<compile_context>
chip_gen: v7x
topology: tpu7x:2x2x1
jax: 0.10.0
libtpu: 0.0.40
codegen_flags: <defaults>
</compile_context>

<pallas_src>
import functools
import math

import jax
import jax.numpy as jnp
from jax.experimental import pallas as pl
from jax.experimental.pallas import tpu as pltpu


TAPS = tuple((oy, ox) for oy in (-1, 0, 1) for ox in (-1, 0, 1))   # tap t = ky*3 + kx


def bottleneck_csp_kernel(
    x_ref,       # (c1p, L)        bf16  input chunk: channels x (imgs*H*W) lanes
    mask_ref,    # (8, 1, L)       f32   validity masks for the 8 non-center 3x3 taps
    w_in_ref,    # (2, c_p, c1p)   bf16  [0]=cv1(+BN), [1]=cv2(+csp-BN half 2)
    w_sq_ref,    # (11, c_p, c_p)  bf16  [0]=m.cv1(+BN), [1..9]=m.cv2 3x3 taps(+BN), [10]=cv3(+csp-BN half 1)
    w_out_ref,   # (2, c2p, c_p)   bf16  cv4(+BN) split along its 2*c_ input channels
    b_c_ref,     # (5, c_p, 1)     f32   [0]=cv1, [1]=m.cv1, [2]=m.cv2, [3]=cv3, [4]=cv2
    b4_ref,      # (c2p, 1)        f32   cv4 bias
    o_ref,       # (c2p, L)        f32
    *, W: int,
):
    bf16 = jnp.bfloat16
    dot = lambda a, b: jnp.dot(a, b, preferred_element_type=jnp.float32)
    relu = lambda t: jnp.maximum(t, 0.0)

    xb = x_ref[...]                                       # (c1p, L) bf16
    L = xb.shape[-1]

    # cv1: 1x1 conv + BN + ReLU
    t1 = relu(dot(w_in_ref[0], xb) + b_c_ref[0])          # (c_p, L) f32

    # Bottleneck.cv1: 1x1 conv + BN + ReLU
    h1 = relu(dot(w_sq_ref[0], t1.astype(bf16)) + b_c_ref[1])
    h1b = h1.astype(bf16)

    # Bottleneck.cv2: 3x3 conv (pad=1) + BN + ReLU, as 9 lane-shifted matmuls.
    acc = dot(w_sq_ref[5], h1b)                           # center tap: no shift, no mask
    mi = 0
    for t, (oy, ox) in enumerate(TAPS):
        if oy == 0 and ox == 0:
            continue
        shift = (-(oy * W + ox)) % L                      # shifted[p] = h1[p + oy*W + ox]
        shifted = pltpu.roll(h1, shift, 1) * mask_ref[mi]
        acc = acc + dot(w_sq_ref[1 + t], shifted.astype(bf16))
        mi += 1
    h2 = relu(acc + b_c_ref[2])

    # Bottleneck residual shortcut
    t2 = t1 + h2

    # cv3 / cv2 (bias-free 1x1) with the standalone BN(2c_) folded per half, LeakyReLU(0.1)
    y1 = dot(w_sq_ref[10], t2.astype(bf16)) + b_c_ref[3]
    y2 = dot(w_in_ref[1], xb) + b_c_ref[4]
    y1 = jnp.where(y1 > 0, y1, 0.1 * y1)
    y2 = jnp.where(y2 > 0, y2, 0.1 * y2)

    # cv4 applied to the channel concat, expressed as two half matmuls (no in-kernel concat)
    out = relu(dot(w_out_ref[0], y1.astype(bf16))
               + dot(w_out_ref[1], y2.astype(bf16)) + b4_ref[...])
    o_ref[...] = out


# ----------------------------------------------------------------------------
# Wrapper
# ----------------------------------------------------------------------------

def _round_up(n, m):
    return ((n + m - 1) // m) * m


def _pad_to(a, shape):
    return jnp.pad(a, [(0, s - d) for s, d in zip(shape, a.shape)])


def _tap_masks(H, W, imgs):
    """(8, 1, imgs*H*W) f32 validity masks for the 8 non-center 3x3 taps."""
    lane = jnp.arange(imgs * H * W, dtype=jnp.int32)
    row = (lane // W) % H            # % H: lanes hold several whole images back-to-back
    col = lane % W
    masks = []
    for oy, ox in TAPS:
        if oy == 0 and ox == 0:
            continue
        masks.append((row + oy >= 0) & (row + oy < H) & (col + ox >= 0) & (col + ox < W))
    return jnp.stack(masks)[:, None, :].astype(jnp.float32)


def bottleneck_csp(x, packed, *, max_chunk_lanes=4096):
    """x: (B, c1, H, W) float32, NCHW.  Returns (B, c2, H, W) float32."""
    B, c1, H, Wd = x.shape
    HW = H * Wd
    c2 = packed["c2"]
    c1p = packed["w_in"].shape[2]
    c2p = packed["w_out"].shape[1]

    # channels -> sublanes, (batch, h, w) -> lanes; zero-pad channels; bf16 MXU operand.
    x2d = jnp.transpose(x, (1, 0, 2, 3)).reshape(c1, B * HW)
    x2d = _pad_to(x2d, (c1p, B * HW)).astype(jnp.bfloat16)

    # Grid iterates over chunks of whole images along the lane axis.  At the tested toy
    # shapes this is a single lane-dense grid step (the layer is launch/DMA-overhead
    # bound); for big batches it gives many steps that pipeline and shard across cores.
    # TODO(synk): for very large H*W (real YOLO strides) add an intra-image row tile with
    # a one-row halo instead of whole-image chunks, so a chunk fits v7x's 64 MiB VMEM.
    imgs_per_chunk = B                                   # fallback: one chunk (full dim)
    for d in range(B, 0, -1):
        lanes = d * HW
        if B % d == 0 and lanes % 128 == 0 and lanes <= max(HW, max_chunk_lanes):
            imgs_per_chunk = d
            break
    num_chunks = B // imgs_per_chunk
    chunk_lanes = imgs_per_chunk * HW

    masks = _tap_masks(H, Wd, imgs_per_chunk)
    kernel = functools.partial(bottleneck_csp_kernel, W=Wd)
    args = (x2d, masks, packed["w_in"], packed["w_sq"], packed["w_out"],
            packed["b_c"], packed["b4"])

    def run(single_buffer_consts):
        const_kw = {"pipeline_mode": pl.Buffered(1)} if single_buffer_consts else {}

        def const_spec(shape):
            n = len(shape)
            return pl.BlockSpec(shape, lambda i: (0,) * n, **const_kw)

        return pl.pallas_call(
            kernel,
            out_shape=jax.ShapeDtypeStruct((c2p, B * HW), jnp.float32),
            grid_spec=pltpu.PrefetchScalarGridSpec(
                num_scalar_prefetch=0,
                grid=(num_chunks,),
                in_specs=[
                    pl.BlockSpec((c1p, chunk_lanes), lambda i: (0, i)),   # x chunk
                    const_spec(masks.shape),                              # tap masks
                    const_spec(packed["w_in"].shape),                     # cv1 / cv2
                    const_spec(packed["w_sq"].shape),                     # m.cv1, 3x3 taps, cv3
                    const_spec(packed["w_out"].shape),                    # cv4 halves
                    const_spec(packed["b_c"].shape),                      # c_-sized biases
                    const_spec(packed["b4"].shape),                       # cv4 bias
                ],
                out_specs=pl.BlockSpec((c2p, chunk_lanes), lambda i: (0, i)),
            ),
            compiler_params=pltpu.CompilerParams(
                dimension_semantics=("parallel",)),
        )(*args)

    try:
        out2d = jax.block_until_ready(run(True))
    except Exception:
        # This JAX/Mosaic build rejects pipeline_mode=pl.Buffered(1); use default buffering.
        out2d = run(False)

    out = out2d[:c2].reshape(c2, B, H, Wd)
    return jnp.transpose(out, (1, 0, 2, 3))


# ----------------------------------------------------------------------------
# Parameter construction: raw PyTorch-style params + BN folding / bf16 packing.
# ----------------------------------------------------------------------------

def init_raw_params(key, c1, c2, e=0.5):
    """PyTorch-style raw parameters for BottleneckCSP(c1, c2, n=1, shortcut=True, e)."""
    c_ = int(c2 * e)
    ks = iter(jax.random.split(key, 32))

    def conv_w(o, i, k=1):
        scale = 1.0 / math.sqrt(i * k * k)
        return jax.random.normal(next(ks), (o, i, k, k), jnp.float32) * scale

    def bn(c):
        g = jax.random.uniform(next(ks), (c,), jnp.float32, 0.5, 1.5)
        b = jax.random.normal(next(ks), (c,), jnp.float32) * 0.1
        m = jax.random.normal(next(ks), (c,), jnp.float32) * 0.1
        v = jax.random.uniform(next(ks), (c,), jnp.float32, 0.5, 1.5)
        return (g, b, m, v)

    raw = {
        "cv1_w": conv_w(c_, c1, 1), "cv1_bn": bn(c_),
        "m_cv1_w": conv_w(c_, c_, 1), "m_cv1_bn": bn(c_),
        "m_cv2_w": conv_w(c_, c_, 3), "m_cv2_bn": bn(c_),
        "cv2_w": conv_w(c_, c1, 1),
        "cv3_w": conv_w(c_, c_, 1),
        "bn": bn(2 * c_),
        "cv4_w": conv_w(c2, 2 * c_, 1), "cv4_bn": bn(c2),
    }
    return raw, c_


def fuse_and_pack_params(raw, c1, c2, c_, eps=1e-5, pad=8):
    """Fold every eval-mode BatchNorm into the preceding conv, zero-pad channels to a
    sublane multiple, cast weights to bf16 and stack them into a few dense inputs."""
    c1p, c_p, c2p = (_round_up(c, pad) for c in (c1, c_, c2))
    bf16 = jnp.bfloat16

    def scale_bias(g, b, m, v):
        s = g / jnp.sqrt(v + eps)
        return s, b - m * s

    def fold_1x1(w, bn):                                  # w: (O, I, 1, 1) -> (O, I), (O,)
        s, bias = scale_bias(*bn)
        return w[:, :, 0, 0] * s[:, None], bias

    w_cv1, b_cv1 = fold_1x1(raw["cv1_w"], raw["cv1_bn"])
    w_m1, b_m1 = fold_1x1(raw["m_cv1_w"], raw["m_cv1_bn"])

    # 3x3 conv + BN -> 9 taps of (c_, c_); tap t = ky*3 + kx  <->  (oy, ox) = (ky-1, kx-1)
    s3, b_m2 = scale_bias(*raw["m_cv2_bn"])
    w3 = raw["m_cv2_w"] * s3[:, None, None, None]
    w_taps = [w3[:, :, ky, kx] for ky in range(3) for kx in range(3)]

    # standalone BN(2c_) applied to cat(y1, y2): folded per-half into bias-free cv3 / cv2
    sb, bb = scale_bias(*raw["bn"])
    w_cv3, b_cv3 = raw["cv3_w"][:, :, 0, 0] * sb[:c_, None], bb[:c_]
    w_cv2, b_cv2 = raw["cv2_w"][:, :, 0, 0] * sb[c_:, None], bb[c_:]

    # cv4 (+ its BN), split along the 2c_ input channels -> no in-kernel concat
    w_cv4, b_cv4 = fold_1x1(raw["cv4_w"], raw["cv4_bn"])

    pw = lambda w, o, i: _pad_to(w, (o, i)).astype(bf16)
    pb = lambda b, o: _pad_to(b, (o,))[:, None].astype(jnp.float32)

    return {
        "w_in": jnp.stack([pw(w_cv1, c_p, c1p), pw(w_cv2, c_p, c1p)]),
        "w_sq": jnp.stack([pw(w_m1, c_p, c_p)] + [pw(w, c_p, c_p) for w in w_taps]
                          + [pw(w_cv3, c_p, c_p)]),
        "w_out": jnp.stack([pw(w_cv4[:, :c_], c2p, c_p), pw(w_cv4[:, c_:], c2p, c_p)]),
        "b_c": jnp.stack([pb(b, c_p) for b in (b_cv1, b_m1, b_m2, b_cv3, b_cv2)]),
        "b4": pb(b_cv4, c2p),
        "c2": c2,
    }


# ----------------------------------------------------------------------------
# Pure-JAX reference (raw params, lax.conv, explicit BN) for validation.
# ----------------------------------------------------------------------------

def reference(x, raw, eps=1e-5):
    def conv(t, w, pad):
        return jax.lax.conv_general_dilated(
            t, w, window_strides=(1, 1), padding=[(pad, pad), (pad, pad)],
            dimension_numbers=("NCHW", "OIHW", "NCHW"))

    def bnorm(t, bn):
        g, b, m, v = bn
        s = g / jnp.sqrt(v + eps)
        return t * s[None, :, None, None] + (b - m * s)[None, :, None, None]

    relu = lambda t: jnp.maximum(t, 0.0)

    t1 = relu(bnorm(conv(x, raw["cv1_w"], 0), raw["cv1_bn"]))            # cv1
    h1 = relu(bnorm(conv(t1, raw["m_cv1_w"], 0), raw["m_cv1_bn"]))       # Bottleneck.cv1
    h2 = relu(bnorm(conv(h1, raw["m_cv2_w"], 1), raw["m_cv2_bn"]))       # Bottleneck.cv2
    t2 = t1 + h2                                                         # shortcut
    y1 = conv(t2, raw["cv3_w"], 0)
    y2 = conv(x, raw["cv2_w"], 0)
    z = bnorm(jnp.concatenate([y1, y2], axis=1), raw["bn"])
    z = jnp.where(z > 0, z, 0.1 * z)                                     # LeakyReLU(0.1)
    return relu(bnorm(conv(z, raw["cv4_w"], 0), raw["cv4_bn"]))          # cv4


if __name__ == "__main__":
    # BottleneckCSP(c1=4, c2=4, n=1, shortcut=True, e=0.5) on x of shape (2, 4, 16, 16).
    B, C1, H, W = 2, 4, 16, 16
    C2 = 4

    key = jax.random.PRNGKey(0)
    kx, kp = jax.random.split(key)
    x = jax.random.normal(kx, (B, C1, H, W), jnp.float32)
    raw, c_ = init_raw_params(kp, C1, C2, e=0.5)
    packed = fuse_and_pack_params(raw, C1, C2, c_)

    out = bottleneck_csp(x, packed)
    out = jax.block_until_ready(out)

    ref = reference(x, raw)
    assert out.shape == (B, C2, H, W)
    max_err = float(jnp.max(jnp.abs(out - ref)))
    scale = float(jnp.max(jnp.abs(ref)))
    # bf16 MXU operands with f32 accumulation -> tolerance scaled to the output magnitude.
    assert max_err <= 0.05 * scale + 1e-3, (
        f"mismatch vs reference, max_err={max_err}, scale={scale}")

    print("KERNEL_OK")
</pallas_src>

<mosaic_0001>
module attributes {stable_mosaic.version = 11 : i64} {
  func.func @bottleneck_csp_kernel(%arg0: i32, %arg1: memref<8x512xbf16, #tpu.memory_space<vmem>>, %arg2: memref<8x1x512xf32, #tpu.memory_space<vmem>>, %arg3: memref<2x8x8xbf16, #tpu.memory_space<vmem>>, %arg4: memref<11x8x8xbf16, #tpu.memory_space<vmem>>, %arg5: memref<2x8x8xbf16, #tpu.memory_space<vmem>>, %arg6: memref<5x8x1xf32, #tpu.memory_space<vmem>>, %arg7: memref<8x1xf32, #tpu.memory_space<vmem>>, %arg8: memref<8x512xf32, #tpu.memory_space<vmem>>) attributes {dimension_semantics = [#tpu.dimension_semantics<parallel>], iteration_bounds = array<i64: 1>, scalar_prefetch = 0 : i64, scratch_operands = 0 : i64, tpu.core_type = #tpu.core_type<tc>, window_params = [{transform_indices = @transform_0, window_bounds = array<i64: 8, 512>}, {pipeline_mode = #tpu.pipeline_mode<synchronous>, transform_indices = @transform_1, window_bounds = array<i64: 8, 1, 512>}, {pipeline_mode = #tpu.pipeline_mode<synchronous>, transform_indices = @transform_2, window_bounds = array<i64: 2, 8, 8>}, {pipeline_mode = #tpu.pipeline_mode<synchronous>, transform_indices = @transform_3, window_bounds = array<i64: 11, 8, 8>}, {pipeline_mode = #tpu.pipeline_mode<synchronous>, transform_indices = @transform_4, window_bounds = array<i64: 2, 8, 8>}, {pipeline_mode = #tpu.pipeline_mode<synchronous>, transform_indices = @transform_5, window_bounds = array<i64: 5, 8, 1>}, {pipeline_mode = #tpu.pipeline_mode<synchronous>, transform_indices = @transform_6, window_bounds = array<i64: 8, 1>}, {transform_indices = @transform_7, window_bounds = array<i64: 8, 512>}]} {
    %c0 = arith.constant 0 : index
    %c0_0 = arith.constant 0 : index
    %0 = vector.load %arg1[%c0, %c0_0] : memref<8x512xbf16, #tpu.memory_space<vmem>>, vector<8x512xbf16>
    %c0_1 = arith.constant 0 : index
    %c0_2 = arith.constant 0 : index
    %c0_3 = arith.constant 0 : index
    %1 = vector.load %arg3[%c0_1, %c0_2, %c0_3] : memref<2x8x8xbf16, #tpu.memory_space<vmem>>, vector<1x8x8xbf16>
    %2 = vector.shape_cast %1 : vector<1x8x8xbf16> to vector<8x8xbf16>
    %cst = arith.constant dense<0.000000e+00> : vector<8x512xf32>
    %3 = tpu.matmul %2, %0, %cst {dimension_numbers = #tpu.dot_dimension_numbers<[1], [0], [0], [1], [0, 0, 1, 1], [], []>} : vector<8x8xbf16>, vector<8x512xbf16>, vector<8x512xf32> -> vector<8x512xf32>
    %c0_4 = arith.constant 0 : index
    %c0_5 = arith.constant 0 : index
    %c0_6 = arith.constant 0 : index
    %4 = vector.load %arg6[%c0_4, %c0_5, %c0_6] : memref<5x8x1xf32, #tpu.memory_space<vmem>>, vector<1x8x1xf32>
    %5 = vector.shape_cast %4 : vector<1x8x1xf32> to vector<8x1xf32>
    %6 = vector.broadcast %5 : vector<8x1xf32> to vector<8x512xf32>
    %7 = arith.addf %3, %6 : vector<8x512xf32>
    %cst_7 = arith.constant 0.000000e+00 : f32
    %8 = vector.broadcast %cst_7 : f32 to vector<8x512xf32>
    %9 = arith.maximumf %7, %8 : vector<8x512xf32>
    %c0_8 = arith.constant 0 : index
    %c0_9 = arith.constant 0 : index
    %c0_10 = arith.constant 0 : index
    %10 = vector.load %arg4[%c0_8, %c0_9, %c0_10] : memref<11x8x8xbf16, #tpu.memory_space<vmem>>, vector<1x8x8xbf16>
    %11 = vector.shape_cast %10 : vector<1x8x8xbf16> to vector<8x8xbf16>
    %12 = arith.truncf %9 : vector<8x512xf32> to vector<8x512xbf16>
    %cst_11 = arith.constant dense<0.000000e+00> : vector<8x512xf32>
    %13 = tpu.matmul %11, %12, %cst_11 {dimension_numbers = #tpu.dot_dimension_numbers<[1], [0], [0], [1], [0, 0, 1, 1], [], []>} : vector<8x8xbf16>, vector<8x512xbf16>, vector<8x512xf32> -> vector<8x512xf32>
    %c1 = arith.constant 1 : index
    %c0_12 = arith.constant 0 : index
    %c0_13 = arith.constant 0 : index
    %14 = vector.load %arg6[%c1, %c0_12, %c0_13] : memref<5x8x1xf32, #tpu.memory_space<vmem>>, vector<1x8x1xf32>
    %15 = vector.shape_cast %14 : vector<1x8x1xf32> to vector<8x1xf32>
    %16 = vector.broadcast %15 : vector<8x1xf32> to vector<8x512xf32>
    %17 = arith.addf %13, %16 : vector<8x512xf32>
    %cst_14 = arith.constant 0.000000e+00 : f32
    %18 = vector.broadcast %cst_14 : f32 to vector<8x512xf32>
    %19 = arith.maximumf %17, %18 : vector<8x512xf32>
    %20 = arith.truncf %19 : vector<8x512xf32> to vector<8x512xbf16>
    %c5 = arith.constant 5 : index
    %c0_15 = arith.constant 0 : index
    %c0_16 = arith.constant 0 : index
    %21 = vector.load %arg4[%c5, %c0_15, %c0_16] : memref<11x8x8xbf16, #tpu.memory_space<vmem>>, vector<1x8x8xbf16>
    %22 = vector.shape_cast %21 : vector<1x8x8xbf16> to vector<8x8xbf16>
    %cst_17 = arith.constant dense<0.000000e+00> : vector<8x512xf32>
    %23 = tpu.matmul %22, %20, %cst_17 {dimension_numbers = #tpu.dot_dimension_numbers<[1], [0], [0], [1], [0, 0, 1, 1], [], []>} : vector<8x8xbf16>, vector<8x512xbf16>, vector<8x512xf32> -> vector<8x512xf32>
    %c17_i32 = arith.constant 17 : i32
    %24 = tpu.dynamic_rotate %19 by %c17_i32 dim 1 : vector<8x512xf32>, i32 -> vector<8x512xf32>
    %c0_18 = arith.constant 0 : index
    %c0_19 = arith.constant 0 : index
    %c0_20 = arith.constant 0 : index
    %25 = vector.load %arg2[%c0_18, %c0_19, %c0_20] : memref<8x1x512xf32, #tpu.memory_space<vmem>>, vector<1x1x512xf32>
    %26 = vector.shape_cast %25 : vector<1x1x512xf32> to vector<1x512xf32>
    %27 = vector.broadcast %26 : vector<1x512xf32> to vector<8x512xf32>
    %28 = arith.mulf %24, %27 : vector<8x512xf32>
    %c1_21 = arith.constant 1 : index
    %c0_22 = arith.constant 0 : index
    %c0_23 = arith.constant 0 : index
    %29 = vector.load %arg4[%c1_21, %c0_22, %c0_23] : memref<11x8x8xbf16, #tpu.memory_space<vmem>>, vector<1x8x8xbf16>
    %30 = vector.shape_cast %29 : vector<1x8x8xbf16> to vector<8x8xbf16>
    %31 = arith.truncf %28 : vector<8x512xf32> to vector<8x512xbf16>
    %cst_24 = arith.constant dense<0.000000e+00> : vector<8x512xf32>
    %32 = tpu.matmul %30, %31, %cst_24 {dimension_numbers = #tpu.dot_dimension_numbers<[1], [0], [0], [1], [0, 0, 1, 1], [], []>} : vector<8x8xbf16>, vector<8x512xbf16>, vector<8x512xf32> -> vector<8x512xf32>
    %33 = arith.addf %23, %32 : vector<8x512xf32>
    %c16_i32 = arith.constant 16 : i32
    %34 = tpu.dynamic_rotate %19 by %c16_i32 dim 1 : vector<8x512xf32>, i32 -> vector<8x512xf32>
    %c1_25 = arith.constant 1 : index
    %c0_26 = arith.constant 0 : index
    %c0_27 = arith.constant 0 : index
    %35 = vector.load %arg2[%c1_25, %c0_26, %c0_27] : memref<8x1x512xf32, #tpu.memory_space<vmem>>, vector<1x1x512xf32>
    %36 = vector.shape_cast %35 : vector<1x1x512xf32> to vector<1x512xf32>
    %37 = vector.broadcast %36 : vector<1x512xf32> to vector<8x512xf32>
    %38 = arith.mulf %34, %37 : vector<8x512xf32>
    %c2 = arith.constant 2 : index
    %c0_28 = arith.constant 0 : index
    %c0_29 = arith.constant 0 : index
    %39 = vector.load %arg4[%c2, %c0_28, %c0_29] : memref<11x8x8xbf16, #tpu.memory_space<vmem>>, vector<1x8x8xbf16>
    %40 = vector.shape_cast %39 : vector<1x8x8xbf16> to vector<8x8xbf16>
    %41 = arith.truncf %38 : vector<8x512xf32> to vector<8x512xbf16>
    %cst_30 = arith.constant dense<0.000000e+00> : vector<8x512xf32>
    %42 = tpu.matmul %40, %41, %cst_30 {dimension_numbers = #tpu.dot_dimension_numbers<[1], [0], [0], [1], [0, 0, 1, 1], [], []>} : vector<8x8xbf16>, vector<8x512xbf16>, vector<8x512xf32> -> vector<8x512xf32>
    %43 = arith.addf %33, %42 : vector<8x512xf32>
    %c15_i32 = arith.constant 15 : i32
    %44 = tpu.dynamic_rotate %19 by %c15_i32 dim 1 : vector<8x512xf32>, i32 -> vector<8x512xf32>
    %c2_31 = arith.constant 2 : index
    %c0_32 = arith.constant 0 : index
    %c0_33 = arith.constant 0 : index
    %45 = vector.load %arg2[%c2_31, %c0_32, %c0_33] : memref<8x1x512xf32, #tpu.memory_space<vmem>>, vector<1x1x512xf32>
    %46 = vector.shape_cast %45 : vector<1x1x512xf32> to vector<1x512xf32>
    %47 = vector.broadcast %46 : vector<1x512xf32> to vector<8x512xf32>
    %48 = arith.mulf %44, %47 : vector<8x512xf32>
    %c3 = arith.constant 3 : index
    %c0_34 = arith.constant 0 : index
    %c0_35 = arith.constant 0 : index
    %49 = vector.load %arg4[%c3, %c0_34, %c0_35] : memref<11x8x8xbf16, #tpu.memory_space<vmem>>, vector<1x8x8xbf16>
    %50 = vector.shape_cast %49 : vector<1x8x8xbf16> to vector<8x8xbf16>
    %51 = arith.truncf %48 : vector<8x512xf32> to vector<8x512xbf16>
    %cst_36 = arith.constant dense<0.000000e+00> : vector<8x512xf32>
    %52 = tpu.matmul %50, %51, %cst_36 {dimension_numbers = #tpu.dot_dimension_numbers<[1], [0], [0], [1], [0, 0, 1, 1], [], []>} : vector<8x8xbf16>, vector<8x512xbf16>, vector<8x512xf32> -> vector<8x512xf32>
    %53 = arith.addf %43, %52 : vector<8x512xf32>
    %c1_i32 = arith.constant 1 : i32
    %54 = tpu.dynamic_rotate %19 by %c1_i32 dim 1 : vector<8x512xf32>, i32 -> vector<8x512xf32>
    %c3_37 = arith.constant 3 : index
    %c0_38 = arith.constant 0 : index
    %c0_39 = arith.constant 0 : index
    %55 = vector.load %arg2[%c3_37, %c0_38, %c0_39] : memref<8x1x512xf32, #tpu.memory_space<vmem>>, vector<1x1x512xf32>
    %56 = vector.shape_cast %55 : vector<1x1x512xf32> to vector<1x512xf32>
    %57 = vector.broadcast %56 : vector<1x512xf32> to vector<8x512xf32>
    %58 = arith.mulf %54, %57 : vector<8x512xf32>
    %c4 = arith.constant 4 : index
    %c0_40 = arith.constant 0 : index
    %c0_41 = arith.constant 0 : index
    %59 = vector.load %arg4[%c4, %c0_40, %c0_41] : memref<11x8x8xbf16, #tpu.memory_space<vmem>>, vector<1x8x8xbf16>
    %60 = vector.shape_cast %59 : vector<1x8x8xbf16> to vector<8x8xbf16>
    %61 = arith.truncf %58 : vector<8x512xf32> to vector<8x512xbf16>
    %cst_42 = arith.constant dense<0.000000e+00> : vector<8x512xf32>
    %62 = tpu.matmul %60, %61, %cst_42 {dimension_numbers = #tpu.dot_dimension_numbers<[1], [0], [0], [1], [0, 0, 1, 1], [], []>} : vector<8x8xbf16>, vector<8x512xbf16>, vector<8x512xf32> -> vector<8x512xf32>
    %63 = arith.addf %53, %62 : vector<8x512xf32>
    %c511_i32 = arith.constant 511 : i32
    %64 = tpu.dynamic_rotate %19 by %c511_i32 dim 1 : vector<8x512xf32>, i32 -> vector<8x512xf32>
    %c4_43 = arith.constant 4 : index
    %c0_44 = arith.constant 0 : index
    %c0_45 = arith.constant 0 : index
    %65 = vector.load %arg2[%c4_43, %c0_44, %c0_45] : memref<8x1x512xf32, #tpu.memory_space<vmem>>, vector<1x1x512xf32>
    %66 = vector.shape_cast %65 : vector<1x1x512xf32> to vector<1x512xf32>
    %67 = vector.broadcast %66 : vector<1x512xf32> to vector<8x512xf32>
    %68 = arith.mulf %64, %67 : vector<8x512xf32>
    %c6 = arith.constant 6 : index
    %c0_46 = arith.constant 0 : index
    %c0_47 = arith.constant 0 : index
    %69 = vector.load %arg4[%c6, %c0_46, %c0_47] : memref<11x8x8xbf16, #tpu.memory_space<vmem>>, vector<1x8x8xbf16>
    %70 = vector.shape_cast %69 : vector<1x8x8xbf16> to vector<8x8xbf16>
    %71 = arith.truncf %68 : vector<8x512xf32> to vector<8x512xbf16>
    %cst_48 = arith.constant dense<0.000000e+00> : vector<8x512xf32>
    %72 = tpu.matmul %70, %71, %cst_48 {dimension_numbers = #tpu.dot_dimension_numbers<[1], [0], [0], [1], [0, 0, 1, 1], [], []>} : vector<8x8xbf16>, vector<8x512xbf16>, vector<8x512xf32> -> vector<8x512xf32>
    %73 = arith.addf %63, %72 : vector<8x512xf32>
    %c497_i32 = arith.constant 497 : i32
    %74 = tpu.dynamic_rotate %19 by %c497_i32 dim 1 : vector<8x512xf32>, i32 -> vector<8x512xf32>
    %c5_49 = arith.constant 5 : index
    %c0_50 = arith.constant 0 : index
    %c0_51 = arith.constant 0 : index
    %75 = vector.load %arg2[%c5_49, %c0_50, %c0_51] : memref<8x1x512xf32, #tpu.memory_space<vmem>>, vector<1x1x512xf32>
    %76 = vector.shape_cast %75 : vector<1x1x512xf32> to vector<1x512xf32>
    %77 = vector.broadcast %76 : vector<1x512xf32> to vector<8x512xf32>
    %78 = arith.mulf %74, %77 : vector<8x512xf32>
    %c7 = arith.constant 7 : index
    %c0_52 = arith.constant 0 : index
    %c0_53 = arith.constant 0 : index
    %79 = vector.load %arg4[%c7, %c0_52, %c0_53] : memref<11x8x8xbf16, #tpu.memory_space<vmem>>, vector<1x8x8xbf16>
    %80 = vector.shape_cast %79 : vector<1x8x8xbf16> to vector<8x8xbf16>
    %81 = arith.truncf %78 : vector<8x512xf32> to vector<8x512xbf16>
    %cst_54 = arith.constant dense<0.000000e+00> : vector<8x512xf32>
    %82 = tpu.matmul %80, %81, %cst_54 {dimension_numbers = #tpu.dot_dimension_numbers<[1], [0], [0], [1], [0, 0, 1, 1], [], []>} : vector<8x8xbf16>, vector<8x512xbf16>, vector<8x512xf32> -> vector<8x512xf32>
    %83 = arith.addf %73, %82 : vector<8x512xf32>
    %c496_i32 = arith.constant 496 : i32
    %84 = tpu.dynamic_rotate %19 by %c496_i32 dim 1 : vector<8x512xf32>, i32 -> vector<8x512xf32>
    %c6_55 = arith.constant 6 : index
    %c0_56 = arith.constant 0 : index
    %c0_57 = arith.constant 0 : index
    %85 = vector.load %arg2[%c6_55, %c0_56, %c0_57] : memref<8x1x512xf32, #tpu.memory_space<vmem>>, vector<1x1x512xf32>
    %86 = vector.shape_cast %85 : vector<1x1x512xf32> to vector<1x512xf32>
    %87 = vector.broadcast %86 : vector<1x512xf32> to vector<8x512xf32>
    %88 = arith.mulf %84, %87 : vector<8x512xf32>
    %c8 = arith.constant 8 : index
    %c0_58 = arith.constant 0 : index
    %c0_59 = arith.constant 0 : index
    %89 = vector.load %arg4[%c8, %c0_58, %c0_59] : memref<11x8x8xbf16, #tpu.memory_space<vmem>>, vector<1x8x8xbf16>
    %90 = vector.shape_cast %89 : vector<1x8x8xbf16> to vector<8x8xbf16>
    %91 = arith.truncf %88 : vector<8x512xf32> to vector<8x512xbf16>
    %cst_60 = arith.constant dense<0.000000e+00> : vector<8x512xf32>
    %92 = tpu.matmul %90, %91, %cst_60 {dimension_numbers = #tpu.dot_dimension_numbers<[1], [0], [0], [1], [0, 0, 1, 1], [], []>} : vector<8x8xbf16>, vector<8x512xbf16>, vector<8x512xf32> -> vector<8x512xf32>
    %93 = arith.addf %83, %92 : vector<8x512xf32>
    %c495_i32 = arith.constant 495 : i32
    %94 = tpu.dynamic_rotate %19 by %c495_i32 dim 1 : vector<8x512xf32>, i32 -> vector<8x512xf32>
    %c7_61 = arith.constant 7 : index
    %c0_62 = arith.constant 0 : index
    %c0_63 = arith.constant 0 : index
    %95 = vector.load %arg2[%c7_61, %c0_62, %c0_63] : memref<8x1x512xf32, #tpu.memory_space<vmem>>, vector<1x1x512xf32>
    %96 = vector.shape_cast %95 : vector<1x1x512xf32> to vector<1x512xf32>
    %97 = vector.broadcast %96 : vector<1x512xf32> to vector<8x512xf32>
    %98 = arith.mulf %94, %97 : vector<8x512xf32>
    %c9 = arith.constant 9 : index
    %c0_64 = arith.constant 0 : index
    %c0_65 = arith.constant 0 : index
    %99 = vector.load %arg4[%c9, %c0_64, %c0_65] : memref<11x8x8xbf16, #tpu.memory_space<vmem>>, vector<1x8x8xbf16>
    %100 = vector.shape_cast %99 : vector<1x8x8xbf16> to vector<8x8xbf16>
    %101 = arith.truncf %98 : vector<8x512xf32> to vector<8x512xbf16>
    %cst_66 = arith.constant dense<0.000000e+00> : vector<8x512xf32>
    %102 = tpu.matmul %100, %101, %cst_66 {dimension_numbers = #tpu.dot_dimension_numbers<[1], [0], [0], [1], [0, 0, 1, 1], [], []>} : vector<8x8xbf16>, vector<8x512xbf16>, vector<8x512xf32> -> vector<8x512xf32>
    %103 = arith.addf %93, %102 : vector<8x512xf32>
    %c2_67 = arith.constant 2 : index
    %c0_68 = arith.constant 0 : index
    %c0_69 = arith.constant 0 : index
    %104 = vector.load %arg6[%c2_67, %c0_68, %c0_69] : memref<5x8x1xf32, #tpu.memory_space<vmem>>, vector<1x8x1xf32>
    %105 = vector.shape_cast %104 : vector<1x8x1xf32> to vector<8x1xf32>
    %106 = vector.broadcast %105 : vector<8x1xf32> to vector<8x512xf32>
    %107 = arith.addf %103, %106 : vector<8x512xf32>
    %cst_70 = arith.constant 0.000000e+00 : f32
    %108 = vector.broadcast %cst_70 : f32 to vector<8x512xf32>
    %109 = arith.maximumf %107, %108 : vector<8x512xf32>
    %110 = arith.addf %9, %109 : vector<8x512xf32>
    %c10 = arith.constant 10 : index
    %c0_71 = arith.constant 0 : index
    %c0_72 = arith.constant 0 : index
    %111 = vector.load %arg4[%c10, %c0_71, %c0_72] : memref<11x8x8xbf16, #tpu.memory_space<vmem>>, vector<1x8x8xbf16>
    %112 = vector.shape_cast %111 : vector<1x8x8xbf16> to vector<8x8xbf16>
    %113 = arith.truncf %110 : vector<8x512xf32> to vector<8x512xbf16>
    %cst_73 = arith.constant dense<0.000000e+00> : vector<8x512xf32>
    %114 = tpu.matmul %112, %113, %cst_73 {dimension_numbers = #tpu.dot_dimension_numbers<[1], [0], [0], [1], [0, 0, 1, 1], [], []>} : vector<8x8xbf16>, vector<8x512xbf16>, vector<8x512xf32> -> vector<8x512xf32>
    %c3_74 = arith.constant 3 : index
    %c0_75 = arith.constant 0 : index
    %c0_76 = arith.constant 0 : index
    %115 = vector.load %arg6[%c3_74, %c0_75, %c0_76] : memref<5x8x1xf32, #tpu.memory_space<vmem>>, vector<1x8x1xf32>
    %116 = vector.shape_cast %115 : vector<1x8x1xf32> to vector<8x1xf32>
    %117 = vector.broadcast %116 : vector<8x1xf32> to vector<8x512xf32>
    %118 = arith.addf %114, %117 : vector<8x512xf32>
    %c1_77 = arith.constant 1 : index
    %c0_78 = arith.constant 0 : index
    %c0_79 = arith.constant 0 : index
    %119 = vector.load %arg3[%c1_77, %c0_78, %c0_79] : memref<2x8x8xbf16, #tpu.memory_space<vmem>>, vector<1x8x8xbf16>
    %120 = vector.shape_cast %119 : vector<1x8x8xbf16> to vector<8x8xbf16>
    %cst_80 = arith.constant dense<0.000000e+00> : vector<8x512xf32>
    %121 = tpu.matmul %120, %0, %cst_80 {dimension_numbers = #tpu.dot_dimension_numbers<[1], [0], [0], [1], [0, 0, 1, 1], [], []>} : vector<8x8xbf16>, vector<8x512xbf16>, vector<8x512xf32> -> vector<8x512xf32>
    %c4_81 = arith.constant 4 : index
    %c0_82 = arith.constant 0 : index
    %c0_83 = arith.constant 0 : index
    %122 = vector.load %arg6[%c4_81, %c0_82, %c0_83] : memref<5x8x1xf32, #tpu.memory_space<vmem>>, vector<1x8x1xf32>
    %123 = vector.shape_cast %122 : vector<1x8x1xf32> to vector<8x1xf32>
    %124 = vector.broadcast %123 : vector<8x1xf32> to vector<8x512xf32>
    %125 = arith.addf %121, %124 : vector<8x512xf32>
    %cst_84 = arith.constant 0.000000e+00 : f32
    %126 = vector.broadcast %cst_84 : f32 to vector<8x512xf32>
    %127 = arith.cmpf ogt, %118, %126 : vector<8x512xf32>
    %cst_85 = arith.constant 1.000000e-01 : f32
    %128 = vector.broadcast %cst_85 : f32 to vector<8x512xf32>
    %129 = arith.mulf %128, %118 : vector<8x512xf32>
    %130 = arith.select %127, %118, %129 : vector<8x512xi1>, vector<8x512xf32>
    %cst_86 = arith.constant 0.000000e+00 : f32
    %131 = vector.broadcast %cst_86 : f32 to vector<8x512xf32>
    %132 = arith.cmpf ogt, %125, %131 : vector<8x512xf32>
    %cst_87 = arith.constant 1.000000e-01 : f32
    %133 = vector.broadcast %cst_87 : f32 to vector<8x512xf32>
    %134 = arith.mulf %133, %125 : vector<8x512xf32>
    %135 = arith.select %132, %125, %134 : vector<8x512xi1>, vector<8x512xf32>
    %c0_88 = arith.constant 0 : index
    %c0_89 = arith.constant 0 : index
    %c0_90 = arith.constant 0 : index
    %136 = vector.load %arg5[%c0_88, %c0_89, %c0_90] : memref<2x8x8xbf16, #tpu.memory_space<vmem>>, vector<1x8x8xbf16>
    %137 = vector.shape_cast %136 : vector<1x8x8xbf16> to vector<8x8xbf16>
    %138 = arith.truncf %130 : vector<8x512xf32> to vector<8x512xbf16>
    %cst_91 = arith.constant dense<0.000000e+00> : vector<8x512xf32>
    %139 = tpu.matmul %137, %138, %cst_91 {dimension_numbers = #tpu.dot_dimension_numbers<[1], [0], [0], [1], [0, 0, 1, 1], [], []>} : vector<8x8xbf16>, vector<8x512xbf16>, vector<8x512xf32> -> vector<8x512xf32>
    %c1_92 = arith.constant 1 : index
    %c0_93 = arith.constant 0 : index
    %c0_94 = arith.constant 0 : index
    %140 = vector.load %arg5[%c1_92, %c0_93, %c0_94] : memref<2x8x8xbf16, #tpu.memory_space<vmem>>, vector<1x8x8xbf16>
    %141 = vector.shape_cast %140 : vector<1x8x8xbf16> to vector<8x8xbf16>
    %142 = arith.truncf %135 : vector<8x512xf32> to vector<8x512xbf16>
    %cst_95 = arith.constant dense<0.000000e+00> : vector<8x512xf32>
    %143 = tpu.matmul %141, %142, %cst_95 {dimension_numbers = #tpu.dot_dimension_numbers<[1], [0], [0], [1], [0, 0, 1, 1], [], []>} : vector<8x8xbf16>, vector<8x512xbf16>, vector<8x512xf32> -> vector<8x512xf32>
    %144 = arith.addf %139, %143 : vector<8x512xf32>
    %c0_96 = arith.constant 0 : index
    %c0_97 = arith.constant 0 : index
    %145 = vector.load %arg7[%c0_96, %c0_97] : memref<8x1xf32, #tpu.memory_space<vmem>>, vector<8x1xf32>
    %146 = vector.broadcast %145 : vector<8x1xf32> to vector<8x512xf32>
    %147 = arith.addf %144, %146 : vector<8x512xf32>
    %cst_98 = arith.constant 0.000000e+00 : f32
    %148 = vector.broadcast %cst_98 : f32 to vector<8x512xf32>
    %149 = arith.maximumf %147, %148 : vector<8x512xf32>
    %c0_99 = arith.constant 0 : index
    %c0_100 = arith.constant 0 : index
    %150 = vector.load %arg8[%c0_99, %c0_100] : memref<8x512xf32, #tpu.memory_space<vmem>>, vector<8x512xf32>
    tpu.vector_store %arg8[%c0_99, %c0_100], %149 {strides = array<i32>} : memref<8x512xf32, #tpu.memory_space<vmem>>, vector<8x512xf32>,
    return
  }
  func.func @transform_0(%arg0: i32) -> (i32, i32) {
    %c0_i32 = arith.constant 0 : i32
    %c0_i32_0 = arith.constant 0 : i32
    return %c0_i32, %arg0 : i32, i32
  }
  func.func @transform_1(%arg0: i32) -> (i32, i32, i32) {
    %c0_i32 = arith.constant 0 : i32
    %c0_i32_0 = arith.constant 0 : i32
    %c0_i32_1 = arith.constant 0 : i32
    %c0_i32_2 = arith.constant 0 : i32
    return %c0_i32, %c0_i32_0, %c0_i32_1 : i32, i32, i32
  }
  func.func @transform_2(%arg0: i32) -> (i32, i32, i32) {
    %c0_i32 = arith.constant 0 : i32
    %c0_i32_0 = arith.constant 0 : i32
    %c0_i32_1 = arith.constant 0 : i32
    %c0_i32_2 = arith.constant 0 : i32
    return %c0_i32, %c0_i32_0, %c0_i32_1 : i32, i32, i32
  }
  func.func @transform_3(%arg0: i32) -> (i32, i32, i32) {
    %c0_i32 = arith.constant 0 : i32
    %c0_i32_0 = arith.constant 0 : i32
    %c0_i32_1 = arith.constant 0 : i32
    %c0_i32_2 = arith.constant 0 : i32
    return %c0_i32, %c0_i32_0, %c0_i32_1 : i32, i32, i32
  }
  func.func @transform_4(%arg0: i32) -> (i32, i32, i32) {
    %c0_i32 = arith.constant 0 : i32
    %c0_i32_0 = arith.constant 0 : i32
    %c0_i32_1 = arith.constant 0 : i32
    %c0_i32_2 = arith.constant 0 : i32
    return %c0_i32, %c0_i32_0, %c0_i32_1 : i32, i32, i32
  }
  func.func @transform_5(%arg0: i32) -> (i32, i32, i32) {
    %c0_i32 = arith.constant 0 : i32
    %c0_i32_0 = arith.constant 0 : i32
    %c0_i32_1 = arith.constant 0 : i32
    %c0_i32_2 = arith.constant 0 : i32
    return %c0_i32, %c0_i32_0, %c0_i32_1 : i32, i32, i32
  }
  func.func @transform_6(%arg0: i32) -> (i32, i32) {
    %c0_i32 = arith.constant 0 : i32
    %c0_i32_0 = arith.constant 0 : i32
    %c0_i32_1 = arith.constant 0 : i32
    return %c0_i32, %c0_i32_0 : i32, i32
  }
  func.func @transform_7(%arg0: i32) -> (i32, i32) {
    %c0_i32 = arith.constant 0 : i32
    %c0_i32_0 = arith.constant 0 : i32
    return %c0_i32, %arg0 : i32, i32
  }
}

module attributes {stable_mosaic.version = 11 : i64} {
  func.func @bottleneck_csp_kernel(%arg0: i32, %arg1: memref<8x512xbf16, #tpu.memory_space<vmem>>, %arg2: memref<8x1x512xf32, #tpu.memory_space<vmem>>, %arg3: memref<2x8x8xbf16, #tpu.memory_space<vmem>>, %arg4: memref<11x8x8xbf16, #tpu.memory_space<vmem>>, %arg5: memref<2x8x8xbf16, #tpu.memory_space<vmem>>, %arg6: memref<5x8x1xf32, #tpu.memory_space<vmem>>, %arg7: memref<8x1xf32, #tpu.memory_space<vmem>>, %arg8: memref<8x512xf32, #tpu.memory_space<vmem>>) attributes {dimension_semantics = [#tpu.dimension_semantics<parallel>], iteration_bounds = array<i64: 1>, scalar_prefetch = 0 : i64, scratch_operands = 0 : i64, tpu.core_type = #tpu.core_type<tc>, window_params = [{transform_indices = @transform_0, window_bounds = array<i64: 8, 512>}, {pipeline_mode = #tpu.pipeline_mode<synchronous>, transform_indices = @transform_1, window_bounds = array<i64: 8, 1, 512>}, {pipeline_mode = #tpu.pipeline_mode<synchronous>, transform_indices = @transform_2, window_bounds = array<i64: 2, 8, 8>}, {pipeline_mode = #tpu.pipeline_mode<synchronous>, transform_indices = @transform_3, window_bounds = array<i64: 11, 8, 8>}, {pipeline_mode = #tpu.pipeline_mode<synchronous>, transform_indices = @transform_4, window_bounds = array<i64: 2, 8, 8>}, {pipeline_mode = #tpu.pipeline_mode<synchronous>, transform_indices = @transform_5, window_bounds = array<i64: 5, 8, 1>}, {pipeline_mode = #tpu.pipeline_mode<synchronous>, transform_indices = @transform_6, window_bounds = array<i64: 8, 1>}, {transform_indices = @transform_7, window_bounds = array<i64: 8, 512>}]} {
    %c0 = arith.constant 0 : index
    %c0_0 = arith.constant 0 : index
    %0 = vector.load %arg1[%c0, %c0_0] : memref<8x512xbf16, #tpu.memory_space<vmem>>, vector<8x512xbf16>
    %c0_1 = arith.constant 0 : index
    %c0_2 = arith.constant 0 : index
    %c0_3 = arith.constant 0 : index
    %1 = vector.load %arg3[%c0_1, %c0_2, %c0_3] : memref<2x8x8xbf16, #tpu.memory_space<vmem>>, vector<1x8x8xbf16>
    %2 = vector.shape_cast %1 : vector<1x8x8xbf16> to vector<8x8xbf16>
    %cst = arith.constant dense<0.000000e+00> : vector<8x512xf32>
    %3 = tpu.matmul %2, %0, %cst {dimension_numbers = #tpu.dot_dimension_numbers<[1], [0], [0], [1], [0, 0, 1, 1], [], []>} : vector<8x8xbf16>, vector<8x512xbf16>, vector<8x512xf32> -> vector<8x512xf32>
    %c0_4 = arith.constant 0 : index
    %c0_5 = arith.constant 0 : index
    %c0_6 = arith.constant 0 : index
    %4 = vector.load %arg6[%c0_4, %c0_5, %c0_6] : memref<5x8x1xf32, #tpu.memory_space<vmem>>, vector<1x8x1xf32>
    %5 = vector.shape_cast %4 : vector<1x8x1xf32> to vector<8x1xf32>
    %6 = vector.broadcast %5 : vector<8x1xf32> to vector<8x512xf32>
    %7 = arith.addf %3, %6 : vector<8x512xf32>
    %cst_7 = arith.constant 0.000000e+00 : f32
    %8 = vector.broadcast %cst_7 : f32 to vector<8x512xf32>
    %9 = arith.maximumf %7, %8 : vector<8x512xf32>
    %c0_8 = arith.constant 0 : index
    %c0_9 = arith.constant 0 : index
    %c0_10 = arith.constant 0 : index
    %10 = vector.load %arg4[%c0_8, %c0_9, %c0_10] : memref<11x8x8xbf16, #tpu.memory_space<vmem>>, vector<1x8x8xbf16>
    %11 = vector.shape_cast %10 : vector<1x8x8xbf16> to vector<8x8xbf16>
    %12 = arith.truncf %9 : vector<8x512xf32> to vector<8x512xbf16>
    %cst_11 = arith.constant dense<0.000000e+00> : vector<8x512xf32>
    %13 = tpu.matmul %11, %12, %cst_11 {dimension_numbers = #tpu.dot_dimension_numbers<[1], [0], [0], [1], [0, 0, 1, 1], [], []>} : vector<8x8xbf16>, vector<8x512xbf16>, vector<8x512xf32> -> vector<8x512xf32>
    %c1 = arith.constant 1 : index
    %c0_12 = arith.constant 0 : index
    %c0_13 = arith.constant 0 : index
    %14 = vector.load %arg6[%c1, %c0_12, %c0_13] : memref<5x8x1xf32, #tpu.memory_space<vmem>>, vector<1x8x1xf32>
    %15 = vector.shape_cast %14 : vector<1x8x1xf32> to vector<8x1xf32>
    %16 = vector.broadcast %15 : vector<8x1xf32> to vector<8x512xf32>
    %17 = arith.addf %13, %16 : vector<8x512xf32>
    %cst_14 = arith.constant 0.000000e+00 : f32
    %18 = vector.broadcast %cst_14 : f32 to vector<8x512xf32>
    %19 = arith.maximumf %17, %18 : vector<8x512xf32>
    %20 = arith.truncf %19 : vector<8x512xf32> to vector<8x512xbf16>
    %c5 = arith.constant 5 : index
    %c0_15 = arith.constant 0 : index
    %c0_16 = arith.constant 0 : index
    %21 = vector.load %arg4[%c5, %c0_15, %c0_16] : memref<11x8x8xbf16, #tpu.memory_space<vmem>>, vector<1x8x8xbf16>
    %22 = vector.shape_cast %21 : vector<1x8x8xbf16> to vector<8x8xbf16>
    %cst_17 = arith.constant dense<0.000000e+00> : vector<8x512xf32>
    %23 = tpu.matmul %22, %20, %cst_17 {dimension_numbers = #tpu.dot_dimension_numbers<[1], [0], [0], [1], [0, 0, 1, 1], [], []>} : vector<8x8xbf16>, vector<8x512xbf16>, vector<8x512xf32> -> vector<8x512xf32>
    %c17_i32 = arith.constant 17 : i32
    %24 = tpu.dynamic_rotate %19 by %c17_i32 dim 1 : vector<8x512xf32>, i32 -> vector<8x512xf32>
    %c0_18 = arith.constant 0 : index
    %c0_19 = arith.constant 0 : index
    %c0_20 = arith.constant 0 : index
    %25 = vector.load %arg2[%c0_18, %c0_19, %c0_20] : memref<8x1x512xf32, #tpu.memory_space<vmem>>, vector<1x1x512xf32>
    %26 = vector.shape_cast %25 : vector<1x1x512xf32> to vector<1x512xf32>
    %27 = vector.broadcast %26 : vector<1x512xf32> to vector<8x512xf32>
    %28 = arith.mulf %24, %27 : vector<8x512xf32>
    %c1_21 = arith.constant 1 : index
    %c0_22 = arith.constant 0 : index
    %c0_23 = arith.constant 0 : index
    %29 = vector.load %arg4[%c1_21, %c0_22, %c0_23] : memref<11x8x8xbf16, #tpu.memory_space<vmem>>, vector<1x8x8xbf16>
    %30 = vector.shape_cast %29 : vector<1x8x8xbf16> to vector<8x8xbf16>
    %31 = arith.truncf %28 : vector<8x512xf32> to vector<8x512xbf16>
    %cst_24 = arith.constant dense<0.000000e+00> : vector<8x512xf32>
    %32 = tpu.matmul %30, %31, %cst_24 {dimension_numbers = #tpu.dot_dimension_numbers<[1], [0], [0], [1], [0, 0, 1, 1], [], []>} : vector<8x8xbf16>, vector<8x512xbf16>, vector<8x512xf32> -> vector<8x512xf32>
    %33 = arith.addf %23, %32 : vector<8x512xf32>
    %c16_i32 = arith.constant 16 : i32
    %34 = tpu.dynamic_rotate %19 by %c16_i32 dim 1 : vector<8x512xf32>, i32 -> vector<8x512xf32>
    %c1_25 = arith.constant 1 : index
    %c0_26 = arith.constant 0 : index
    %c0_27 = arith.constant 0 : index
    %35 = vector.load %arg2[%c1_25, %c0_26, %c0_27] : memref<8x1x512xf32, #tpu.memory_space<vmem>>, vector<1x1x512xf32>
    %36 = vector.shape_cast %35 : vector<1x1x512xf32> to vector<1x512xf32>
    %37 = vector.broadcast %36 : vector<1x512xf32> to vector<8x512xf32>
    %38 = arith.mulf %34, %37 : vector<8x512xf32>
    %c2 = arith.constant 2 : index
    %c0_28 = arith.constant 0 : index
    %c0_29 = arith.constant 0 : index
    %39 = vector.load %arg4[%c2, %c0_28, %c0_29] : memref<11x8x8xbf16, #tpu.memory_space<vmem>>, vector<1x8x8xbf16>
    %40 = vector.shape_cast %39 : vector<1x8x8xbf16> to vector<8x8xbf16>
    %41 = arith.truncf %38 : vector<8x512xf32> to vector<8x512xbf16>
    %cst_30 = arith.constant dense<0.000000e+00> : vector<8x512xf32>
    %42 = tpu.matmul %40, %41, %cst_30 {dimension_numbers = #tpu.dot_dimension_numbers<[1], [0], [0], [1], [0, 0, 1, 1], [], []>} : vector<8x8xbf16>, vector<8x512xbf16>, vector<8x512xf32> -> vector<8x512xf32>
    %43 = arith.addf %33, %42 : vector<8x512xf32>
    %c15_i32 = arith.constant 15 : i32
    %44 = tpu.dynamic_rotate %19 by %c15_i32 dim 1 : vector<8x512xf32>, i32 -> vector<8x512xf32>
    %c2_31 = arith.constant 2 : index
    %c0_32 = arith.constant 0 : index
    %c0_33 = arith.constant 0 : index
    %45 = vector.load %arg2[%c2_31, %c0_32, %c0_33] : memref<8x1x512xf32, #tpu.memory_space<vmem>>, vector<1x1x512xf32>
    %46 = vector.shape_cast %45 : vector<1x1x512xf32> to vector<1x512xf32>
    %47 = vector.broadcast %46 : vector<1x512xf32> to vector<8x512xf32>
    %48 = arith.mulf %44, %47 : vector<8x512xf32>
    %c3 = arith.constant 3 : index
    %c0_34 = arith.constant 0 : index
    %c0_35 = arith.constant 0 : index
    %49 = vector.load %arg4[%c3, %c0_34, %c0_35] : memref<11x8x8xbf16, #tpu.memory_space<vmem>>, vector<1x8x8xbf16>
    %50 = vector.shape_cast %49 : vector<1x8x8xbf16> to vector<8x8xbf16>
    %51 = arith.truncf %48 : vector<8x512xf32> to vector<8x512xbf16>
    %cst_36 = arith.constant dense<0.000000e+00> : vector<8x512xf32>
    %52 = tpu.matmul %50, %51, %cst_36 {dimension_numbers = #tpu.dot_dimension_numbers<[1], [0], [0], [1], [0, 0, 1, 1], [], []>} : vector<8x8xbf16>, vector<8x512xbf16>, vector<8x512xf32> -> vector<8x512xf32>
    %53 = arith.addf %43, %52 : vector<8x512xf32>
    %c1_i32 = arith.constant 1 : i32
    %54 = tpu.dynamic_rotate %19 by %c1_i32 dim 1 : vector<8x512xf32>, i32 -> vector<8x512xf32>
    %c3_37 = arith.constant 3 : index
    %c0_38 = arith.constant 0 : index
    %c0_39 = arith.constant 0 : index
    %55 = vector.load %arg2[%c3_37, %c0_38, %c0_39] : memref<8x1x512xf32, #tpu.memory_space<vmem>>, vector<1x1x512xf32>
    %56 = vector.shape_cast %55 : vector<1x1x512xf32> to vector<1x512xf32>
    %57 = vector.broadcast %56 : vector<1x512xf32> to vector<8x512xf32>
    %58 = arith.mulf %54, %57 : vector<8x512xf32>
    %c4 = arith.constant 4 : index
    %c0_40 = arith.constant 0 : index
    %c0_41 = arith.constant 0 : index
    %59 = vector.load %arg4[%c4, %c0_40, %c0_41] : memref<11x8x8xbf16, #tpu.memory_space<vmem>>, vector<1x8x8xbf16>
    %60 = vector.shape_cast %59 : vector<1x8x8xbf16> to vector<8x8xbf16>
    %61 = arith.truncf %58 : vector<8x512xf32> to vector<8x512xbf16>
    %cst_42 = arith.constant dense<0.000000e+00> : vector<8x512xf32>
    %62 = tpu.matmul %60, %61, %cst_42 {dimension_numbers = #tpu.dot_dimension_numbers<[1], [0], [0], [1], [0, 0, 1, 1], [], []>} : vector<8x8xbf16>, vector<8x512xbf16>, vector<8x512xf32> -> vector<8x512xf32>
    %63 = arith.addf %53, %62 : vector<8x512xf32>
    %c511_i32 = arith.constant 511 : i32
    %64 = tpu.dynamic_rotate %19 by %c511_i32 dim 1 : vector<8x512xf32>, i32 -> vector<8x512xf32>
    %c4_43 = arith.constant 4 : index
    %c0_44 = arith.constant 0 : index
    %c0_45 = arith.constant 0 : index
    %65 = vector.load %arg2[%c4_43, %c0_44, %c0_45] : memref<8x1x512xf32, #tpu.memory_space<vmem>>, vector<1x1x512xf32>
    %66 = vector.shape_cast %65 : vector<1x1x512xf32> to vector<1x512xf32>
    %67 = vector.broadcast %66 : vector<1x512xf32> to vector<8x512xf32>
    %68 = arith.mulf %64, %67 : vector<8x512xf32>
    %c6 = arith.constant 6 : index
    %c0_46 = arith.constant 0 : index
    %c0_47 = arith.constant 0 : index
    %69 = vector.load %arg4[%c6, %c0_46, %c0_47] : memref<11x8x8xbf16, #tpu.memory_space<vmem>>, vector<1x8x8xbf16>
    %70 = vector.shape_cast %69 : vector<1x8x8xbf16> to vector<8x8xbf16>
    %71 = arith.truncf %68 : vector<8x512xf32> to vector<8x512xbf16>
    %cst_48 = arith.constant dense<0.000000e+00> : vector<8x512xf32>
    %72 = tpu.matmul %70, %71, %cst_48 {dimension_numbers = #tpu.dot_dimension_numbers<[1], [0], [0], [1], [0, 0, 1, 1], [], []>} : vector<8x8xbf16>, vector<8x512xbf16>, vector<8x512xf32> -> vector<8x512xf32>
    %73 = arith.addf %63, %72 : vector<8x512xf32>
    %c497_i32 = arith.constant 497 : i32
    %74 = tpu.dynamic_rotate %19 by %c497_i32 dim 1 : vector<8x512xf32>, i32 -> vector<8x512xf32>
    %c5_49 = arith.constant 5 : index
    %c0_50 = arith.constant 0 : index
    %c0_51 = arith.constant 0 : index
    %75 = vector.load %arg2[%c5_49, %c0_50, %c0_51] : memref<8x1x512xf32, #tpu.memory_space<vmem>>, vector<1x1x512xf32>
    %76 = vector.shape_cast %75 : vector<1x1x512xf32> to vector<1x512xf32>
    %77 = vector.broadcast %76 : vector<1x512xf32> to vector<8x512xf32>
    %78 = arith.mulf %74, %77 : vector<8x512xf32>
    %c7 = arith.constant 7 : index
    %c0_52 = arith.constant 0 : index
    %c0_53 = arith.constant 0 : index
    %79 = vector.load %arg4[%c7, %c0_52, %c0_53] : memref<11x8x8xbf16, #tpu.memory_space<vmem>>, vector<1x8x8xbf16>
    %80 = vector.shape_cast %79 : vector<1x8x8xbf16> to vector<8x8xbf16>
    %81 = arith.truncf %78 : vector<8x512xf32> to vector<8x512xbf16>
    %cst_54 = arith.constant dense<0.000000e+00> : vector<8x512xf32>
    %82 = tpu.matmul %80, %81, %cst_54 {dimension_numbers = #tpu.dot_dimension_numbers<[1], [0], [0], [1], [0, 0, 1, 1], [], []>} : vector<8x8xbf16>, vector<8x512xbf16>, vector<8x512xf32> -> vector<8x512xf32>
    %83 = arith.addf %73, %82 : vector<8x512xf32>
    %c496_i32 = arith.constant 496 : i32
    %84 = tpu.dynamic_rotate %19 by %c496_i32 dim 1 : vector<8x512xf32>, i32 -> vector<8x512xf32>
    %c6_55 = arith.constant 6 : index
    %c0_56 = arith.constant 0 : index
    %c0_57 = arith.constant 0 : index
    %85 = vector.load %arg2[%c6_55, %c0_56, %c0_57] : memref<8x1x512xf32, #tpu.memory_space<vmem>>, vector<1x1x512xf32>
    %86 = vector.shape_cast %85 : vector<1x1x512xf32> to vector<1x512xf32>
    %87 = vector.broadcast %86 : vector<1x512xf32> to vector<8x512xf32>
    %88 = arith.mulf %84, %87 : vector<8x512xf32>
    %c8 = arith.constant 8 : index
    %c0_58 = arith.constant 0 : index
    %c0_59 = arith.constant 0 : index
    %89 = vector.load %arg4[%c8, %c0_58, %c0_59] : memref<11x8x8xbf16, #tpu.memory_space<vmem>>, vector<1x8x8xbf16>
    %90 = vector.shape_cast %89 : vector<1x8x8xbf16> to vector<8x8xbf16>
    %91 = arith.truncf %88 : vector<8x512xf32> to vector<8x512xbf16>
    %cst_60 = arith.constant dense<0.000000e+00> : vector<8x512xf32>
    %92 = tpu.matmul %90, %91, %cst_60 {dimension_numbers = #tpu.dot_dimension_numbers<[1], [0], [0], [1], [0, 0, 1, 1], [], []>} : vector<8x8xbf16>, vector<8x512xbf16>, vector<8x512xf32> -> vector<8x512xf32>
    %93 = arith.addf %83, %92 : vector<8x512xf32>
    %c495_i32 = arith.constant 495 : i32
    %94 = tpu.dynamic_rotate %19 by %c495_i32 dim 1 : vector<8x512xf32>, i32 -> vector<8x512xf32>
    %c7_61 = arith.constant 7 : index
    %c0_62 = arith.constant 0 : index
    %c0_63 = arith.constant 0 : index
    %95 = vector.load %arg2[%c7_61, %c0_62, %c0_63] : memref<8x1x512xf32, #tpu.memory_space<vmem>>, vector<1x1x512xf32>
    %96 = vector.shape_cast %95 : vector<1x1x512xf32> to vector<1x512xf32>
    %97 = vector.broadcast %96 : vector<1x512xf32> to vector<8x512xf32>
    %98 = arith.mulf %94, %97 : vector<8x512xf32>
    %c9 = arith.constant 9 : index
    %c0_64 = arith.constant 0 : index
    %c0_65 = arith.constant 0 : index
    %99 = vector.load %arg4[%c9, %c0_64, %c0_65] : memref<11x8x8xbf16, #tpu.memory_space<vmem>>, vector<1x8x8xbf16>
    %100 = vector.shape_cast %99 : vector<1x8x8xbf16> to vector<8x8xbf16>
    %101 = arith.truncf %98 : vector<8x512xf32> to vector<8x512xbf16>
    %cst_66 = arith.constant dense<0.000000e+00> : vector<8x512xf32>
    %102 = tpu.matmul %100, %101, %cst_66 {dimension_numbers = #tpu.dot_dimension_numbers<[1], [0], [0], [1], [0, 0, 1, 1], [], []>} : vector<8x8xbf16>, vector<8x512xbf16>, vector<8x512xf32> -> vector<8x512xf32>
    %103 = arith.addf %93, %102 : vector<8x512xf32>
    %c2_67 = arith.constant 2 : index
    %c0_68 = arith.constant 0 : index
    %c0_69 = arith.constant 0 : index
    %104 = vector.load %arg6[%c2_67, %c0_68, %c0_69] : memref<5x8x1xf32, #tpu.memory_space<vmem>>, vector<1x8x1xf32>
    %105 = vector.shape_cast %104 : vector<1x8x1xf32> to vector<8x1xf32>
    %106 = vector.broadcast %105 : vector<8x1xf32> to vector<8x512xf32>
    %107 = arith.addf %103, %106 : vector<8x512xf32>
    %cst_70 = arith.constant 0.000000e+00 : f32
    %108 = vector.broadcast %cst_70 : f32 to vector<8x512xf32>
    %109 = arith.maximumf %107, %108 : vector<8x512xf32>
    %110 = arith.addf %9, %109 : vector<8x512xf32>
    %c10 = arith.constant 10 : index
    %c0_71 = arith.constant 0 : index
    %c0_72 = arith.constant 0 : index
    %111 = vector.load %arg4[%c10, %c0_71, %c0_72] : memref<11x8x8xbf16, #tpu.memory_space<vmem>>, vector<1x8x8xbf16>
    %112 = vector.shape_cast %111 : vector<1x8x8xbf16> to vector<8x8xbf16>
    %113 = arith.truncf %110 : vector<8x512xf32> to vector<8x512xbf16>
    %cst_73 = arith.constant dense<0.000000e+00> : vector<8x512xf32>
    %114 = tpu.matmul %112, %113, %cst_73 {dimension_numbers = #tpu.dot_dimension_numbers<[1], [0], [0], [1], [0, 0, 1, 1], [], []>} : vector<8x8xbf16>, vector<8x512xbf16>, vector<8x512xf32> -> vector<8x512xf32>
    %c3_74 = arith.constant 3 : index
    %c0_75 = arith.constant 0 : index
    %c0_76 = arith.constant 0 : index
    %115 = vector.load %arg6[%c3_74, %c0_75, %c0_76] : memref<5x8x1xf32, #tpu.memory_space<vmem>>, vector<1x8x1xf32>
    %116 = vector.shape_cast %115 : vector<1x8x1xf32> to vector<8x1xf32>
    %117 = vector.broadcast %116 : vector<8x1xf32> to vector<8x512xf32>
    %118 = arith.addf %114, %117 : vector<8x512xf32>
    %c1_77 = arith.constant 1 : index
    %c0_78 = arith.constant 0 : index
    %c0_79 = arith.constant 0 : index
    %119 = vector.load %arg3[%c1_77, %c0_78, %c0_79] : memref<2x8x8xbf16, #tpu.memory_space<vmem>>, vector<1x8x8xbf16>
    %120 = vector.shape_cast %119 : vector<1x8x8xbf16> to vector<8x8xbf16>
    %cst_80 = arith.constant dense<0.000000e+00> : vector<8x512xf32>
    %121 = tpu.matmul %120, %0, %cst_80 {dimension_numbers = #tpu.dot_dimension_numbers<[1], [0], [0], [1], [0, 0, 1, 1], [], []>} : vector<8x8xbf16>, vector<8x512xbf16>, vector<8x512xf32> -> vector<8x512xf32>
    %c4_81 = arith.constant 4 : index
    %c0_82 = arith.constant 0 : index
    %c0_83 = arith.constant 0 : index
    %122 = vector.load %arg6[%c4_81, %c0_82, %c0_83] : memref<5x8x1xf32, #tpu.memory_space<vmem>>, vector<1x8x1xf32>
    %123 = vector.shape_cast %122 : vector<1x8x1xf32> to vector<8x1xf32>
    %124 = vector.broadcast %123 : vector<8x1xf32> to vector<8x512xf32>
    %125 = arith.addf %121, %124 : vector<8x512xf32>
    %cst_84 = arith.constant 0.000000e+00 : f32
    %126 = vector.broadcast %cst_84 : f32 to vector<8x512xf32>
    %127 = arith.cmpf ogt, %118, %126 : vector<8x512xf32>
    %cst_85 = arith.constant 1.000000e-01 : f32
    %128 = vector.broadcast %cst_85 : f32 to vector<8x512xf32>
    %129 = arith.mulf %128, %118 : vector<8x512xf32>
    %130 = arith.select %127, %118, %129 : vector<8x512xi1>, vector<8x512xf32>
    %cst_86 = arith.constant 0.000000e+00 : f32
    %131 = vector.broadcast %cst_86 : f32 to vector<8x512xf32>
    %132 = arith.cmpf ogt, %125, %131 : vector<8x512xf32>
    %cst_87 = arith.constant 1.000000e-01 : f32
    %133 = vector.broadcast %cst_87 : f32 to vector<8x512xf32>
    %134 = arith.mulf %133, %125 : vector<8x512xf32>
    %135 = arith.select %132, %125, %134 : vector<8x512xi1>, vector<8x512xf32>
    %c0_88 = arith.constant 0 : index
    %c0_89 = arith.constant 0 : index
    %c0_90 = arith.constant 0 : index
    %136 = vector.load %arg5[%c0_88, %c0_89, %c0_90] : memref<2x8x8xbf16, #tpu.memory_space<vmem>>, vector<1x8x8xbf16>
    %137 = vector.shape_cast %136 : vector<1x8x8xbf16> to vector<8x8xbf16>
    %138 = arith.truncf %130 : vector<8x512xf32> to vector<8x512xbf16>
    %cst_91 = arith.constant dense<0.000000e+00> : vector<8x512xf32>
    %139 = tpu.matmul %137, %138, %cst_91 {dimension_numbers = #tpu.dot_dimension_numbers<[1], [0], [0], [1], [0, 0, 1, 1], [], []>} : vector<8x8xbf16>, vector<8x512xbf16>, vector<8x512xf32> -> vector<8x512xf32>
    %c1_92 = arith.constant 1 : index
    %c0_93 = arith.constant 0 : index
    %c0_94 = arith.constant 0 : index
    %140 = vector.load %arg5[%c1_92, %c0_93, %c0_94] : memref<2x8x8xbf16, #tpu.memory_space<vmem>>, vector<1x8x8xbf16>
    %141 = vector.shape_cast %140 : vector<1x8x8xbf16> to vector<8x8xbf16>
    %142 = arith.truncf %135 : vector<8x512xf32> to vector<8x512xbf16>
    %cst_95 = arith.constant dense<0.000000e+00> : vector<8x512xf32>
    %143 = tpu.matmul %141, %142, %cst_95 {dimension_numbers = #tpu.dot_dimension_numbers<[1], [0], [0], [1], [0, 0, 1, 1], [], []>} : vector<8x8xbf16>, vector<8x512xbf16>, vector<8x512xf32> -> vector<8x512xf32>
    %144 = arith.addf %139, %143 : vector<8x512xf32>
    %c0_96 = arith.constant 0 : index
    %c0_97 = arith.constant 0 : index
    %145 = vector.load %arg7[%c0_96, %c0_97] : memref<8x1xf32, #tpu.memory_space<vmem>>, vector<8x1xf32>
    %146 = vector.broadcast %145 : vector<8x1xf32> to vector<8x512xf32>
    %147 = arith.addf %144, %146 : vector<8x512xf32>
    %cst_98 = arith.constant 0.000000e+00 : f32
    %148 = vector.broadcast %cst_98 : f32 to vector<8x512xf32>
    %149 = arith.maximumf %147, %148 : vector<8x512xf32>
    %c0_99 = arith.constant 0 : index
    %c0_100 = arith.constant 0 : index
    %150 = vector.load %arg8[%c0_99, %c0_100] : memref<8x512xf32, #tpu.memory_space<vmem>>, vector<8x512xf32>
    tpu.vector_store %arg8[%c0_99, %c0_100], %149 {strides = array<i32>} : memref<8x512xf32, #tpu.memory_space<vmem>>, vector<8x512xf32>,
    return
  }
  func.func @transform_0(%arg0: i32) -> (i32, i32) {
    %c0_i32 = arith.constant 0 : i32
    %c0_i32_0 = arith.constant 0 : i32
    return %c0_i32, %arg0 : i32, i32
  }
  func.func @transform_1(%arg0: i32) -> (i32, i32, i32) {
    %c0_i32 = arith.constant 0 : i32
    %c0_i32_0 = arith.constant 0 : i32
    %c0_i32_1 = arith.constant 0 : i32
    %c0_i32_2 = arith.constant 0 : i32
    return %c0_i32, %c0_i32_0, %c0_i32_1 : i32, i32, i32
  }
  func.func @transform_2(%arg0: i32) -> (i32, i32, i32) {
    %c0_i32 = arith.constant 0 : i32
    %c0_i32_0 = arith.constant 0 : i32
    %c0_i32_1 = arith.constant 0 : i32
    %c0_i32_2 = arith.constant 0 : i32
    return %c0_i32, %c0_i32_0, %c0_i32_1 : i32, i32, i32
  }
  func.func @transform_3(%arg0: i32) -> (i32, i32, i32) {
    %c0_i32 = arith.constant 0 : i32
    %c0_i32_0 = arith.constant 0 : i32
    %c0_i32_1 = arith.constant 0 : i32
    %c0_i32_2 = arith.constant 0 : i32
    return %c0_i32, %c0_i32_0, %c0_i32_1 : i32, i32, i32
  }
  func.func @transform_4(%arg0: i32) -> (i32, i32, i32) {
    %c0_i32 = arith.constant 0 : i32
    %c0_i32_0 = arith.constant 0 : i32
    %c0_i32_1 = arith.constant 0 : i32
    %c0_i32_2 = arith.constant 0 : i32
    return %c0_i32, %c0_i32_0, %c0_i32_1 : i32, i32, i32
  }
  func.func @transform_5(%arg0: i32) -> (i32, i32, i32) {
    %c0_i32 = arith.constant 0 : i32
    %c0_i32_0 = arith.constant 0 : i32
    %c0_i32_1 = arith.constant 0 : i32
    %c0_i32_2 = arith.constant 0 : i32
    return %c0_i32, %c0_i32_0, %c0_i32_1 : i32, i32, i32
  }
  func.func @transform_6(%arg0: i32) -> (i32, i32) {
    %c0_i32 = arith.constant 0 : i32
    %c0_i32_0 = arith.constant 0 : i32
    %c0_i32_1 = arith.constant 0 : i32
    return %c0_i32, %c0_i32_0 : i32, i32
  }
  func.func @transform_7(%arg0: i32) -> (i32, i32) {
    %c0_i32 = arith.constant 0 : i32
    %c0_i32_0 = arith.constant 0 : i32
    return %c0_i32, %arg0 : i32, i32
  }
}

</mosaic_0001>

<bundles_post_ra>
// kernel: tpu_custom_call.1
= control target key start
LH: loop header
LB: loop body
LE: loop exit
PB: predicated region body
PF: predicated region fallthrough
CT: control target
= control target key end

     0   :  { %vm51_vm0 = vcmask 1043456   ;;  %v2150_v6 = vmov 0   ;;  %s2625_s0 = inlined_call_operand.vmem [shape: bf16[8,512], index: 0, kind: input, shape index: {}]   ;;  %s2626_s1 = inlined_call_operand.vmem [shape: f32[8,1,512], index: 1, kind: input, shape index: {}]   ;;  %s2627_s2 = inlined_call_operand.vmem [shape: bf16[2,8,8], index: 2, kind: input, shape index: {}]   ;;  %s2628_s3 = inlined_call_operand.vmem [shape: bf16[11,8,8], index: 3, kind: input, shape index: {}]   ;;  %s2629_s4 = inlined_call_operand.vmem [shape: bf16[2,8,8], index: 4, kind: input, shape index: {}]   ;;  %s2630_s5 = inlined_call_operand.vmem [shape: f32[5,8,1], index: 5, kind: input, shape index: {}]   ;;  %s2631_s6 = inlined_call_operand.vmem [shape: f32[8,1], index: 6, kind: input, shape index: {}]   ;;  %s2632_s7 = inlined_call_operand.hbm [shape: f32[8,512], index: 7, kind: output, shape index: {}]  }
   0x1   :  { %v28_v0 = vld [vmem:[%s2625_s0] sm:$0xff]  ;;  %v29_v1 = vld [vmem:[%s2625_s0 + $0x8] sm:$0xff]  ;;  %96 = vmatprep.mubr.bf16.mxu0 %v2150_v6 }
   0x2   :  { %v2206_v2 = vcombine.high %v28_v0, %v28_v0  ;;  %v2208_v3 = vcombine.high %v29_v1, %v29_v1  ;;  %v2023_v4 = vcombine.low %v28_v0, %v28_v0  ;;  %v2025_v5 = vcombine.low %v29_v1, %v29_v1 }
   0x3   :  { %12 = vsyncpa [#allocation3], 0  ;;  %137 = vmatprep.mubr.bf16.mxu1 %v2150_v6  ;;  %2120 = vset.pattern.permute.xlu0 %v2150_v6  ;;  %v31_v7 = vld [vmem:[%s2630_s5] sm:$0xff]  ;;  %vm47_vm1 = vcmask 64512   ;;  %v2031_v11 = vld [vmem:[%s2630_s5 + $0x8] sm:$0xff]  ;;  %s2151_s12 = smov 17   ;;  %v277_v55 = vlaneseq }
   0x4   :  { %2027 = vmatprep.subr.msk.bf16.mxu0 %vm51_vm0, %v2206_v2  ;;  %2029 = vmatprep.subr.msk.bf16.mxu1 %vm51_vm0, %v2208_v3  ;;  %v2221_v8 = vsel %vm51_vm0, %v2023_v4, 0  ;;  %v2224_v9 = vsel %vm51_vm0, %v2025_v5, 0  ;;  %v30_v10 = vld [vmem:[%s2627_s2] sm:$0xf]  ;;  %s2152_s13 = smov 16   ;;  %s2153_s14 = smov 15  }
   0x5   :  { %65 = vmatpush1.bf16.msra.mxu0 %v2221_v8  ;;  %106 = vmatpush1.bf16.msra.mxu1 %v2224_v9  ;;  %v150_v35 = vld [vmem:[%s2628_s3] sm:$0xf]  ;;  %s2154_s15 = smov 1   ;;  %s2155_s16 = smov 127   ;;  %v2088_v53 = vld [vmem:[%s2630_s5 + $0x10] sm:$0xff]  ;;  %v2090_v54 = vld [vmem:[%s2630_s5 + $0x18] sm:$0xff] }
   0x6   :  { %34 = vperm.xlu0 %2120, %v31_v7   ;;  %2121 = vset.pattern.permute.xlu1 %v2150_v6  ;;  %s2156_s17 = smov 113   ;;  %s2157_s18 = smov 112   ;;  %v287_v56 = vshrl.u32 %v277_v55, 7  ;;  %v2312_v57 = vand.u32 127, %v277_v55  ;;  %v284_v60 = vld [vmem:[%s2626_s1] sm:$0xf] }
   0x7   :  { %s2158_s19 = smov 111  }
   0x8   :  { %2028 = vmatmul.mubr.msk.bf16.vlgmr.msra.gmra.mrb[0].mxu0 %vm47_vm1, %v30_v10  ;;  %2030 = vmatmul.mubr.msk.bf16.vlgmr.msra.gmra.mrb[0].mxu1 %vm47_vm1, %v30_v10  ;;  %v2314_v58 = vsub.s32 1, %v287_v56  ;;  %v2316_v59 = vsub.s32 2, %v287_v56  ;;  %vm279_vm2 = vcmp.lt.s32.totalorder %v2312_v57, 17  ;;  %v2324_v1 = vsub.s32 0, %v287_v56 }
   0x9   :  { %209 = vmatprep.mubr.bf16.mxu0 %v2150_v6  ;;  %250 = vmatprep.mubr.bf16.mxu1 %v2150_v6  ;;  %v2326_v4 = vsub.s32 3, %v287_v56  ;;  %vm518_vm3 = vcmp.lt.s32.totalorder %v2312_v57, 16  ;;  %vm665_vm4 = vcmp.lt.s32.totalorder %v2312_v57, 15  ;;  %vm812_vm5 = vcmp.lt.s32.totalorder %v2312_v57, 1 }
   0xa   :  { %159 = vperm.xlu0 %2120, %v2031_v11   ;;  %v293_v63 = vrot.slane %v284_v60, %v2314_v58  ;;  %v297_v0 = vrot.slane %v284_v60, %v2316_v59  ;;  %vm959_vm6 = vcmp.lt.s32.totalorder %v2312_v57, 127  ;;  %vm1106_vm7 = vcmp.lt.s32.totalorder %v2312_v57, 113 }
   0xb   :  { %vm1253_vm8 = vcmp.lt.s32.totalorder %v2312_v57, 112  ;;  %vm1400_vm9 = vcmp.lt.s32.totalorder %v2312_v57, 111 }
  0x85   :  { %v35_v12 = vpop.permute.xlu0 %34 }
  0x89   :  { %v160_v36 = vpop.permute.xlu0 %159 }
  0xdb   :  { %v98_v13 = vpop.f32.mrb[0].mxu0  ;;  %v139_v14 = vpop.f32.mrb[0].mxu1 }
  0xdc   :  { %v99_v15 = vadd.f32 %v98_v13, %v35_v12  ;;  %v140_v16 = vadd.f32 %v139_v14, %v35_v12  ;;  %v100_v17 = vpop.f32.mrb[1].mxu0  ;;  %v141_v18 = vpop.f32.mrb[1].mxu1  ;;  %v289_v14 = vrot.slane %v284_v60, %v2324_v1 }
  0xdd   :  { %v101_v19 = vadd.f32 %v100_v17, %v35_v12  ;;  %v142_v20 = vadd.f32 %v141_v18, %v35_v12  ;;  %v102_v21 = vpop.f32.mrb[2].mxu0  ;;  %v143_v22 = vpop.f32.mrb[2].mxu1 }
  0xde   :  { %v2239_v23 = vmax.f32 %v99_v15, 0.0  ;;  %v2241_v24 = vmax.f32 %v140_v16, 0.0  ;;  %v103_v25 = vpop.f32.mrb[3].mxu0  ;;  %v144_v26 = vpop.f32.mrb[3].mxu1  ;;  %v301_v15 = vrot.slane %v284_v60, %v2326_v4  ;;  %v2046_v16 = vld [vmem:[%s2626_s1 + $0x4] sm:$0xf] }
  0xdf   :  { %v2243_v27 = vmax.f32 %v101_v19, 0.0  ;;  %v2245_v28 = vmax.f32 %v142_v20, 0.0 }
  0xe0   :  { %v151_v29 = vpack.c.bf16 %v2239_v23, %v2239_v23  ;;  %v153_v30 = vpack.c.bf16 %v2241_v24, %v2241_v24 }
  0xe1   :  { %v152_v31 = vpack.c.bf16 %v2243_v27, %v2243_v27  ;;  %v154_v32 = vpack.c.bf16 %v2245_v28, %v2245_v28 }
  0xe2   :  { %v166_v33 = vsel %vm51_vm0, %v151_v29, 0  ;;  %v172_v34 = vsel %vm51_vm0, %v153_v30, 0  ;;  %v533_v29 = vrot.slane %v2046_v16, %v2314_v58  ;;  %v537_v30 = vrot.slane %v2046_v16, %v2316_v59 }
  0xe3   :  { %2032 = vmatprep.subr.msk.bf16.mxu0 %vm51_vm0, %v152_v31  ;;  %2034 = vmatprep.subr.msk.bf16.mxu1 %vm51_vm0, %v154_v32 }
  0xe4   :  { %178 = vmatpush1.bf16.msra.mxu0 %v166_v33  ;;  %219 = vmatpush1.bf16.msra.mxu1 %v172_v34 }
  0xe7   :  { %2033 = vmatmul.mubr.msk.bf16.vlgmr.msra.gmra.mrb[4].mxu0 %vm47_vm1, %v150_v35  ;;  %2035 = vmatmul.mubr.msk.bf16.vlgmr.msra.gmra.mrb[4].mxu1 %vm47_vm1, %v150_v35 }
  0xe8   :  { %363 = vmatprep.mubr.bf16.mxu0 %v2150_v6  ;;  %404 = vmatprep.mubr.bf16.mxu1 %v2150_v6 }
 0x1ba   :  { %v211_v37 = vpop.f32.mrb[4].mxu0  ;;  %v252_v38 = vpop.f32.mrb[4].mxu1 }
 0x1bb   :  { %v212_v39 = vadd.f32 %v211_v37, %v160_v36  ;;  %v253_v40 = vadd.f32 %v252_v38, %v160_v36  ;;  %v213_v41 = vpop.f32.mrb[5].mxu0  ;;  %v254_v42 = vpop.f32.mrb[5].mxu1 }
 0x1bc   :  { %v215_v43 = vpop.f32.mrb[6].mxu0  ;;  %v256_v44 = vpop.f32.mrb[6].mxu1  ;;  %v214_v47 = vadd.f32 %v213_v41, %v160_v36  ;;  %v255_v51 = vadd.f32 %v254_v42, %v160_v36  ;;  %v541_v41 = vrot.slane %v2046_v16, %v2326_v4 }
 0x1bd   :  { %v2266_v45 = vmax.f32 %v212_v39, 0.0  ;;  %v2268_v46 = vmax.f32 %v253_v40, 0.0  ;;  %v216_v48 = vpop.f32.mrb[7].mxu0  ;;  %v257_v49 = vpop.f32.mrb[7].mxu1  ;;  %v529_v40 = vrot.slane %v2046_v16, %v2324_v1  ;;  %v2058_v16 = vld [vmem:[%s2626_s1 + $0xc] sm:$0xf] }
 0x1be   :  { %v2272_v50 = vmax.f32 %v214_v47, 0.0  ;;  %v2276_v52 = vmax.f32 %v255_v51, 0.0  ;;  %v2037_v47 = vld [vmem:[%s2628_s3 + $0x4] sm:$0xf] }
 0x1bf   :  { %273 = vrot.lane.b32.xlu0 %v2268_v46, %s2151_s12  ;;  %269 = vrot.lane.b32.xlu1 %v2266_v45, %s2151_s12  ;;  %v263_v31 = vpack.c.bf16 %v2266_v45, %v2266_v45  ;;  %v265_v37 = vpack.c.bf16 %v2268_v46, %v2268_v46 }
 0x1c0   :  { %v264_v36 = vpack.c.bf16 %v2272_v50, %v2272_v50  ;;  %v266_v39 = vpack.c.bf16 %v2276_v52, %v2276_v52 }
 0x1c1   :  { %v423_v51 = vsel %vm51_vm0, %v265_v37, 0  ;;  %v831_v37 = vrot.slane %v2058_v16, %v2316_v59 }
 0x1c3   :  { %510 = vrot.lane.b32.xlu0 %v2266_v45, %s2152_s13  ;;  %271 = vrot.lane.b32.xlu1 %v2272_v50, %s2151_s12 }
 0x1c7   :  { %514 = vrot.lane.b32.xlu0 %v2268_v46, %s2152_s13  ;;  %275 = vrot.lane.b32.xlu1 %v2276_v52, %s2151_s12 }
 0x1cb   :  { %657 = vrot.lane.b32.xlu0 %v2266_v45, %s2153_s14  ;;  %512 = vrot.lane.b32.xlu1 %v2272_v50, %s2152_s13 }
 0x1cf   :  { %661 = vrot.lane.b32.xlu0 %v2268_v46, %s2153_s14  ;;  %516 = vrot.lane.b32.xlu1 %v2276_v52, %s2152_s13 }
 0x1d3   :  { %804 = vrot.lane.b32.xlu0 %v2266_v45, %s2154_s15  ;;  %659 = vrot.lane.b32.xlu1 %v2272_v50, %s2153_s14 }
 0x1d7   :  { %808 = vrot.lane.b32.xlu0 %v2268_v46, %s2154_s15  ;;  %663 = vrot.lane.b32.xlu1 %v2276_v52, %s2153_s14 }
 0x1db   :  { %951 = vrot.lane.b32.xlu0 %v2266_v45, %s2155_s16  ;;  %806 = vrot.lane.b32.xlu1 %v2272_v50, %s2154_s15 }
 0x1df   :  { %955 = vrot.lane.b32.xlu0 %v2268_v46, %s2155_s16  ;;  %810 = vrot.lane.b32.xlu1 %v2276_v52, %s2154_s15 }
 0x1e3   :  { %1098 = vrot.lane.b32.xlu0 %v2266_v45, %s2156_s17  ;;  %953 = vrot.lane.b32.xlu1 %v2272_v50, %s2155_s16 }
 0x1e7   :  { %1102 = vrot.lane.b32.xlu0 %v2268_v46, %s2156_s17  ;;  %957 = vrot.lane.b32.xlu1 %v2276_v52, %s2155_s16 }
 0x1eb   :  { %1245 = vrot.lane.b32.xlu0 %v2266_v45, %s2157_s18  ;;  %1100 = vrot.lane.b32.xlu1 %v2272_v50, %s2156_s17 }
 0x1ef   :  { %1249 = vrot.lane.b32.xlu0 %v2268_v46, %s2157_s18  ;;  %1104 = vrot.lane.b32.xlu1 %v2276_v52, %s2156_s17 }
 0x1f3   :  { %1392 = vrot.lane.b32.xlu0 %v2266_v45, %s2158_s19  ;;  %1247 = vrot.lane.b32.xlu1 %v2272_v50, %s2157_s18 }
 0x1f7   :  { %1396 = vrot.lane.b32.xlu0 %v2268_v46, %s2158_s19  ;;  %1251 = vrot.lane.b32.xlu1 %v2276_v52, %s2157_s18  ;;  %v2052_v46 = vld [vmem:[%s2626_s1 + $0x8] sm:$0xf] }
 0x1f8   :  { %v680_v55 = vrot.slane %v2052_v46, %v2314_v58 }
 0x1fb   :  { %1543 = vperm.xlu0 %2120, %v2088_v53   ;;  %1394 = vrot.lane.b32.xlu1 %v2272_v50, %s2158_s19  ;;  %v417_v50 = vsel %vm51_vm0, %v263_v31, 0 }
 0x1ff   :  { %1568 = vperm.xlu0 %2120, %v2090_v54   ;;  %1398 = vrot.lane.b32.xlu1 %v2276_v52, %s2158_s19 }
 0x231   :  { %v274_v61 = vpop.permute.xlu0 %273  ;;  %v270_v62 = vpop.permute.xlu1 %269 }
 0x235   :  { %v511_v5 = vpop.permute.xlu0 %510  ;;  %v272_v7 = vpop.permute.xlu1 %271 }
 0x236   :  { %v281_v10 = vsel %vm279_vm2, %v272_v7, %v274_v61  ;;  %v282_v11 = vsel %vm279_vm2, %v270_v62, %v272_v7 }
 0x237   :  { %v307_v12 = vmul.f32 %v293_v63, %v282_v11  ;;  %v308_v13 = vmul.f32 %v297_v0, %v281_v10  ;;  %v676_v10 = vrot.slane %v2052_v46, %v2324_v1  ;;  %v688_v11 = vrot.slane %v2052_v46, %v2326_v4 }
 0x239   :  { %v313_v17 = vpack.c.bf16 %v307_v12, %v307_v12  ;;  %v515_v18 = vpop.permute.xlu0 %514  ;;  %v276_v19 = vpop.permute.xlu1 %275  ;;  %v314_v22 = vpack.c.bf16 %v308_v13, %v308_v13 }
 0x23a   :  { %v280_v20 = vsel %vm279_vm2, %v274_v61, %v276_v19  ;;  %v283_v21 = vsel %vm279_vm2, %v276_v19, %v270_v62 }
 0x23b   :  { %v306_v25 = vmul.f32 %v289_v14, %v283_v21  ;;  %v309_v26 = vmul.f32 %v301_v15, %v280_v20  ;;  %2038 = vmatprep.subr.msk.bf16.mxu0 %vm51_vm0, %v313_v17  ;;  %v326_v45 = vsel %vm51_vm0, %v314_v22, 0  ;;  %v2036_v17 = vld [vmem:[%s2628_s3 + $0x14] sm:$0xf] }
 0x23d   :  { %v312_v32 = vpack.c.bf16 %v306_v25, %v306_v25  ;;  %v315_v33 = vpack.c.bf16 %v309_v26, %v309_v26  ;;  %v658_v34 = vpop.permute.xlu0 %657  ;;  %v513_v35 = vpop.permute.xlu1 %512  ;;  %v827_v26 = vrot.slane %v2058_v16, %v2314_v58 }
 0x23e   :  { %v521_v38 = vsel %vm518_vm3, %v511_v5, %v513_v35  ;;  %v520_v42 = vsel %vm518_vm3, %v513_v35, %v515_v18 }
 0x23f   :  { %v547_v43 = vmul.f32 %v533_v29, %v521_v38  ;;  %2040 = vmatprep.subr.msk.bf16.mxu1 %vm51_vm0, %v315_v33  ;;  %v320_v44 = vsel %vm51_vm0, %v312_v32, 0  ;;  %v548_v52 = vmul.f32 %v537_v30, %v520_v42  ;;  %v835_v42 = vrot.slane %v2058_v16, %v2326_v4 }
 0x240   :  { %332 = vmatpush1.bf16.msra.mxu0 %v320_v44  ;;  %373 = vmatpush1.bf16.msra.mxu1 %v326_v45  ;;  %v2047_v45 = vld [vmem:[%s2628_s3 + $0x8] sm:$0xf] }
 0x241   :  { %v662_v48 = vpop.permute.xlu0 %661  ;;  %2042 = vmatprep.subr.msk.bf16.mxu0 %vm51_vm0, %v264_v36  ;;  %2044 = vmatprep.subr.msk.bf16.mxu1 %vm51_vm0, %v266_v39  ;;  %v517_v49 = vpop.permute.xlu1 %516  ;;  %v553_v56 = vpack.c.bf16 %v547_v43, %v547_v43  ;;  %v554_v12 = vpack.c.bf16 %v548_v52, %v548_v52  ;;  %v2064_v43 = vld [vmem:[%s2626_s1 + $0x10] sm:$0xf] }
 0x242   :  { %v519_v53 = vsel %vm518_vm3, %v515_v18, %v517_v49  ;;  %v522_v54 = vsel %vm518_vm3, %v517_v49, %v511_v5  ;;  %v684_v5 = vrot.slane %v2052_v46, %v2316_v59  ;;  %v974_v52 = vrot.slane %v2064_v43, %v2314_v58 }
 0x243   :  { %v546_v60 = vmul.f32 %v529_v40, %v522_v54  ;;  %v549_v61 = vmul.f32 %v541_v41, %v519_v53  ;;  %2039 = vmatmul.mubr.msk.bf16.vlgmr.msra.gmra.mrb[8].mxu0 %vm47_vm1, %v2037_v47  ;;  %2041 = vmatmul.mubr.msk.bf16.vlgmr.msra.gmra.mrb[8].mxu1 %vm47_vm1, %v2037_v47  ;;  %v566_v32 = vsel %vm51_vm0, %v554_v12, 0  ;;  %v823_v41 = vrot.slane %v2058_v16, %v2324_v1 }
 0x244   :  { %429 = vmatpush1.bf16.msra.mxu0 %v417_v50  ;;  %470 = vmatpush1.bf16.msra.mxu1 %v423_v51 }
 0x245   :  { %v555_v62 = vpack.c.bf16 %v549_v61, %v549_v61  ;;  %v805_v63 = vpop.permute.xlu0 %804  ;;  %v660_v0 = vpop.permute.xlu1 %659  ;;  %2048 = vmatprep.subr.msk.bf16.mxu0 %vm51_vm0, %v553_v56  ;;  %460 = vmatprep.mubr.bf16.mxu0 %v2150_v6  ;;  %v552_v13 = vpack.c.bf16 %v546_v60, %v546_v60 }
 0x246   :  { %v668_v7 = vsel %vm665_vm4, %v658_v34, %v660_v0  ;;  %501 = vmatprep.mubr.bf16.mxu1 %v2150_v6  ;;  %v667_v14 = vsel %vm665_vm4, %v660_v0, %v662_v48 }
 0x247   :  { %v694_v15 = vmul.f32 %v680_v55, %v668_v7  ;;  %2050 = vmatprep.subr.msk.bf16.mxu1 %vm51_vm0, %v555_v62  ;;  %v695_v21 = vmul.f32 %v684_v5, %v667_v14  ;;  %v560_v31 = vsel %vm51_vm0, %v552_v13, 0  ;;  %v978_v5 = vrot.slane %v2064_v43, %v2316_v59  ;;  %v2070_v14 = vld [vmem:[%s2626_s1 + $0x14] sm:$0xf] }
 0x248   :  { %v982_v7 = vrot.slane %v2064_v43, %v2326_v4 }
 0x249   :  { %v700_v18 = vpack.c.bf16 %v694_v15, %v694_v15  ;;  %v809_v19 = vpop.permute.xlu0 %808  ;;  %v664_v20 = vpop.permute.xlu1 %663  ;;  %v2053_v15 = vld [vmem:[%s2628_s3 + $0xc] sm:$0xf] }
 0x24a   :  { %v666_v22 = vsel %vm665_vm4, %v662_v48, %v664_v20  ;;  %v669_v25 = vsel %vm665_vm4, %v664_v20, %v658_v34  ;;  %v701_v34 = vpack.c.bf16 %v695_v21, %v695_v21 }
 0x24b   :  { %v693_v29 = vmul.f32 %v676_v10, %v669_v25  ;;  %v696_v30 = vmul.f32 %v688_v11, %v666_v22  ;;  %2043 = vmatmul.mubr.msk.bf16.vlgmr.msra.gmra.mrb[12].mxu0 %vm47_vm1, %v2036_v17  ;;  %2045 = vmatmul.mubr.msk.bf16.vlgmr.msra.gmra.mrb[12].mxu1 %vm47_vm1, %v2036_v17  ;;  %v1121_v22 = vrot.slane %v2070_v14, %v2314_v58 }
 0x24c   :  { %572 = vmatpush1.bf16.msra.mxu0 %v560_v31  ;;  %613 = vmatpush1.bf16.msra.mxu1 %v566_v32  ;;  %v713_v51 = vsel %vm51_vm0, %v701_v34, 0 }
 0x24d   :  { %v702_v33 = vpack.c.bf16 %v696_v30, %v696_v30  ;;  %2054 = vmatprep.subr.msk.bf16.mxu0 %vm51_vm0, %v700_v18  ;;  %v952_v35 = vpop.permute.xlu0 %951  ;;  %v807_v36 = vpop.permute.xlu1 %806  ;;  %603 = vmatprep.mubr.bf16.mxu0 %v2150_v6  ;;  %v699_v39 = vpack.c.bf16 %v693_v29, %v693_v29 }
 0x24e   :  { %v815_v38 = vsel %vm812_vm5, %v805_v63, %v807_v36  ;;  %644 = vmatprep.mubr.bf16.mxu1 %v2150_v6  ;;  %v814_v44 = vsel %vm812_vm5, %v807_v36, %v809_v19  ;;  %v1117_v36 = vrot.slane %v2070_v14, %v2324_v1 }
 0x24f   :  { %v841_v40 = vmul.f32 %v827_v26, %v815_v38  ;;  %2056 = vmatprep.subr.msk.bf16.mxu1 %vm51_vm0, %v702_v33  ;;  %v842_v53 = vmul.f32 %v831_v37, %v814_v44  ;;  %v707_v56 = vsel %vm51_vm0, %v699_v39, 0  ;;  %v1125_v39 = vrot.slane %v2070_v14, %v2316_v59 }
 0x251   :  { %v847_v46 = vpack.c.bf16 %v841_v40, %v841_v40  ;;  %v956_v47 = vpop.permute.xlu0 %955  ;;  %v811_v48 = vpop.permute.xlu1 %810  ;;  %v848_v10 = vpack.c.bf16 %v842_v53, %v842_v53  ;;  %v1129_v40 = vrot.slane %v2070_v14, %v2326_v4 }
 0x252   :  { %v813_v49 = vsel %vm812_vm5, %v809_v19, %v811_v48  ;;  %v816_v50 = vsel %vm812_vm5, %v811_v48, %v805_v63  ;;  %v970_v63 = vrot.slane %v2064_v43, %v2324_v1  ;;  %v2059_v43 = vld [vmem:[%s2628_s3 + $0x10] sm:$0xf] }
 0x253   :  { %v840_v54 = vmul.f32 %v823_v41, %v816_v50  ;;  %v843_v55 = vmul.f32 %v835_v42, %v813_v49  ;;  %2049 = vmatmul.mubr.msk.bf16.vlgmr.msra.gmra.mrb[16].mxu0 %vm47_vm1, %v2047_v45  ;;  %2051 = vmatmul.mubr.msk.bf16.vlgmr.msra.gmra.mrb[16].mxu1 %vm47_vm1, %v2047_v45  ;;  %v860_v30 = vsel %vm51_vm0, %v848_v10, 0  ;;  %v2076_v41 = vld [vmem:[%s2626_s1 + $0x18] sm:$0xf] }
 0x254   :  { %719 = vmatpush1.bf16.msra.mxu0 %v707_v56  ;;  %760 = vmatpush1.bf16.msra.mxu1 %v713_v51  ;;  %v1268_v50 = vrot.slane %v2076_v41, %v2314_v58 }
 0x255   :  { %v849_v60 = vpack.c.bf16 %v843_v55, %v843_v55  ;;  %2060 = vmatprep.subr.msk.bf16.mxu0 %vm51_vm0, %v847_v46  ;;  %v1099_v61 = vpop.permute.xlu0 %1098  ;;  %v954_v62 = vpop.permute.xlu1 %953  ;;  %750 = vmatprep.mubr.bf16.mxu0 %v2150_v6  ;;  %v846_v11 = vpack.c.bf16 %v840_v54, %v840_v54 }
 0x256   :  { %v961_v0 = vsel %vm959_vm6, %v954_v62, %v956_v47  ;;  %791 = vmatprep.mubr.bf16.mxu1 %v2150_v6  ;;  %v962_v12 = vsel %vm959_vm6, %v952_v35, %v954_v62  ;;  %v1272_v62 = vrot.slane %v2076_v41, %v2316_v59 }
 0x257   :  { %v988_v13 = vmul.f32 %v974_v52, %v961_v0  ;;  %2062 = vmatprep.subr.msk.bf16.mxu1 %vm51_vm0, %v849_v60  ;;  %v987_v19 = vmul.f32 %v970_v63, %v962_v12  ;;  %v854_v29 = vsel %vm51_vm0, %v846_v11, 0  ;;  %v1264_v60 = vrot.slane %v2076_v41, %v2324_v1  ;;  %v2082_v12 = vld [vmem:[%s2626_s1 + $0x1c] sm:$0xf] }
 0x258   :  { %v1276_v63 = vrot.slane %v2076_v41, %v2326_v4 }
 0x259   :  { %v994_v16 = vpack.c.bf16 %v988_v13, %v988_v13  ;;  %v1103_v17 = vpop.permute.xlu0 %1102  ;;  %v958_v18 = vpop.permute.xlu1 %957  ;;  %v2065_v13 = vld [vmem:[%s2628_s3 + $0x18] sm:$0xf] }
 0x25a   :  { %v960_v20 = vsel %vm959_vm6, %v956_v47, %v958_v18  ;;  %v963_v21 = vsel %vm959_vm6, %v958_v18, %v952_v35  ;;  %v993_v35 = vpack.c.bf16 %v987_v19, %v987_v19  ;;  %v1415_v19 = vrot.slane %v2082_v12, %v2314_v58 }
 0x25b   :  { %v989_v25 = vmul.f32 %v978_v5, %v960_v20  ;;  %v990_v26 = vmul.f32 %v982_v7, %v963_v21  ;;  %2055 = vmatmul.mubr.msk.bf16.vlgmr.msra.gmra.mrb[20].mxu0 %vm47_vm1, %v2053_v15  ;;  %2057 = vmatmul.mubr.msk.bf16.vlgmr.msra.gmra.mrb[20].mxu1 %vm47_vm1, %v2053_v15 }
 0x25c   :  { %866 = vmatpush1.bf16.msra.mxu0 %v854_v29  ;;  %907 = vmatpush1.bf16.msra.mxu1 %v860_v30  ;;  %v1001_v49 = vsel %vm51_vm0, %v993_v35, 0 }
 0x25d   :  { %v996_v31 = vpack.c.bf16 %v990_v26, %v990_v26  ;;  %2066 = vmatprep.subr.msk.bf16.mxu0 %vm51_vm0, %v994_v16  ;;  %v1246_v32 = vpop.permute.xlu0 %1245  ;;  %v1101_v33 = vpop.permute.xlu1 %1100  ;;  %897 = vmatprep.mubr.bf16.mxu0 %v2150_v6  ;;  %v995_v37 = vpack.c.bf16 %v989_v25, %v989_v25 }
 0x25e   :  { %v1108_v34 = vsel %vm1106_vm7, %v1101_v33, %v1103_v17  ;;  %938 = vmatprep.mubr.bf16.mxu1 %v2150_v6  ;;  %v1109_v42 = vsel %vm1106_vm7, %v1099_v61, %v1101_v33 }
 0x25f   :  { %v1135_v38 = vmul.f32 %v1121_v22, %v1108_v34  ;;  %2068 = vmatprep.subr.msk.bf16.mxu1 %vm51_vm0, %v996_v31  ;;  %v1134_v51 = vmul.f32 %v1117_v36, %v1109_v42  ;;  %v1007_v54 = vsel %vm51_vm0, %v995_v37, 0  ;;  %v1411_v31 = vrot.slane %v2082_v12, %v2324_v1  ;;  %v2071_v1 = vld [vmem:[%s2628_s3 + $0x1c] sm:$0xf] }
 0x260   :  { %v1419_v36 = vrot.slane %v2082_v12, %v2316_v59  ;;  %v1423_v34 = vrot.slane %v2082_v12, %v2326_v4 }
 0x261   :  { %v1141_v44 = vpack.c.bf16 %v1135_v38, %v1135_v38  ;;  %v1250_v45 = vpop.permute.xlu0 %1249  ;;  %v1105_v46 = vpop.permute.xlu1 %1104  ;;  %v1140_v0 = vpack.c.bf16 %v1134_v51, %v1134_v51  ;;  %v2096_v51 = vld [vmem:[%s2630_s5 + $0x20] sm:$0xff] }
 0x262   :  { %v1107_v47 = vsel %vm1106_vm7, %v1103_v17, %v1105_v46  ;;  %v1110_v48 = vsel %vm1106_vm7, %v1105_v46, %v1099_v61  ;;  %1674 = vperm.xlu1 %2121, %v2096_v51  }
 0x263   :  { %v1136_v52 = vmul.f32 %v1125_v39, %v1107_v47  ;;  %v1137_v53 = vmul.f32 %v1129_v40, %v1110_v48  ;;  %2061 = vmatmul.mubr.msk.bf16.vlgmr.msra.gmra.mrb[24].mxu0 %vm47_vm1, %v2059_v43  ;;  %2063 = vmatmul.mubr.msk.bf16.vlgmr.msra.gmra.mrb[24].mxu1 %vm47_vm1, %v2059_v43  ;;  %v1148_v22 = vsel %vm51_vm0, %v1140_v0, 0  ;;  %v2077_v47 = vld [vmem:[%s2628_s3 + $0x20] sm:$0xf] }
 0x264   :  { %1013 = vmatpush1.bf16.msra.mxu0 %v1001_v49  ;;  %1054 = vmatpush1.bf16.msra.mxu1 %v1007_v54 }
 0x265   :  { %v1143_v55 = vpack.c.bf16 %v1137_v53, %v1137_v53  ;;  %2072 = vmatprep.subr.msk.bf16.mxu0 %vm51_vm0, %v1141_v44  ;;  %v1248_v56 = vpop.permute.xlu1 %1247  ;;  %1044 = vmatprep.mubr.bf16.mxu0 %v2150_v6  ;;  %v1142_v5 = vpack.c.bf16 %v1136_v52, %v1136_v52  ;;  %v1393_v7 = vpop.permute.xlu0 %1392  ;;  %v1991_v52 = vld [vmem:[%s2631_s6] sm:$0xff] }
 0x266   :  { %v1255_v61 = vsel %vm1253_vm8, %v1248_v56, %v1250_v45  ;;  %1085 = vmatprep.mubr.bf16.mxu1 %v2150_v6  ;;  %v1256_v10 = vsel %vm1253_vm8, %v1246_v32, %v1248_v56  ;;  %1994 = vperm.xlu1 %2121, %v1991_v52  }
 0x267   :  { %v1282_v11 = vmul.f32 %v1268_v50, %v1255_v61  ;;  %2074 = vmatprep.subr.msk.bf16.mxu1 %vm51_vm0, %v1143_v55  ;;  %v1281_v16 = vmul.f32 %v1264_v60, %v1256_v10  ;;  %v1154_v25 = vsel %vm51_vm0, %v1142_v5, 0  ;;  %v2083_v50 = vld [vmem:[%s2628_s3 + $0x24] sm:$0xf] }
 0x269   :  { %v1288_v14 = vpack.c.bf16 %v1282_v11, %v1282_v11  ;;  %v1252_v15 = vpop.permute.xlu1 %1251  ;;  %v1397_v26 = vpop.permute.xlu0 %1396  ;;  %v1287_v58 = vpack.c.bf16 %v1281_v16, %v1281_v16 }
 0x26a   :  { %v1254_v17 = vsel %vm1253_vm8, %v1250_v45, %v1252_v15  ;;  %v1257_v18 = vsel %vm1253_vm8, %v1252_v15, %v1246_v32 }
 0x26b   :  { %v1283_v20 = vmul.f32 %v1272_v62, %v1254_v17  ;;  %v1284_v21 = vmul.f32 %v1276_v63, %v1257_v18  ;;  %2067 = vmatmul.mubr.msk.bf16.vlgmr.msra.gmra.mrb[28].mxu0 %vm47_vm1, %v2065_v13  ;;  %2069 = vmatmul.mubr.msk.bf16.vlgmr.msra.gmra.mrb[28].mxu1 %vm47_vm1, %v2065_v13  ;;  %v1295_v42 = vsel %vm51_vm0, %v1287_v58, 0 }
 0x26c   :  { %1160 = vmatpush1.bf16.msra.mxu0 %v1148_v22  ;;  %1201 = vmatpush1.bf16.msra.mxu1 %v1154_v25 }
 0x26d   :  { %v1290_v29 = vpack.c.bf16 %v1284_v21, %v1284_v21  ;;  %2078 = vmatprep.subr.msk.bf16.mxu0 %vm51_vm0, %v1288_v14  ;;  %v1395_v30 = vpop.permute.xlu1 %1394  ;;  %1191 = vmatprep.mubr.bf16.mxu0 %v2150_v6  ;;  %v1289_v33 = vpack.c.bf16 %v1283_v20, %v1283_v20 }
 0x26e   :  { %v1402_v32 = vsel %vm1400_vm9, %v1395_v30, %v1397_v26  ;;  %1232 = vmatprep.mubr.bf16.mxu1 %v2150_v6  ;;  %v1403_v37 = vsel %vm1400_vm9, %v1393_v7, %v1395_v30 }
 0x26f   :  { %v1429_v35 = vmul.f32 %v1415_v19, %v1402_v32  ;;  %2080 = vmatprep.subr.msk.bf16.mxu1 %vm51_vm0, %v1290_v29  ;;  %v1428_v59 = vmul.f32 %v1411_v31, %v1403_v37  ;;  %v1301_v44 = vsel %vm51_vm0, %v1289_v33, 0 }
 0x271   :  { %v1435_v38 = vpack.c.bf16 %v1429_v35, %v1429_v35  ;;  %v1399_v39 = vpop.permute.xlu1 %1398  ;;  %v1434_v57 = vpack.c.bf16 %v1428_v59, %v1428_v59 }
 0x272   :  { %v1401_v40 = vsel %vm1400_vm9, %v1397_v26, %v1399_v39  ;;  %v1404_v41 = vsel %vm1400_vm9, %v1399_v39, %v1393_v7 }
 0x273   :  { %v1430_v43 = vmul.f32 %v1419_v36, %v1401_v40  ;;  %v1431_v4 = vmul.f32 %v1423_v34, %v1404_v41  ;;  %2073 = vmatmul.mubr.msk.bf16.vlgmr.msra.gmra.mrb[32].mxu0 %vm47_vm1, %v2071_v1  ;;  %2075 = vmatmul.mubr.msk.bf16.vlgmr.msra.gmra.mrb[32].mxu1 %vm47_vm1, %v2071_v1  ;;  %v1442_v48 = vsel %vm51_vm0, %v1434_v57, 0 }
 0x274   :  { %1307 = vmatpush1.bf16.msra.mxu0 %v1295_v42  ;;  %1348 = vmatpush1.bf16.msra.mxu1 %v1301_v44 }
 0x275   :  { %v1437_v45 = vpack.c.bf16 %v1431_v4, %v1431_v4  ;;  %2084 = vmatprep.subr.msk.bf16.mxu0 %vm51_vm0, %v1435_v38  ;;  %1338 = vmatprep.mubr.bf16.mxu0 %v2150_v6  ;;  %v1436_v46 = vpack.c.bf16 %v1430_v43, %v1430_v43 }
 0x276   :  { %1379 = vmatprep.mubr.bf16.mxu1 %v2150_v6 }
 0x277   :  { %2086 = vmatprep.subr.msk.bf16.mxu1 %vm51_vm0, %v1437_v45  ;;  %v1448_v49 = vsel %vm51_vm0, %v1436_v46, 0 }
 0x27b   :  { %2079 = vmatmul.mubr.msk.bf16.vlgmr.msra.gmra.mrb[36].mxu0 %vm47_vm1, %v2077_v47  ;;  %2081 = vmatmul.mubr.msk.bf16.vlgmr.msra.gmra.mrb[36].mxu1 %vm47_vm1, %v2077_v47 }
 0x27c   :  { %1454 = vmatpush1.bf16.msra.mxu0 %v1442_v48  ;;  %1495 = vmatpush1.bf16.msra.mxu1 %v1448_v49 }
 0x27d   :  { %1485 = vmatprep.mubr.bf16.mxu0 %v2150_v6  ;;  %1526 = vmatprep.mubr.bf16.mxu1 %v2150_v6 }
 0x283   :  { %2085 = vmatmul.mubr.msk.bf16.vlgmr.msra.gmra.mrb[40].mxu0 %vm47_vm1, %v2083_v50  ;;  %2087 = vmatmul.mubr.msk.bf16.vlgmr.msra.gmra.mrb[40].mxu1 %vm47_vm1, %v2083_v50 }
 0x284   :  { %1618 = vmatprep.mubr.bf16.mxu0 %v2150_v6  ;;  %1659 = vmatprep.mubr.bf16.mxu1 %v2150_v6 }
 0x316   :  { %v365_v53 = vpop.f32.mrb[8].mxu0  ;;  %v406_v54 = vpop.f32.mrb[8].mxu1 }
 0x317   :  { %v367_v55 = vpop.f32.mrb[9].mxu0  ;;  %v408_v56 = vpop.f32.mrb[9].mxu1 }
 0x318   :  { %v369_v60 = vpop.f32.mrb[10].mxu0  ;;  %v410_v61 = vpop.f32.mrb[10].mxu1 }
 0x319   :  { %v370_v62 = vpop.f32.mrb[11].mxu0  ;;  %v411_v63 = vpop.f32.mrb[11].mxu1 }
 0x31e   :  { %v462_v0 = vpop.f32.mrb[12].mxu0  ;;  %v503_v5 = vpop.f32.mrb[12].mxu1 }
 0x31f   :  { %v463_v7 = vadd.f32 %v462_v0, %v365_v53  ;;  %v504_v10 = vadd.f32 %v503_v5, %v406_v54  ;;  %v464_v11 = vpop.f32.mrb[13].mxu0  ;;  %v505_v12 = vpop.f32.mrb[13].mxu1 }
 0x320   :  { %v465_v13 = vadd.f32 %v464_v11, %v367_v55  ;;  %v506_v14 = vadd.f32 %v505_v12, %v408_v56  ;;  %v466_v15 = vpop.f32.mrb[14].mxu0  ;;  %v507_v16 = vpop.f32.mrb[14].mxu1 }
 0x321   :  { %v467_v17 = vpop.f32.mrb[15].mxu0  ;;  %v508_v18 = vpop.f32.mrb[15].mxu1 }
 0x326   :  { %v605_v19 = vpop.f32.mrb[16].mxu0  ;;  %v646_v20 = vpop.f32.mrb[16].mxu1 }
 0x327   :  { %v653_v21 = vadd.f32 %v605_v19, %v463_v7  ;;  %v655_v22 = vadd.f32 %v646_v20, %v504_v10  ;;  %v607_v25 = vpop.f32.mrb[17].mxu0  ;;  %v648_v26 = vpop.f32.mrb[17].mxu1 }
 0x328   :  { %v654_v29 = vadd.f32 %v607_v25, %v465_v13  ;;  %v656_v30 = vadd.f32 %v648_v26, %v506_v14  ;;  %v609_v58 = vpop.f32.mrb[18].mxu0  ;;  %v650_v31 = vpop.f32.mrb[18].mxu1 }
 0x329   :  { %v610_v32 = vpop.f32.mrb[19].mxu0  ;;  %v651_v33 = vpop.f32.mrb[19].mxu1 }
 0x32e   :  { %v752_v35 = vpop.f32.mrb[20].mxu0  ;;  %v793_v36 = vpop.f32.mrb[20].mxu1 }
 0x32f   :  { %v800_v34 = vadd.f32 %v752_v35, %v653_v21  ;;  %v802_v37 = vadd.f32 %v793_v36, %v655_v22  ;;  %v754_v1 = vpop.f32.mrb[21].mxu0  ;;  %v795_v38 = vpop.f32.mrb[21].mxu1 }
 0x330   :  { %v801_v39 = vadd.f32 %v754_v1, %v654_v29  ;;  %v803_v40 = vadd.f32 %v795_v38, %v656_v30  ;;  %v756_v41 = vpop.f32.mrb[22].mxu0  ;;  %v797_v42 = vpop.f32.mrb[22].mxu1 }
 0x331   :  { %v757_v59 = vpop.f32.mrb[23].mxu0  ;;  %v798_v43 = vpop.f32.mrb[23].mxu1 }
 0x332   :  { %v1544_v38 = vpop.permute.xlu0 %1543 }
 0x336   :  { %v899_v4 = vpop.f32.mrb[24].mxu0  ;;  %v940_v44 = vpop.f32.mrb[24].mxu1 }
 0x337   :  { %v947_v45 = vadd.f32 %v899_v4, %v800_v34  ;;  %v949_v57 = vadd.f32 %v940_v44, %v802_v37  ;;  %v901_v46 = vpop.f32.mrb[25].mxu0  ;;  %v942_v47 = vpop.f32.mrb[25].mxu1 }
 0x338   :  { %v948_v48 = vadd.f32 %v901_v46, %v801_v39  ;;  %v950_v49 = vadd.f32 %v942_v47, %v803_v40  ;;  %v903_v50 = vpop.f32.mrb[26].mxu0  ;;  %v944_v51 = vpop.f32.mrb[26].mxu1 }
 0x339   :  { %v904_v52 = vpop.f32.mrb[27].mxu0  ;;  %v945_v53 = vpop.f32.mrb[27].mxu1 }
 0x33e   :  { %v1046_v54 = vpop.f32.mrb[28].mxu0  ;;  %v1087_v55 = vpop.f32.mrb[28].mxu1 }
 0x33f   :  { %v1094_v56 = vadd.f32 %v1046_v54, %v947_v45  ;;  %v1096_v60 = vadd.f32 %v1087_v55, %v949_v57  ;;  %v1048_v61 = vpop.f32.mrb[29].mxu0  ;;  %v1089_v62 = vpop.f32.mrb[29].mxu1 }
 0x340   :  { %v1095_v63 = vadd.f32 %v1048_v61, %v948_v48  ;;  %v1097_v0 = vadd.f32 %v1089_v62, %v950_v49  ;;  %v1050_v5 = vpop.f32.mrb[30].mxu0  ;;  %v1091_v7 = vpop.f32.mrb[30].mxu1 }
 0x341   :  { %v1051_v10 = vpop.f32.mrb[31].mxu0  ;;  %v1092_v11 = vpop.f32.mrb[31].mxu1 }
 0x346   :  { %v1193_v12 = vpop.f32.mrb[32].mxu0  ;;  %v1234_v13 = vpop.f32.mrb[32].mxu1 }
 0x347   :  { %v1241_v14 = vadd.f32 %v1193_v12, %v1094_v56  ;;  %v1243_v15 = vadd.f32 %v1234_v13, %v1096_v60  ;;  %v1195_v16 = vpop.f32.mrb[33].mxu0  ;;  %v1236_v17 = vpop.f32.mrb[33].mxu1 }
 0x348   :  { %v1242_v18 = vadd.f32 %v1195_v16, %v1095_v63  ;;  %v1244_v19 = vadd.f32 %v1236_v17, %v1097_v0  ;;  %v1197_v20 = vpop.f32.mrb[34].mxu0  ;;  %v1238_v21 = vpop.f32.mrb[34].mxu1 }
 0x349   :  { %v1198_v22 = vpop.f32.mrb[35].mxu0  ;;  %v1239_v25 = vpop.f32.mrb[35].mxu1 }
 0x34a   :  { %v1675_v21 = vpop.permute.xlu1 %1674 }
 0x34e   :  { %v1340_v26 = vpop.f32.mrb[36].mxu0  ;;  %v1381_v29 = vpop.f32.mrb[36].mxu1 }
 0x34f   :  { %v1388_v30 = vadd.f32 %v1340_v26, %v1241_v14  ;;  %v1390_v58 = vadd.f32 %v1381_v29, %v1243_v15  ;;  %v1342_v31 = vpop.f32.mrb[37].mxu0  ;;  %v1383_v32 = vpop.f32.mrb[37].mxu1 }
 0x350   :  { %v1389_v33 = vadd.f32 %v1342_v31, %v1242_v18  ;;  %v1391_v35 = vadd.f32 %v1383_v32, %v1244_v19  ;;  %v1344_v36 = vpop.f32.mrb[38].mxu0  ;;  %v1385_v34 = vpop.f32.mrb[38].mxu1 }
 0x351   :  { %v1345_v37 = vpop.f32.mrb[39].mxu0  ;;  %v1386_v1 = vpop.f32.mrb[39].mxu1 }
 0x356   :  { %v1487_v39 = vpop.f32.mrb[40].mxu0  ;;  %v1528_v40 = vpop.f32.mrb[40].mxu1 }
 0x357   :  { %v1535_v41 = vadd.f32 %v1487_v39, %v1388_v30  ;;  %v1537_v42 = vadd.f32 %v1528_v40, %v1390_v58  ;;  %v1489_v59 = vpop.f32.mrb[41].mxu0  ;;  %v1530_v43 = vpop.f32.mrb[41].mxu1 }
 0x358   :  { %v1536_v4 = vadd.f32 %v1489_v59, %v1389_v33  ;;  %v1538_v44 = vadd.f32 %v1530_v43, %v1391_v35  ;;  %v1491_v45 = vpop.f32.mrb[42].mxu0  ;;  %v1532_v57 = vpop.f32.mrb[42].mxu1 }
 0x359   :  { %v1546_v46 = vadd.f32 %v1544_v38, %v1535_v41  ;;  %v1548_v47 = vadd.f32 %v1544_v38, %v1537_v42  ;;  %v1492_v48 = vpop.f32.mrb[43].mxu0  ;;  %v1533_v49 = vpop.f32.mrb[43].mxu1 }
 0x35a   :  { %v1547_v50 = vadd.f32 %v1544_v38, %v1536_v4  ;;  %v1549_v51 = vadd.f32 %v1544_v38, %v1538_v44 }
 0x35b   :  { %v1550_v52 = vmax.f32 %v1546_v46, 0.0  ;;  %v1552_v53 = vmax.f32 %v1548_v47, 0.0 }
 0x35c   :  { %v1551_v54 = vmax.f32 %v1547_v50, 0.0  ;;  %v1553_v55 = vmax.f32 %v1549_v51, 0.0 }
 0x35d   :  { %v1554_v56 = vadd.f32 %v1550_v52, %v2239_v23  ;;  %v1556_v60 = vadd.f32 %v1552_v53, %v2241_v24  ;;  %v2089_v23 = vld [vmem:[%s2628_s3 + $0x28] sm:$0xf]  ;;  %v2095_v24 = vld [vmem:[%s2627_s2 + $0x4] sm:$0xf] }
 0x35e   :  { %v1555_v61 = vadd.f32 %v1551_v54, %v2243_v27  ;;  %v1557_v62 = vadd.f32 %v1553_v55, %v2245_v28 }
 0x35f   :  { %v1560_v63 = vpack.c.bf16 %v1554_v56, %v1554_v56  ;;  %v1562_v0 = vpack.c.bf16 %v1556_v60, %v1556_v60  ;;  %v2101_v60 = vld [vmem:[%s2629_s4 + $0x4] sm:$0xf] }
 0x360   :  { %v1561_v5 = vpack.c.bf16 %v1555_v61, %v1555_v61  ;;  %v1563_v7 = vpack.c.bf16 %v1557_v62, %v1557_v62 }
 0x361   :  { %v1575_v10 = vsel %vm51_vm0, %v1560_v63, 0  ;;  %v1581_v11 = vsel %vm51_vm0, %v1562_v0, 0  ;;  %v1786_v63 = vld [vmem:[%s2629_s4] sm:$0xf]  ;;  %s2159_s4 = smov [#allocation2]  }
 0x362   :  { %2091 = vmatprep.subr.msk.bf16.mxu0 %vm51_vm0, %v1561_v5  ;;  %2093 = vmatprep.subr.msk.bf16.mxu1 %vm51_vm0, %v1563_v7  ;;  %s2015_s17 = sshll.u32 %s2159_s4, 4  ;;  %s2016_s17 = int_to_ptr.vmem [resolvable:$true] %s2015_s17 }
 0x363   :  { %1587 = vmatpush1.bf16.msra.mxu0 %v1575_v10  ;;  %1628 = vmatpush1.bf16.msra.mxu1 %v1581_v11  ;;  %s2126_s18 = scalar_lea.vmem %s2016_s17, 512  ;;  %p2131_p1 = scmp.lt.s32.totalorder %s2016_s17, %s2016_s17 }
 0x364   :  { %2097 = vmatprep.subr.msk.bf16.mxu0 %vm51_vm0, %v2206_v2  ;;  %2099 = vmatprep.subr.msk.bf16.mxu1 %vm51_vm0, %v2208_v3  ;;  %v1569_v2 = vpop.permute.xlu0 %1568  ;;  %p2127_p0 = scmp.ne.s32.totalorder %s2016_s17, %s2126_s18  ;;  %p2132_p2 = scmp.lt.s32.totalorder %s2126_s18, %s2126_s18 }
 0x366   :  { %2092 = vmatmul.mubr.msk.bf16.vlgmr.msra.gmra.mrb[44].mxu0 %vm47_vm1, %v2089_v23  ;;  %2094 = vmatmul.mubr.msk.bf16.vlgmr.msra.gmra.mrb[44].mxu1 %vm47_vm1, %v2089_v23  ;;  %p2133_p3 = por %p2132_p2, %p2131_p1 }
 0x367   :  { %1681 = vmatpush1.bf16.msra.mxu0 %v2221_v8  ;;  %1722 = vmatpush1.bf16.msra.mxu1 %v2224_v9 }
 0x368   :  { %1712 = vmatprep.mubr.bf16.mxu0 %v2150_v6  ;;  %1753 = vmatprep.mubr.bf16.mxu1 %v2150_v6  ;;  %p2134_p4 = pnand %p2133_p3, %p2127_p0 }
 0x36e   :  { %2098 = vmatmul.mubr.msk.bf16.vlgmr.msra.gmra.mrb[48].mxu0 %vm47_vm1, %v2095_v24  ;;  %2100 = vmatmul.mubr.msk.bf16.vlgmr.msra.gmra.mrb[48].mxu1 %vm47_vm1, %v2095_v24 }
 0x36f   :  { %1844 = vmatprep.mubr.bf16.mxu0 %v2150_v6  ;;  %1885 = vmatprep.mubr.bf16.mxu1 %v2150_v6 }
 0x439   :  { %v1620_v3 = vpop.f32.mrb[44].mxu0  ;;  %v1661_v8 = vpop.f32.mrb[44].mxu1 }
 0x43a   :  { %v1622_v9 = vpop.f32.mrb[45].mxu0  ;;  %v1663_v27 = vpop.f32.mrb[45].mxu1  ;;  %v1621_v28 = vadd.f32 %v1620_v3, %v1569_v2  ;;  %v1662_v12 = vadd.f32 %v1661_v8, %v1569_v2 }
 0x43b   :  { %v1624_v13 = vpop.f32.mrb[46].mxu0  ;;  %v1665_v14 = vpop.f32.mrb[46].mxu1  ;;  %v1623_v15 = vadd.f32 %v1622_v9, %v1569_v2  ;;  %v1664_v16 = vadd.f32 %v1663_v27, %v1569_v2 }
 0x43c   :  { %v1625_v17 = vpop.f32.mrb[47].mxu0  ;;  %v1666_v18 = vpop.f32.mrb[47].mxu1  ;;  %v1766_v19 = vmul.f32 0.1, %v1621_v28  ;;  %v1768_v20 = vmul.f32 0.1, %v1662_v12 }
 0x43d   :  { %vm1762_vm10 = vcmp.gt.f32.partialorder %v1621_v28, 0.0  ;;  %vm1764_vm11 = vcmp.gt.f32.partialorder %v1662_v12, 0.0  ;;  %vm1763_vm12 = vcmp.gt.f32.partialorder %v1623_v15, 0.0  ;;  %v1767_v22 = vmul.f32 0.1, %v1623_v15  ;;  %v1995_v3 = vpop.permute.xlu1 %1994 }
 0x43e   :  { %vm1765_vm13 = vcmp.gt.f32.partialorder %v1664_v16, 0.0  ;;  %v1769_v29 = vmul.f32 0.1, %v1664_v16  ;;  %v1770_v33 = vsel %vm1762_vm10, %v1621_v28, %v1766_v19  ;;  %v1772_v35 = vsel %vm1764_vm11, %v1662_v12, %v1768_v20 }
 0x43f   :  { %v1771_v42 = vsel %vm1763_vm12, %v1623_v15, %v1767_v22  ;;  %v1787_v51 = vpack.c.bf16 %v1770_v33, %v1770_v33  ;;  %v1789_v54 = vpack.c.bf16 %v1772_v35, %v1772_v35 }
 0x440   :  { %v1773_v59 = vsel %vm1765_vm13, %v1664_v16, %v1769_v29  ;;  %v1788_v55 = vpack.c.bf16 %v1771_v42, %v1771_v42 }
 0x441   :  { %v1714_v25 = vpop.f32.mrb[48].mxu0  ;;  %v1755_v26 = vpop.f32.mrb[48].mxu1  ;;  %v1790_v56 = vpack.c.bf16 %v1773_v59, %v1773_v59  ;;  %v1898_v61 = vsel %vm51_vm0, %v1787_v51, 0  ;;  %v1904_v62 = vsel %vm51_vm0, %v1789_v54, 0 }
 0x442   :  { %v1715_v30 = vadd.f32 %v1714_v25, %v1675_v21  ;;  %v1756_v58 = vadd.f32 %v1755_v26, %v1675_v21  ;;  %v1757_v31 = vpop.f32.mrb[49].mxu1  ;;  %v1716_v32 = vpop.f32.mrb[49].mxu0 }
 0x443   :  { %v1758_v36 = vadd.f32 %v1757_v31, %v1675_v21  ;;  %v1717_v34 = vadd.f32 %v1716_v32, %v1675_v21  ;;  %v1718_v37 = vpop.f32.mrb[50].mxu0  ;;  %v1759_v1 = vpop.f32.mrb[50].mxu1 }
 0x444   :  { %vm1774_vm14 = vcmp.gt.f32.partialorder %v1715_v30, 0.0  ;;  %v1778_v38 = vmul.f32 0.1, %v1715_v30  ;;  %vm1776_vm15 = vcmp.gt.f32.partialorder %v1756_v58, 0.0  ;;  %v1780_v39 = vmul.f32 0.1, %v1756_v58 }
 0x445   :  { %vm1777_vm2 = vcmp.gt.f32.partialorder %v1758_v36, 0.0  ;;  %v1781_v40 = vmul.f32 0.1, %v1758_v36  ;;  %vm1775_vm3 = vcmp.gt.f32.partialorder %v1717_v34, 0.0  ;;  %v1779_v41 = vmul.f32 0.1, %v1717_v34 }
 0x446   :  { %v1782_v43 = vsel %vm1774_vm14, %v1715_v30, %v1778_v38  ;;  %v1784_v4 = vsel %vm1776_vm15, %v1756_v58, %v1780_v39  ;;  %v1719_v44 = vpop.f32.mrb[51].mxu0  ;;  %v1760_v45 = vpop.f32.mrb[51].mxu1 }
 0x447   :  { %v1793_v57 = vpack.c.bf16 %v1782_v43, %v1782_v43  ;;  %v1795_v46 = vpack.c.bf16 %v1784_v4, %v1784_v4  ;;  %v1785_v47 = vsel %vm1777_vm2, %v1758_v36, %v1781_v40  ;;  %v1783_v48 = vsel %vm1775_vm3, %v1717_v34, %v1779_v41 }
 0x448   :  { %v1796_v49 = vpack.c.bf16 %v1785_v47, %v1785_v47  ;;  %v1794_v50 = vpack.c.bf16 %v1783_v48, %v1783_v48 }
 0x449   :  { %v1801_v52 = vsel %vm51_vm0, %v1793_v57, 0  ;;  %v1807_v53 = vsel %vm51_vm0, %v1795_v46, 0 }
 0x44a   :  { %2102 = vmatprep.subr.msk.bf16.mxu0 %vm51_vm0, %v1794_v50  ;;  %2104 = vmatprep.subr.msk.bf16.mxu1 %vm51_vm0, %v1796_v49 }
 0x44b   :  { %1813 = vmatpush1.bf16.msra.mxu0 %v1801_v52  ;;  %1854 = vmatpush1.bf16.msra.mxu1 %v1807_v53 }
 0x44c   :  { %2106 = vmatprep.subr.msk.bf16.mxu0 %vm51_vm0, %v1788_v55  ;;  %2108 = vmatprep.subr.msk.bf16.mxu1 %vm51_vm0, %v1790_v56 }
 0x44e   :  { %2103 = vmatmul.mubr.msk.bf16.vlgmr.msra.gmra.mrb[52].mxu0 %vm47_vm1, %v2101_v60  ;;  %2105 = vmatmul.mubr.msk.bf16.vlgmr.msra.gmra.mrb[52].mxu1 %vm47_vm1, %v2101_v60 }
 0x44f   :  { %1910 = vmatpush1.bf16.msra.mxu0 %v1898_v61  ;;  %1951 = vmatpush1.bf16.msra.mxu1 %v1904_v62 }
 0x450   :  { %1941 = vmatprep.mubr.bf16.mxu0 %v2150_v6  ;;  %1982 = vmatprep.mubr.bf16.mxu1 %v2150_v6 }
 0x456   :  { %2107 = vmatmul.mubr.msk.bf16.vlgmr.msra.gmra.mrb[56].mxu0 %vm47_vm1, %v1786_v63  ;;  %2109 = vmatmul.mubr.msk.bf16.vlgmr.msra.gmra.mrb[56].mxu1 %vm47_vm1, %v1786_v63 }
 0x521   :  { %v1846_v0 = vpop.f32.mrb[52].mxu0  ;;  %v1887_v5 = vpop.f32.mrb[52].mxu1 }
 0x522   :  { %v1848_v7 = vpop.f32.mrb[53].mxu0  ;;  %v1889_v10 = vpop.f32.mrb[53].mxu1 }
 0x523   :  { %v1850_v11 = vpop.f32.mrb[54].mxu0  ;;  %v1891_v23 = vpop.f32.mrb[54].mxu1 }
 0x524   :  { %v1851_v24 = vpop.f32.mrb[55].mxu0  ;;  %v1892_v2 = vpop.f32.mrb[55].mxu1 }
 0x529   :  { %v1943_v8 = vpop.f32.mrb[56].mxu0  ;;  %v1984_v9 = vpop.f32.mrb[56].mxu1 }
 0x52a   :  { %v1944_v6 = vadd.f32 %v1943_v8, %v1846_v0  ;;  %v1985_v27 = vadd.f32 %v1984_v9, %v1887_v5  ;;  %v1945_v28 = vpop.f32.mrb[57].mxu0  ;;  %v1986_v12 = vpop.f32.mrb[57].mxu1 }
 0x52b   :  { %v1946_v13 = vadd.f32 %v1945_v28, %v1848_v7  ;;  %v1987_v14 = vadd.f32 %v1986_v12, %v1889_v10  ;;  %v1947_v15 = vpop.f32.mrb[58].mxu0  ;;  %v1988_v16 = vpop.f32.mrb[58].mxu1 }
 0x52c   :  { %v1997_v17 = vadd.f32 %v1995_v3, %v1944_v6  ;;  %v1999_v18 = vadd.f32 %v1995_v3, %v1985_v27  ;;  %v1948_v19 = vpop.f32.mrb[59].mxu0  ;;  %v1989_v20 = vpop.f32.mrb[59].mxu1 }
 0x52d   :  { %v1998_v21 = vadd.f32 %v1995_v3, %v1946_v13  ;;  %v2000_v22 = vadd.f32 %v1995_v3, %v1987_v14 }
 0x52e   :  { %v2001_v25 = vmax.f32 %v1997_v17, 0.0  ;;  %v2003_v26 = vmax.f32 %v1999_v18, 0.0 }
 0x52f   :  { %v2002_v29 = vmax.f32 %v1998_v21, 0.0  ;;  %v2004_v30 = vmax.f32 %v2000_v22, 0.0 }
 0x530   :  { %2005 = vst [vmem:[#allocation2] sm:$0xff] %v2001_v25  ;;  %2007 = vst [vmem:[#allocation2 + $0x10] sm:$0xff] %v2003_v26 }
 0x531   :  { %2006 = vst [vmem:[#allocation2 + $0x8] sm:$0xff] %v2002_v29  ;;  %2008 = vst [vmem:[#allocation2 + $0x18] sm:$0xff] %v2004_v30 }
 0x532   :  { %2137 = shalt.err (!%p2134_p4)
}
 0x533   :  { %s2138_s21 = scalar_lea.hbm %s2632_s7, 512 }
 0x534   :  { %p2139_p5 = scmp.ne.s32.totalorder %s2632_s7, %s2138_s21  ;;  %p2142_p6 = scmp.lt.u32.totalorder %s2138_s21, %s2632_s7 }
 0x536   :  { %p2144_p7 = pnand %p2142_p6, %p2139_p5 }
 0x538   :  { %2147 = shalt.err (!%p2144_p7)
}
 0x539   :  { %2018 = dma.vmem_to_hbm [thread:$0]  %s2016_s17, 512, %s2632_s7, [#allocation3]  }
 0x53a   :  { %2148 = dma.done.wait [#allocation3], 512  }
 0x53b   :  { %2149 = vsyncadd [#allocation3], 4294966784 }
 0x53c   :  { %2022 = vsyncpa [#allocation3], 1 }

// kernel: tpu_custom_call.1
= control target key start
LH: loop header
LB: loop body
LE: loop exit
PB: predicated region body
PF: predicated region fallthrough
CT: control target
= control target key end

     0   :  { %vm51_vm0 = vcmask 1043456   ;;  %v2150_v6 = vmov 0   ;;  %s2625_s0 = inlined_call_operand.vmem [shape: bf16[8,512], index: 0, kind: input, shape index: {}]   ;;  %s2626_s1 = inlined_call_operand.vmem [shape: f32[8,1,512], index: 1, kind: input, shape index: {}]   ;;  %s2627_s2 = inlined_call_operand.vmem [shape: bf16[2,8,8], index: 2, kind: input, shape index: {}]   ;;  %s2628_s3 = inlined_call_operand.vmem [shape: bf16[11,8,8], index: 3, kind: input, shape index: {}]   ;;  %s2629_s4 = inlined_call_operand.vmem [shape: bf16[2,8,8], index: 4, kind: input, shape index: {}]   ;;  %s2630_s5 = inlined_call_operand.vmem [shape: f32[5,8,1], index: 5, kind: input, shape index: {}]   ;;  %s2631_s6 = inlined_call_operand.vmem [shape: f32[8,1], index: 6, kind: input, shape index: {}]   ;;  %s2632_s7 = inlined_call_operand.hbm [shape: f32[8,512], index: 7, kind: output, shape index: {}]  }
   0x1   :  { %v28_v0 = vld [vmem:[%s2625_s0] sm:$0xff]  ;;  %v29_v1 = vld [vmem:[%s2625_s0 + $0x8] sm:$0xff]  ;;  %96 = vmatprep.mubr.bf16.mxu0 %v2150_v6 }
   0x2   :  { %v2206_v2 = vcombine.high %v28_v0, %v28_v0  ;;  %v2208_v3 = vcombine.high %v29_v1, %v29_v1  ;;  %v2023_v4 = vcombine.low %v28_v0, %v28_v0  ;;  %v2025_v5 = vcombine.low %v29_v1, %v29_v1 }
   0x3   :  { %12 = vsyncpa [#allocation3], 0  ;;  %137 = vmatprep.mubr.bf16.mxu1 %v2150_v6  ;;  %2120 = vset.pattern.permute.xlu0 %v2150_v6  ;;  %v31_v7 = vld [vmem:[%s2630_s5] sm:$0xff]  ;;  %vm47_vm1 = vcmask 64512   ;;  %v2031_v11 = vld [vmem:[%s2630_s5 + $0x8] sm:$0xff]  ;;  %s2151_s12 = smov 17   ;;  %v277_v55 = vlaneseq }
   0x4   :  { %2027 = vmatprep.subr.msk.bf16.mxu0 %vm51_vm0, %v2206_v2  ;;  %2029 = vmatprep.subr.msk.bf16.mxu1 %vm51_vm0, %v2208_v3  ;;  %v2221_v8 = vsel %vm51_vm0, %v2023_v4, 0  ;;  %v2224_v9 = vsel %vm51_vm0, %v2025_v5, 0  ;;  %v30_v10 = vld [vmem:[%s2627_s2] sm:$0xf]  ;;  %s2152_s13 = smov 16   ;;  %s2153_s14 = smov 15  }
   0x5   :  { %65 = vmatpush1.bf16.msra.mxu0 %v2221_v8  ;;  %106 = vmatpush1.bf16.msra.mxu1 %v2224_v9  ;;  %v150_v35 = vld [vmem:[%s2628_s3] sm:$0xf]  ;;  %s2154_s15 = smov 1   ;;  %s2155_s16 = smov 127   ;;  %v2088_v53 = vld [vmem:[%s2630_s5 + $0x10] sm:$0xff]  ;;  %v2090_v54 = vld [vmem:[%s2630_s5 + $0x18] sm:$0xff] }
   0x6   :  { %34 = vperm.xlu0 %2120, %v31_v7   ;;  %2121 = vset.pattern.permute.xlu1 %v2150_v6  ;;  %s2156_s17 = smov 113   ;;  %s2157_s18 = smov 112   ;;  %v287_v56 = vshrl.u32 %v277_v55, 7  ;;  %v2312_v57 = vand.u32 127, %v277_v55  ;;  %v284_v60 = vld [vmem:[%s2626_s1] sm:$0xf] }
   0x7   :  { %s2158_s19 = smov 111  }
   0x8   :  { %2028 = vmatmul.mubr.msk.bf16.vlgmr.msra.gmra.mrb[0].mxu0 %vm47_vm1, %v30_v10  ;;  %2030 = vmatmul.mubr.msk.bf16.vlgmr.msra.gmra.mrb[0].mxu1 %vm47_vm1, %v30_v10  ;;  %v2314_v58 = vsub.s32 1, %v287_v56  ;;  %v2316_v59 = vsub.s32 2, %v287_v56  ;;  %vm279_vm2 = vcmp.lt.s32.totalorder %v2312_v57, 17  ;;  %v2324_v1 = vsub.s32 0, %v287_v56 }
   0x9   :  { %209 = vmatprep.mubr.bf16.mxu0 %v2150_v6  ;;  %250 = vmatprep.mubr.bf16.mxu1 %v2150_v6  ;;  %v2326_v4 = vsub.s32 3, %v287_v56  ;;  %vm518_vm3 = vcmp.lt.s32.totalorder %v2312_v57, 16  ;;  %vm665_vm4 = vcmp.lt.s32.totalorder %v2312_v57, 15  ;;  %vm812_vm5 = vcmp.lt.s32.totalorder %v2312_v57, 1 }
   0xa   :  { %159 = vperm.xlu0 %2120, %v2031_v11   ;;  %v293_v63 = vrot.slane %v284_v60, %v2314_v58  ;;  %v297_v0 = vrot.slane %v284_v60, %v2316_v59  ;;  %vm959_vm6 = vcmp.lt.s32.totalorder %v2312_v57, 127  ;;  %vm1106_vm7 = vcmp.lt.s32.totalorder %v2312_v57, 113 }
   0xb   :  { %vm1253_vm8 = vcmp.lt.s32.totalorder %v2312_v57, 112  ;;  %vm1400_vm9 = vcmp.lt.s32.totalorder %v2312_v57, 111 }
  0x85   :  { %v35_v12 = vpop.permute.xlu0 %34 }
  0x89   :  { %v160_v36 = vpop.permute.xlu0 %159 }
  0xdb   :  { %v98_v13 = vpop.f32.mrb[0].mxu0  ;;  %v139_v14 = vpop.f32.mrb[0].mxu1 }
  0xdc   :  { %v99_v15 = vadd.f32 %v98_v13, %v35_v12  ;;  %v140_v16 = vadd.f32 %v139_v14, %v35_v12  ;;  %v100_v17 = vpop.f32.mrb[1].mxu0  ;;  %v141_v18 = vpop.f32.mrb[1].mxu1  ;;  %v289_v14 = vrot.slane %v284_v60, %v2324_v1 }
  0xdd   :  { %v101_v19 = vadd.f32 %v100_v17, %v35_v12  ;;  %v142_v20 = vadd.f32 %v141_v18, %v35_v12  ;;  %v102_v21 = vpop.f32.mrb[2].mxu0  ;;  %v143_v22 = vpop.f32.mrb[2].mxu1 }
  0xde   :  { %v2239_v23 = vmax.f32 %v99_v15, 0.0  ;;  %v2241_v24 = vmax.f32 %v140_v16, 0.0  ;;  %v103_v25 = vpop.f32.mrb[3].mxu0  ;;  %v144_v26 = vpop.f32.mrb[3].mxu1  ;;  %v301_v15 = vrot.slane %v284_v60, %v2326_v4  ;;  %v2046_v16 = vld [vmem:[%s2626_s1 + $0x4] sm:$0xf] }
  0xdf   :  { %v2243_v27 = vmax.f32 %v101_v19, 0.0  ;;  %v2245_v28 = vmax.f32 %v142_v20, 0.0 }
  0xe0   :  { %v151_v29 = vpack.c.bf16 %v2239_v23, %v2239_v23  ;;  %v153_v30 = vpack.c.bf16 %v2241_v24, %v2241_v24 }
  0xe1   :  { %v152_v31 = vpack.c.bf16 %v2243_v27, %v2243_v27  ;;  %v154_v32 = vpack.c.bf16 %v2245_v28, %v2245_v28 }
  0xe2   :  { %v166_v33 = vsel %vm51_vm0, %v151_v29, 0  ;;  %v172_v34 = vsel %vm51_vm0, %v153_v30, 0  ;;  %v533_v29 = vrot.slane %v2046_v16, %v2314_v58  ;;  %v537_v30 = vrot.slane %v2046_v16, %v2316_v59 }
  0xe3   :  { %2032 = vmatprep.subr.msk.bf16.mxu0 %vm51_vm0, %v152_v31  ;;  %2034 = vmatprep.subr.msk.bf16.mxu1 %vm51_vm0, %v154_v32 }
  0xe4   :  { %178 = vmatpush1.bf16.msra.mxu0 %v166_v33  ;;  %219 = vmatpush1.bf16.msra.mxu1 %v172_v34 }
  0xe7   :  { %2033 = vmatmul.mubr.msk.bf16.vlgmr.msra.gmra.mrb[4].mxu0 %vm47_vm1, %v150_v35  ;;  %2035 = vmatmul.mubr.msk.bf16.vlgmr.msra.gmra.mrb[4].mxu1 %vm47_vm1, %v150_v35 }
  0xe8   :  { %363 = vmatprep.mubr.bf16.mxu0 %v2150_v6  ;;  %404 = vmatprep.mubr.bf16.mxu1 %v2150_v6 }
 0x1ba   :  { %v211_v37 = vpop.f32.mrb[4].mxu0  ;;  %v252_v38 = vpop.f32.mrb[4].mxu1 }
 0x1bb   :  { %v212_v39 = vadd.f32 %v211_v37, %v160_v36  ;;  %v253_v40 = vadd.f32 %v252_v38, %v160_v36  ;;  %v213_v41 = vpop.f32.mrb[5].mxu0  ;;  %v254_v42 = vpop.f32.mrb[5].mxu1 }
 0x1bc   :  { %v215_v43 = vpop.f32.mrb[6].mxu0  ;;  %v256_v44 = vpop.f32.mrb[6].mxu1  ;;  %v214_v47 = vadd.f32 %v213_v41, %v160_v36  ;;  %v255_v51 = vadd.f32 %v254_v42, %v160_v36  ;;  %v541_v41 = vrot.slane %v2046_v16, %v2326_v4 }
 0x1bd   :  { %v2266_v45 = vmax.f32 %v212_v39, 0.0  ;;  %v2268_v46 = vmax.f32 %v253_v40, 0.0  ;;  %v216_v48 = vpop.f32.mrb[7].mxu0  ;;  %v257_v49 = vpop.f32.mrb[7].mxu1  ;;  %v529_v40 = vrot.slane %v2046_v16, %v2324_v1  ;;  %v2058_v16 = vld [vmem:[%s2626_s1 + $0xc] sm:$0xf] }
 0x1be   :  { %v2272_v50 = vmax.f32 %v214_v47, 0.0  ;;  %v2276_v52 = vmax.f32 %v255_v51, 0.0  ;;  %v2037_v47 = vld [vmem:[%s2628_s3 + $0x4] sm:$0xf] }
 0x1bf   :  { %273 = vrot.lane.b32.xlu0 %v2268_v46, %s2151_s12  ;;  %269 = vrot.lane.b32.xlu1 %v2266_v45, %s2151_s12  ;;  %v263_v31 = vpack.c.bf16 %v2266_v45, %v2266_v45  ;;  %v265_v37 = vpack.c.bf16 %v2268_v46, %v2268_v46 }
 0x1c0   :  { %v264_v36 = vpack.c.bf16 %v2272_v50, %v2272_v50  ;;  %v266_v39 = vpack.c.bf16 %v2276_v52, %v2276_v52 }
 0x1c1   :  { %v423_v51 = vsel %vm51_vm0, %v265_v37, 0  ;;  %v831_v37 = vrot.slane %v2058_v16, %v2316_v59 }
 0x1c3   :  { %510 = vrot.lane.b32.xlu0 %v2266_v45, %s2152_s13  ;;  %271 = vrot.lane.b32.xlu1 %v2272_v50, %s2151_s12 }
 0x1c7   :  { %514 = vrot.lane.b32.xlu0 %v2268_v46, %s2152_s13  ;;  %275 = vrot.lane.b32.xlu1 %v2276_v52, %s2151_s12 }
 0x1cb   :  { %657 = vrot.lane.b32.xlu0 %v2266_v45, %s2153_s14  ;;  %512 = vrot.lane.b32.xlu1 %v2272_v50, %s2152_s13 }
 0x1cf   :  { %661 = vrot.lane.b32.xlu0 %v2268_v46, %s2153_s14  ;;  %516 = vrot.lane.b32.xlu1 %v2276_v52, %s2152_s13 }
 0x1d3   :  { %804 = vrot.lane.b32.xlu0 %v2266_v45, %s2154_s15  ;;  %659 = vrot.lane.b32.xlu1 %v2272_v50, %s2153_s14 }
 0x1d7   :  { %808 = vrot.lane.b32.xlu0 %v2268_v46, %s2154_s15  ;;  %663 = vrot.lane.b32.xlu1 %v2276_v52, %s2153_s14 }
 0x1db   :  { %951 = vrot.lane.b32.xlu0 %v2266_v45, %s2155_s16  ;;  %806 = vrot.lane.b32.xlu1 %v2272_v50, %s2154_s15 }
 0x1df   :  { %955 = vrot.lane.b32.xlu0 %v2268_v46, %s2155_s16  ;;  %810 = vrot.lane.b32.xlu1 %v2276_v52, %s2154_s15 }
 0x1e3   :  { %1098 = vrot.lane.b32.xlu0 %v2266_v45, %s2156_s17  ;;  %953 = vrot.lane.b32.xlu1 %v2272_v50, %s2155_s16 }
 0x1e7   :  { %1102 = vrot.lane.b32.xlu0 %v2268_v46, %s2156_s17  ;;  %957 = vrot.lane.b32.xlu1 %v2276_v52, %s2155_s16 }
 0x1eb   :  { %1245 = vrot.lane.b32.xlu0 %v2266_v45, %s2157_s18  ;;  %1100 = vrot.lane.b32.xlu1 %v2272_v50, %s2156_s17 }
 0x1ef   :  { %1249 = vrot.lane.b32.xlu0 %v2268_v46, %s2157_s18  ;;  %1104 = vrot.lane.b32.xlu1 %v2276_v52, %s2156_s17 }
 0x1f3   :  { %1392 = vrot.lane.b32.xlu0 %v2266_v45, %s2158_s19  ;;  %1247 = vrot.lane.b32.xlu1 %v2272_v50, %s2157_s18 }
 0x1f7   :  { %1396 = vrot.lane.b32.xlu0 %v2268_v46, %s2158_s19  ;;  %1251 = vrot.lane.b32.xlu1 %v2276_v52, %s2157_s18  ;;  %v2052_v46 = vld [vmem:[%s2626_s1 + $0x8] sm:$0xf] }
 0x1f8   :  { %v680_v55 = vrot.slane %v2052_v46, %v2314_v58 }
 0x1fb   :  { %1543 = vperm.xlu0 %2120, %v2088_v53   ;;  %1394 = vrot.lane.b32.xlu1 %v2272_v50, %s2158_s19  ;;  %v417_v50 = vsel %vm51_vm0, %v263_v31, 0 }
 0x1ff   :  { %1568 = vperm.xlu0 %2120, %v2090_v54   ;;  %1398 = vrot.lane.b32.xlu1 %v2276_v52, %s2158_s19 }
 0x231   :  { %v274_v61 = vpop.permute.xlu0 %273  ;;  %v270_v62 = vpop.permute.xlu1 %269 }
 0x235   :  { %v511_v5 = vpop.permute.xlu0 %510  ;;  %v272_v7 = vpop.permute.xlu1 %271 }
 0x236   :  { %v281_v10 = vsel %vm279_vm2, %v272_v7, %v274_v61  ;;  %v282_v11 = vsel %vm279_vm2, %v270_v62, %v272_v7 }
 0x237   :  { %v307_v12 = vmul.f32 %v293_v63, %v282_v11  ;;  %v308_v13 = vmul.f32 %v297_v0, %v281_v10  ;;  %v676_v10 = vrot.slane %v2052_v46, %v2324_v1  ;;  %v688_v11 = vrot.slane %v2052_v46, %v2326_v4 }
 0x239   :  { %v313_v17 = vpack.c.bf16 %v307_v12, %v307_v12  ;;  %v515_v18 = vpop.permute.xlu0 %514  ;;  %v276_v19 = vpop.permute.xlu1 %275  ;;  %v314_v22 = vpack.c.bf16 %v308_v13, %v308_v13 }
 0x23a   :  { %v280_v20 = vsel %vm279_vm2, %v274_v61, %v276_v19  ;;  %v283_v21 = vsel %vm279_vm2, %v276_v19, %v270_v62 }
 0x23b   :  { %v306_v25 = vmul.f32 %v289_v14, %v283_v21  ;;  %v309_v26 = vmul.f32 %v301_v15, %v280_v20  ;;  %2038 = vmatprep.subr.msk.bf16.mxu0 %vm51_vm0, %v313_v17  ;;  %v326_v45 = vsel %vm51_vm0, %v314_v22, 0  ;;  %v2036_v17 = vld [vmem:[%s2628_s3 + $0x14] sm:$0xf] }
 0x23d   :  { %v312_v32 = vpack.c.bf16 %v306_v25, %v306_v25  ;;  %v315_v33 = vpack.c.bf16 %v309_v26, %v309_v26  ;;  %v658_v34 = vpop.permute.xlu0 %657  ;;  %v513_v35 = vpop.permute.xlu1 %512  ;;  %v827_v26 = vrot.slane %v2058_v16, %v2314_v58 }
 0x23e   :  { %v521_v38 = vsel %vm518_vm3, %v511_v5, %v513_v35  ;;  %v520_v42 = vsel %vm518_vm3, %v513_v35, %v515_v18 }
 0x23f   :  { %v547_v43 = vmul.f32 %v533_v29, %v521_v38  ;;  %2040 = vmatprep.subr.msk.bf16.mxu1 %vm51_vm0, %v315_v33  ;;  %v320_v44 = vsel %vm51_vm0, %v312_v32, 0  ;;  %v548_v52 = vmul.f32 %v537_v30, %v520_v42  ;;  %v835_v42 = vrot.slane %v2058_v16, %v2326_v4 }
 0x240   :  { %332 = vmatpush1.bf16.msra.mxu0 %v320_v44  ;;  %373 = vmatpush1.bf16.msra.mxu1 %v326_v45  ;;  %v2047_v45 = vld [vmem:[%s2628_s3 + $0x8] sm:$0xf] }
 0x241   :  { %v662_v48 = vpop.permute.xlu0 %661  ;;  %2042 = vmatprep.subr.msk.bf16.mxu0 %vm51_vm0, %v264_v36  ;;  %2044 = vmatprep.subr.msk.bf16.mxu1 %vm51_vm0, %v266_v39  ;;  %v517_v49 = vpop.permute.xlu1 %516  ;;  %v553_v56 = vpack.c.bf16 %v547_v43, %v547_v43  ;;  %v554_v12 = vpack.c.bf16 %v548_v52, %v548_v52  ;;  %v2064_v43 = vld [vmem:[%s2626_s1 + $0x10] sm:$0xf] }
 0x242   :  { %v519_v53 = vsel %vm518_vm3, %v515_v18, %v517_v49  ;;  %v522_v54 = vsel %vm518_vm3, %v517_v49, %v511_v5  ;;  %v684_v5 = vrot.slane %v2052_v46, %v2316_v59  ;;  %v974_v52 = vrot.slane %v2064_v43, %v2314_v58 }
 0x243   :  { %v546_v60 = vmul.f32 %v529_v40, %v522_v54  ;;  %v549_v61 = vmul.f32 %v541_v41, %v519_v53  ;;  %2039 = vmatmul.mubr.msk.bf16.vlgmr.msra.gmra.mrb[8].mxu0 %vm47_vm1, %v2037_v47  ;;  %2041 = vmatmul.mubr.msk.bf16.vlgmr.msra.gmra.mrb[8].mxu1 %vm47_vm1, %v2037_v47  ;;  %v566_v32 = vsel %vm51_vm0, %v554_v12, 0  ;;  %v823_v41 = vrot.slane %v2058_v16, %v2324_v1 }
 0x244   :  { %429 = vmatpush1.bf16.msra.mxu0 %v417_v50  ;;  %470 = vmatpush1.bf16.msra.mxu1 %v423_v51 }
 0x245   :  { %v555_v62 = vpack.c.bf16 %v549_v61, %v549_v61  ;;  %v805_v63 = vpop.permute.xlu0 %804  ;;  %v660_v0 = vpop.permute.xlu1 %659  ;;  %2048 = vmatprep.subr.msk.bf16.mxu0 %vm51_vm0, %v553_v56  ;;  %460 = vmatprep.mubr.bf16.mxu0 %v2150_v6  ;;  %v552_v13 = vpack.c.bf16 %v546_v60, %v546_v60 }
 0x246   :  { %v668_v7 = vsel %vm665_vm4, %v658_v34, %v660_v0  ;;  %501 = vmatprep.mubr.bf16.mxu1 %v2150_v6  ;;  %v667_v14 = vsel %vm665_vm4, %v660_v0, %v662_v48 }
 0x247   :  { %v694_v15 = vmul.f32 %v680_v55, %v668_v7  ;;  %2050 = vmatprep.subr.msk.bf16.mxu1 %vm51_vm0, %v555_v62  ;;  %v695_v21 = vmul.f32 %v684_v5, %v667_v14  ;;  %v560_v31 = vsel %vm51_vm0, %v552_v13, 0  ;;  %v978_v5 = vrot.slane %v2064_v43, %v2316_v59  ;;  %v2070_v14 = vld [vmem:[%s2626_s1 + $0x14] sm:$0xf] }
 0x248   :  { %v982_v7 = vrot.slane %v2064_v43, %v2326_v4 }
 0x249   :  { %v700_v18 = vpack.c.bf16 %v694_v15, %v694_v15  ;;  %v809_v19 = vpop.permute.xlu0 %808  ;;  %v664_v20 = vpop.permute.xlu1 %663  ;;  %v2053_v15 = vld [vmem:[%s2628_s3 + $0xc] sm:$0xf] }
 0x24a   :  { %v666_v22 = vsel %vm665_vm4, %v662_v48, %v664_v20  ;;  %v669_v25 = vsel %vm665_vm4, %v664_v20, %v658_v34  ;;  %v701_v34 = vpack.c.bf16 %v695_v21, %v695_v21 }
 0x24b   :  { %v693_v29 = vmul.f32 %v676_v10, %v669_v25  ;;  %v696_v30 = vmul.f32 %v688_v11, %v666_v22  ;;  %2043 = vmatmul.mubr.msk.bf16.vlgmr.msra.gmra.mrb[12].mxu0 %vm47_vm1, %v2036_v17  ;;  %2045 = vmatmul.mubr.msk.bf16.vlgmr.msra.gmra.mrb[12].mxu1 %vm47_vm1, %v2036_v17  ;;  %v1121_v22 = vrot.slane %v2070_v14, %v2314_v58 }
 0x24c   :  { %572 = vmatpush1.bf16.msra.mxu0 %v560_v31  ;;  %613 = vmatpush1.bf16.msra.mxu1 %v566_v32  ;;  %v713_v51 = vsel %vm51_vm0, %v701_v34, 0 }
 0x24d   :  { %v702_v33 = vpack.c.bf16 %v696_v30, %v696_v30  ;;  %2054 = vmatprep.subr.msk.bf16.mxu0 %vm51_vm0, %v700_v18  ;;  %v952_v35 = vpop.permute.xlu0 %951  ;;  %v807_v36 = vpop.permute.xlu1 %806  ;;  %603 = vmatprep.mubr.bf16.mxu0 %v2150_v6  ;;  %v699_v39 = vpack.c.bf16 %v693_v29, %v693_v29 }
 0x24e   :  { %v815_v38 = vsel %vm812_vm5, %v805_v63, %v807_v36  ;;  %644 = vmatprep.mubr.bf16.mxu1 %v2150_v6  ;;  %v814_v44 = vsel %vm812_vm5, %v807_v36, %v809_v19  ;;  %v1117_v36 = vrot.slane %v2070_v14, %v2324_v1 }
 0x24f   :  { %v841_v40 = vmul.f32 %v827_v26, %v815_v38  ;;  %2056 = vmatprep.subr.msk.bf16.mxu1 %vm51_vm0, %v702_v33  ;;  %v842_v53 = vmul.f32 %v831_v37, %v814_v44  ;;  %v707_v56 = vsel %vm51_vm0, %v699_v39, 0  ;;  %v1125_v39 = vrot.slane %v2070_v14, %v2316_v59 }
 0x251   :  { %v847_v46 = vpack.c.bf16 %v841_v40, %v841_v40  ;;  %v956_v47 = vpop.permute.xlu0 %955  ;;  %v811_v48 = vpop.permute.xlu1 %810  ;;  %v848_v10 = vpack.c.bf16 %v842_v53, %v842_v53  ;;  %v1129_v40 = vrot.slane %v2070_v14, %v2326_v4 }
 0x252   :  { %v813_v49 = vsel %vm812_vm5, %v809_v19, %v811_v48  ;;  %v816_v50 = vsel %vm812_vm5, %v811_v48, %v805_v63  ;;  %v970_v63 = vrot.slane %v2064_v43, %v2324_v1  ;;  %v2059_v43 = vld [vmem:[%s2628_s3 + $0x10] sm:$0xf] }
 0x253   :  { %v840_v54 = vmul.f32 %v823_v41, %v816_v50  ;;  %v843_v55 = vmul.f32 %v835_v42, %v813_v49  ;;  %2049 = vmatmul.mubr.msk.bf16.vlgmr.msra.gmra.mrb[16].mxu0 %vm47_vm1, %v2047_v45  ;;  %2051 = vmatmul.mubr.msk.bf16.vlgmr.msra.gmra.mrb[16].mxu1 %vm47_vm1, %v2047_v45  ;;  %v860_v30 = vsel %vm51_vm0, %v848_v10, 0  ;;  %v2076_v41 = vld [vmem:[%s2626_s1 + $0x18] sm:$0xf] }
 0x254   :  { %719 = vmatpush1.bf16.msra.mxu0 %v707_v56  ;;  %760 = vmatpush1.bf16.msra.mxu1 %v713_v51  ;;  %v1268_v50 = vrot.slane %v2076_v41, %v2314_v58 }
 0x255   :  { %v849_v60 = vpack.c.bf16 %v843_v55, %v843_v55  ;;  %2060 = vmatprep.subr.msk.bf16.mxu0 %vm51_vm0, %v847_v46  ;;  %v1099_v61 = vpop.permute.xlu0 %1098  ;;  %v954_v62 = vpop.permute.xlu1 %953  ;;  %750 = vmatprep.mubr.bf16.mxu0 %v2150_v6  ;;  %v846_v11 = vpack.c.bf16 %v840_v54, %v840_v54 }
 0x256   :  { %v961_v0 = vsel %vm959_vm6, %v954_v62, %v956_v47  ;;  %791 = vmatprep.mubr.bf16.mxu1 %v2150_v6  ;;  %v962_v12 = vsel %vm959_vm6, %v952_v35, %v954_v62  ;;  %v1272_v62 = vrot.slane %v2076_v41, %v2316_v59 }
 0x257   :  { %v988_v13 = vmul.f32 %v974_v52, %v961_v0  ;;  %2062 = vmatprep.subr.msk.bf16.mxu1 %vm51_vm0, %v849_v60  ;;  %v987_v19 = vmul.f32 %v970_v63, %v962_v12  ;;  %v854_v29 = vsel %vm51_vm0, %v846_v11, 0  ;;  %v1264_v60 = vrot.slane %v2076_v41, %v2324_v1  ;;  %v2082_v12 = vld [vmem:[%s2626_s1 + $0x1c] sm:$0xf] }
 0x258   :  { %v1276_v63 = vrot.slane %v2076_v41, %v2326_v4 }
 0x259   :  { %v994_v16 = vpack.c.bf16 %v988_v13, %v988_v13  ;;  %v1103_v17 = vpop.permute.xlu0 %1102  ;;  %v958_v18 = vpop.permute.xlu1 %957  ;;  %v2065_v13 = vld [vmem:[%s2628_s3 + $0x18] sm:$0xf] }
 0x25a   :  { %v960_v20 = vsel %vm959_vm6, %v956_v47, %v958_v18  ;;  %v963_v21 = vsel %vm959_vm6, %v958_v18, %v952_v35  ;;  %v993_v35 = vpack.c.bf16 %v987_v19, %v987_v19  ;;  %v1415_v19 = vrot.slane %v2082_v12, %v2314_v58 }
 0x25b   :  { %v989_v25 = vmul.f32 %v978_v5, %v960_v20  ;;  %v990_v26 = vmul.f32 %v982_v7, %v963_v21  ;;  %2055 = vmatmul.mubr.msk.bf16.vlgmr.msra.gmra.mrb[20].mxu0 %vm47_vm1, %v2053_v15  ;;  %2057 = vmatmul.mubr.msk.bf16.vlgmr.msra.gmra.mrb[20].mxu1 %vm47_vm1, %v2053_v15 }
 0x25c   :  { %866 = vmatpush1.bf16.msra.mxu0 %v854_v29  ;;  %907 = vmatpush1.bf16.msra.mxu1 %v860_v30  ;;  %v1001_v49 = vsel %vm51_vm0, %v993_v35, 0 }
 0x25d   :  { %v996_v31 = vpack.c.bf16 %v990_v26, %v990_v26  ;;  %2066 = vmatprep.subr.msk.bf16.mxu0 %vm51_vm0, %v994_v16  ;;  %v1246_v32 = vpop.permute.xlu0 %1245  ;;  %v1101_v33 = vpop.permute.xlu1 %1100  ;;  %897 = vmatprep.mubr.bf16.mxu0 %v2150_v6  ;;  %v995_v37 = vpack.c.bf16 %v989_v25, %v989_v25 }
 0x25e   :  { %v1108_v34 = vsel %vm1106_vm7, %v1101_v33, %v1103_v17  ;;  %938 = vmatprep.mubr.bf16.mxu1 %v2150_v6  ;;  %v1109_v42 = vsel %vm1106_vm7, %v1099_v61, %v1101_v33 }
 0x25f   :  { %v1135_v38 = vmul.f32 %v1121_v22, %v1108_v34  ;;  %2068 = vmatprep.subr.msk.bf16.mxu1 %vm51_vm0, %v996_v31  ;;  %v1134_v51 = vmul.f32 %v1117_v36, %v1109_v42  ;;  %v1007_v54 = vsel %vm51_vm0, %v995_v37, 0  ;;  %v1411_v31 = vrot.slane %v2082_v12, %v2324_v1  ;;  %v2071_v1 = vld [vmem:[%s2628_s3 + $0x1c] sm:$0xf] }
 0x260   :  { %v1419_v36 = vrot.slane %v2082_v12, %v2316_v59  ;;  %v1423_v34 = vrot.slane %v2082_v12, %v2326_v4 }
 0x261   :  { %v1141_v44 = vpack.c.bf16 %v1135_v38, %v1135_v38  ;;  %v1250_v45 = vpop.permute.xlu0 %1249  ;;  %v1105_v46 = vpop.permute.xlu1 %1104  ;;  %v1140_v0 = vpack.c.bf16 %v1134_v51, %v1134_v51  ;;  %v2096_v51 = vld [vmem:[%s2630_s5 + $0x20] sm:$0xff] }
 0x262   :  { %v1107_v47 = vsel %vm1106_vm7, %v1103_v17, %v1105_v46  ;;  %v1110_v48 = vsel %vm1106_vm7, %v1105_v46, %v1099_v61  ;;  %1674 = vperm.xlu1 %2121, %v2096_v51  }
 0x263   :  { %v1136_v52 = vmul.f32 %v1125_v39, %v1107_v47  ;;  %v1137_v53 = vmul.f32 %v1129_v40, %v1110_v48  ;;  %2061 = vmatmul.mubr.msk.bf16.vlgmr.msra.gmra.mrb[24].mxu0 %vm47_vm1, %v2059_v43  ;;  %2063 = vmatmul.mubr.msk.bf16.vlgmr.msra.gmra.mrb[24].mxu1 %vm47_vm1, %v2059_v43  ;;  %v1148_v22 = vsel %vm51_vm0, %v1140_v0, 0  ;;  %v2077_v47 = vld [vmem:[%s2628_s3 + $0x20] sm:$0xf] }
 0x264   :  { %1013 = vmatpush1.bf16.msra.mxu0 %v1001_v49  ;;  %1054 = vmatpush1.bf16.msra.mxu1 %v1007_v54 }
 0x265   :  { %v1143_v55 = vpack.c.bf16 %v1137_v53, %v1137_v53  ;;  %2072 = vmatprep.subr.msk.bf16.mxu0 %vm51_vm0, %v1141_v44  ;;  %v1248_v56 = vpop.permute.xlu1 %1247  ;;  %1044 = vmatprep.mubr.bf16.mxu0 %v2150_v6  ;;  %v1142_v5 = vpack.c.bf16 %v1136_v52, %v1136_v52  ;;  %v1393_v7 = vpop.permute.xlu0 %1392  ;;  %v1991_v52 = vld [vmem:[%s2631_s6] sm:$0xff] }
 0x266   :  { %v1255_v61 = vsel %vm1253_vm8, %v1248_v56, %v1250_v45  ;;  %1085 = vmatprep.mubr.bf16.mxu1 %v2150_v6  ;;  %v1256_v10 = vsel %vm1253_vm8, %v1246_v32, %v1248_v56  ;;  %1994 = vperm.xlu1 %2121, %v1991_v52  }
 0x267   :  { %v1282_v11 = vmul.f32 %v1268_v50, %v1255_v61  ;;  %2074 = vmatprep.subr.msk.bf16.mxu1 %vm51_vm0, %v1143_v55  ;;  %v1281_v16 = vmul.f32 %v1264_v60, %v1256_v10  ;;  %v1154_v25 = vsel %vm51_vm0, %v1142_v5, 0  ;;  %v2083_v50 = vld [vmem:[%s2628_s3 + $0x24] sm:$0xf] }
 0x269   :  { %v1288_v14 = vpack.c.bf16 %v1282_v11, %v1282_v11  ;;  %v1252_v15 = vpop.permute.xlu1 %1251  ;;  %v1397_v26 = vpop.permute.xlu0 %1396  ;;  %v1287_v58 = vpack.c.bf16 %v1281_v16, %v1281_v16 }
 0x26a   :  { %v1254_v17 = vsel %vm1253_vm8, %v1250_v45, %v1252_v15  ;;  %v1257_v18 = vsel %vm1253_vm8, %v1252_v15, %v1246_v32 }
 0x26b   :  { %v1283_v20 = vmul.f32 %v1272_v62, %v1254_v17  ;;  %v1284_v21 = vmul.f32 %v1276_v63, %v1257_v18  ;;  %2067 = vmatmul.mubr.msk.bf16.vlgmr.msra.gmra.mrb[28].mxu0 %vm47_vm1, %v2065_v13  ;;  %2069 = vmatmul.mubr.msk.bf16.vlgmr.msra.gmra.mrb[28].mxu1 %vm47_vm1, %v2065_v13  ;;  %v1295_v42 = vsel %vm51_vm0, %v1287_v58, 0 }
 0x26c   :  { %1160 = vmatpush1.bf16.msra.mxu0 %v1148_v22  ;;  %1201 = vmatpush1.bf16.msra.mxu1 %v1154_v25 }
 0x26d   :  { %v1290_v29 = vpack.c.bf16 %v1284_v21, %v1284_v21  ;;  %2078 = vmatprep.subr.msk.bf16.mxu0 %vm51_vm0, %v1288_v14  ;;  %v1395_v30 = vpop.permute.xlu1 %1394  ;;  %1191 = vmatprep.mubr.bf16.mxu0 %v2150_v6  ;;  %v1289_v33 = vpack.c.bf16 %v1283_v20, %v1283_v20 }
 0x26e   :  { %v1402_v32 = vsel %vm1400_vm9, %v1395_v30, %v1397_v26  ;;  %1232 = vmatprep.mubr.bf16.mxu1 %v2150_v6  ;;  %v1403_v37 = vsel %vm1400_vm9, %v1393_v7, %v1395_v30 }
 0x26f   :  { %v1429_v35 = vmul.f32 %v1415_v19, %v1402_v32  ;;  %2080 = vmatprep.subr.msk.bf16.mxu1 %vm51_vm0, %v1290_v29  ;;  %v1428_v59 = vmul.f32 %v1411_v31, %v1403_v37  ;;  %v1301_v44 = vsel %vm51_vm0, %v1289_v33, 0 }
 0x271   :  { %v1435_v38 = vpack.c.bf16 %v1429_v35, %v1429_v35  ;;  %v1399_v39 = vpop.permute.xlu1 %1398  ;;  %v1434_v57 = vpack.c.bf16 %v1428_v59, %v1428_v59 }
 0x272   :  { %v1401_v40 = vsel %vm1400_vm9, %v1397_v26, %v1399_v39  ;;  %v1404_v41 = vsel %vm1400_vm9, %v1399_v39, %v1393_v7 }
 0x273   :  { %v1430_v43 = vmul.f32 %v1419_v36, %v1401_v40  ;;  %v1431_v4 = vmul.f32 %v1423_v34, %v1404_v41  ;;  %2073 = vmatmul.mubr.msk.bf16.vlgmr.msra.gmra.mrb[32].mxu0 %vm47_vm1, %v2071_v1  ;;  %2075 = vmatmul.mubr.msk.bf16.vlgmr.msra.gmra.mrb[32].mxu1 %vm47_vm1, %v2071_v1  ;;  %v1442_v48 = vsel %vm51_vm0, %v1434_v57, 0 }
 0x274   :  { %1307 = vmatpush1.bf16.msra.mxu0 %v1295_v42  ;;  %1348 = vmatpush1.bf16.msra.mxu1 %v1301_v44 }
 0x275   :  { %v1437_v45 = vpack.c.bf16 %v1431_v4, %v1431_v4  ;;  %2084 = vmatprep.subr.msk.bf16.mxu0 %vm51_vm0, %v1435_v38  ;;  %1338 = vmatprep.mubr.bf16.mxu0 %v2150_v6  ;;  %v1436_v46 = vpack.c.bf16 %v1430_v43, %v1430_v43 }
 0x276   :  { %1379 = vmatprep.mubr.bf16.mxu1 %v2150_v6 }
 0x277   :  { %2086 = vmatprep.subr.msk.bf16.mxu1 %vm51_vm0, %v1437_v45  ;;  %v1448_v49 = vsel %vm51_vm0, %v1436_v46, 0 }
 0x27b   :  { %2079 = vmatmul.mubr.msk.bf16.vlgmr.msra.gmra.mrb[36].mxu0 %vm47_vm1, %v2077_v47  ;;  %2081 = vmatmul.mubr.msk.bf16.vlgmr.msra.gmra.mrb[36].mxu1 %vm47_vm1, %v2077_v47 }
 0x27c   :  { %1454 = vmatpush1.bf16.msra.mxu0 %v1442_v48  ;;  %1495 = vmatpush1.bf16.msra.mxu1 %v1448_v49 }
 0x27d   :  { %1485 = vmatprep.mubr.bf16.mxu0 %v2150_v6  ;;  %1526 = vmatprep.mubr.bf16.mxu1 %v2150_v6 }
 0x283   :  { %2085 = vmatmul.mubr.msk.bf16.vlgmr.msra.gmra.mrb[40].mxu0 %vm47_vm1, %v2083_v50  ;;  %2087 = vmatmul.mubr.msk.bf16.vlgmr.msra.gmra.mrb[40].mxu1 %vm47_vm1, %v2083_v50 }
 0x284   :  { %1618 = vmatprep.mubr.bf16.mxu0 %v2150_v6  ;;  %1659 = vmatprep.mubr.bf16.mxu1 %v2150_v6 }
 0x316   :  { %v365_v53 = vpop.f32.mrb[8].mxu0  ;;  %v406_v54 = vpop.f32.mrb[8].mxu1 }
 0x317   :  { %v367_v55 = vpop.f32.mrb[9].mxu0  ;;  %v408_v56 = vpop.f32.mrb[9].mxu1 }
 0x318   :  { %v369_v60 = vpop.f32.mrb[10].mxu0  ;;  %v410_v61 = vpop.f32.mrb[10].mxu1 }
 0x319   :  { %v370_v62 = vpop.f32.mrb[11].mxu0  ;;  %v411_v63 = vpop.f32.mrb[11].mxu1 }
 0x31e   :  { %v462_v0 = vpop.f32.mrb[12].mxu0  ;;  %v503_v5 = vpop.f32.mrb[12].mxu1 }
 0x31f   :  { %v463_v7 = vadd.f32 %v462_v0, %v365_v53  ;;  %v504_v10 = vadd.f32 %v503_v5, %v406_v54  ;;  %v464_v11 = vpop.f32.mrb[13].mxu0  ;;  %v505_v12 = vpop.f32.mrb[13].mxu1 }
 0x320   :  { %v465_v13 = vadd.f32 %v464_v11, %v367_v55  ;;  %v506_v14 = vadd.f32 %v505_v12, %v408_v56  ;;  %v466_v15 = vpop.f32.mrb[14].mxu0  ;;  %v507_v16 = vpop.f32.mrb[14].mxu1 }
 0x321   :  { %v467_v17 = vpop.f32.mrb[15].mxu0  ;;  %v508_v18 = vpop.f32.mrb[15].mxu1 }
 0x326   :  { %v605_v19 = vpop.f32.mrb[16].mxu0  ;;  %v646_v20 = vpop.f32.mrb[16].mxu1 }
 0x327   :  { %v653_v21 = vadd.f32 %v605_v19, %v463_v7  ;;  %v655_v22 = vadd.f32 %v646_v20, %v504_v10  ;;  %v607_v25 = vpop.f32.mrb[17].mxu0  ;;  %v648_v26 = vpop.f32.mrb[17].mxu1 }
 0x328   :  { %v654_v29 = vadd.f32 %v607_v25, %v465_v13  ;;  %v656_v30 = vadd.f32 %v648_v26, %v506_v14  ;;  %v609_v58 = vpop.f32.mrb[18].mxu0  ;;  %v650_v31 = vpop.f32.mrb[18].mxu1 }
 0x329   :  { %v610_v32 = vpop.f32.mrb[19].mxu0  ;;  %v651_v33 = vpop.f32.mrb[19].mxu1 }
 0x32e   :  { %v752_v35 = vpop.f32.mrb[20].mxu0  ;;  %v793_v36 = vpop.f32.mrb[20].mxu1 }
 0x32f   :  { %v800_v34 = vadd.f32 %v752_v35, %v653_v21  ;;  %v802_v37 = vadd.f32 %v793_v36, %v655_v22  ;;  %v754_v1 = vpop.f32.mrb[21].mxu0  ;;  %v795_v38 = vpop.f32.mrb[21].mxu1 }
 0x330   :  { %v801_v39 = vadd.f32 %v754_v1, %v654_v29  ;;  %v803_v40 = vadd.f32 %v795_v38, %v656_v30  ;;  %v756_v41 = vpop.f32.mrb[22].mxu0  ;;  %v797_v42 = vpop.f32.mrb[22].mxu1 }
 0x331   :  { %v757_v59 = vpop.f32.mrb[23].mxu0  ;;  %v798_v43 = vpop.f32.mrb[23].mxu1 }
 0x332   :  { %v1544_v38 = vpop.permute.xlu0 %1543 }
 0x336   :  { %v899_v4 = vpop.f32.mrb[24].mxu0  ;;  %v940_v44 = vpop.f32.mrb[24].mxu1 }
 0x337   :  { %v947_v45 = vadd.f32 %v899_v4, %v800_v34  ;;  %v949_v57 = vadd.f32 %v940_v44, %v802_v37  ;;  %v901_v46 = vpop.f32.mrb[25].mxu0  ;;  %v942_v47 = vpop.f32.mrb[25].mxu1 }
 0x338   :  { %v948_v48 = vadd.f32 %v901_v46, %v801_v39  ;;  %v950_v49 = vadd.f32 %v942_v47, %v803_v40  ;;  %v903_v50 = vpop.f32.mrb[26].mxu0  ;;  %v944_v51 = vpop.f32.mrb[26].mxu1 }
 0x339   :  { %v904_v52 = vpop.f32.mrb[27].mxu0  ;;  %v945_v53 = vpop.f32.mrb[27].mxu1 }
 0x33e   :  { %v1046_v54 = vpop.f32.mrb[28].mxu0  ;;  %v1087_v55 = vpop.f32.mrb[28].mxu1 }
 0x33f   :  { %v1094_v56 = vadd.f32 %v1046_v54, %v947_v45  ;;  %v1096_v60 = vadd.f32 %v1087_v55, %v949_v57  ;;  %v1048_v61 = vpop.f32.mrb[29].mxu0  ;;  %v1089_v62 = vpop.f32.mrb[29].mxu1 }
 0x340   :  { %v1095_v63 = vadd.f32 %v1048_v61, %v948_v48  ;;  %v1097_v0 = vadd.f32 %v1089_v62, %v950_v49  ;;  %v1050_v5 = vpop.f32.mrb[30].mxu0  ;;  %v1091_v7 = vpop.f32.mrb[30].mxu1 }
 0x341   :  { %v1051_v10 = vpop.f32.mrb[31].mxu0  ;;  %v1092_v11 = vpop.f32.mrb[31].mxu1 }
 0x346   :  { %v1193_v12 = vpop.f32.mrb[32].mxu0  ;;  %v1234_v13 = vpop.f32.mrb[32].mxu1 }
 0x347   :  { %v1241_v14 = vadd.f32 %v1193_v12, %v1094_v56  ;;  %v1243_v15 = vadd.f32 %v1234_v13, %v1096_v60  ;;  %v1195_v16 = vpop.f32.mrb[33].mxu0  ;;  %v1236_v17 = vpop.f32.mrb[33].mxu1 }
 0x348   :  { %v1242_v18 = vadd.f32 %v1195_v16, %v1095_v63  ;;  %v1244_v19 = vadd.f32 %v1236_v17, %v1097_v0  ;;  %v1197_v20 = vpop.f32.mrb[34].mxu0  ;;  %v1238_v21 = vpop.f32.mrb[34].mxu1 }
 0x349   :  { %v1198_v22 = vpop.f32.mrb[35].mxu0  ;;  %v1239_v25 = vpop.f32.mrb[35].mxu1 }
 0x34a   :  { %v1675_v21 = vpop.permute.xlu1 %1674 }
 0x34e   :  { %v1340_v26 = vpop.f32.mrb[36].mxu0  ;;  %v1381_v29 = vpop.f32.mrb[36].mxu1 }
 0x34f   :  { %v1388_v30 = vadd.f32 %v1340_v26, %v1241_v14  ;;  %v1390_v58 = vadd.f32 %v1381_v29, %v1243_v15  ;;  %v1342_v31 = vpop.f32.mrb[37].mxu0  ;;  %v1383_v32 = vpop.f32.mrb[37].mxu1 }
 0x350   :  { %v1389_v33 = vadd.f32 %v1342_v31, %v1242_v18  ;;  %v1391_v35 = vadd.f32 %v1383_v32, %v1244_v19  ;;  %v1344_v36 = vpop.f32.mrb[38].mxu0  ;;  %v1385_v34 = vpop.f32.mrb[38].mxu1 }
 0x351   :  { %v1345_v37 = vpop.f32.mrb[39].mxu0  ;;  %v1386_v1 = vpop.f32.mrb[39].mxu1 }
 0x356   :  { %v1487_v39 = vpop.f32.mrb[40].mxu0  ;;  %v1528_v40 = vpop.f32.mrb[40].mxu1 }
 0x357   :  { %v1535_v41 = vadd.f32 %v1487_v39, %v1388_v30  ;;  %v1537_v42 = vadd.f32 %v1528_v40, %v1390_v58  ;;  %v1489_v59 = vpop.f32.mrb[41].mxu0  ;;  %v1530_v43 = vpop.f32.mrb[41].mxu1 }
 0x358   :  { %v1536_v4 = vadd.f32 %v1489_v59, %v1389_v33  ;;  %v1538_v44 = vadd.f32 %v1530_v43, %v1391_v35  ;;  %v1491_v45 = vpop.f32.mrb[42].mxu0  ;;  %v1532_v57 = vpop.f32.mrb[42].mxu1 }
 0x359   :  { %v1546_v46 = vadd.f32 %v1544_v38, %v1535_v41  ;;  %v1548_v47 = vadd.f32 %v1544_v38, %v1537_v42  ;;  %v1492_v48 = vpop.f32.mrb[43].mxu0  ;;  %v1533_v49 = vpop.f32.mrb[43].mxu1 }
 0x35a   :  { %v1547_v50 = vadd.f32 %v1544_v38, %v1536_v4  ;;  %v1549_v51 = vadd.f32 %v1544_v38, %v1538_v44 }
 0x35b   :  { %v1550_v52 = vmax.f32 %v1546_v46, 0.0  ;;  %v1552_v53 = vmax.f32 %v1548_v47, 0.0 }
 0x35c   :  { %v1551_v54 = vmax.f32 %v1547_v50, 0.0  ;;  %v1553_v55 = vmax.f32 %v1549_v51, 0.0 }
 0x35d   :  { %v1554_v56 = vadd.f32 %v1550_v52, %v2239_v23  ;;  %v1556_v60 = vadd.f32 %v1552_v53, %v2241_v24  ;;  %v2089_v23 = vld [vmem:[%s2628_s3 + $0x28] sm:$0xf]  ;;  %v2095_v24 = vld [vmem:[%s2627_s2 + $0x4] sm:$0xf] }
 0x35e   :  { %v1555_v61 = vadd.f32 %v1551_v54, %v2243_v27  ;;  %v1557_v62 = vadd.f32 %v1553_v55, %v2245_v28 }
 0x35f   :  { %v1560_v63 = vpack.c.bf16 %v1554_v56, %v1554_v56  ;;  %v1562_v0 = vpack.c.bf16 %v1556_v60, %v1556_v60  ;;  %v2101_v60 = vld [vmem:[%s2629_s4 + $0x4] sm:$0xf] }
 0x360   :  { %v1561_v5 = vpack.c.bf16 %v1555_v61, %v1555_v61  ;;  %v1563_v7 = vpack.c.bf16 %v1557_v62, %v1557_v62 }
 0x361   :  { %v1575_v10 = vsel %vm51_vm0, %v1560_v63, 0  ;;  %v1581_v11 = vsel %vm51_vm0, %v1562_v0, 0  ;;  %v1786_v63 = vld [vmem:[%s2629_s4] sm:$0xf]  ;;  %s2159_s4 = smov [#allocation2]  }
 0x362   :  { %2091 = vmatprep.subr.msk.bf16.mxu0 %vm51_vm0, %v1561_v5  ;;  %2093 = vmatprep.subr.msk.bf16.mxu1 %vm51_vm0, %v1563_v7  ;;  %s2015_s17 = sshll.u32 %s2159_s4, 4  ;;  %s2016_s17 = int_to_ptr.vmem [resolvable:$true] %s2015_s17 }
 0x363   :  { %1587 = vmatpush1.bf16.msra.mxu0 %v1575_v10  ;;  %1628 = vmatpush1.bf16.msra.mxu1 %v1581_v11  ;;  %s2126_s18 = scalar_lea.vmem %s2016_s17, 512  ;;  %p2131_p1 = scmp.lt.s32.totalorder %s2016_s17, %s2016_s17 }
 0x364   :  { %2097 = vmatprep.subr.msk.bf16.mxu0 %vm51_vm0, %v2206_v2  ;;  %2099 = vmatprep.subr.msk.bf16.mxu1 %vm51_vm0, %v2208_v3  ;;  %v1569_v2 = vpop.permute.xlu0 %1568  ;;  %p2127_p0 = scmp.ne.s32.totalorder %s2016_s17, %s2126_s18  ;;  %p2132_p2 = scmp.lt.s32.totalorder %s2126_s18, %s2126_s18 }
 0x366   :  { %2092 = vmatmul.mubr.msk.bf16.vlgmr.msra.gmra.mrb[44].mxu0 %vm47_vm1, %v2089_v23  ;;  %2094 = vmatmul.mubr.msk.bf16.vlgmr.msra.gmra.mrb[44].mxu1 %vm47_vm1, %v2089_v23  ;;  %p2133_p3 = por %p2132_p2, %p2131_p1 }
 0x367   :  { %1681 = vmatpush1.bf16.msra.mxu0 %v2221_v8  ;;  %1722 = vmatpush1.bf16.msra.mxu1 %v2224_v9 }
 0x368   :  { %1712 = vmatprep.mubr.bf16.mxu0 %v2150_v6  ;;  %1753 = vmatprep.mubr.bf16.mxu1 %v2150_v6  ;;  %p2134_p4 = pnand %p2133_p3, %p2127_p0 }
 0x36e   :  { %2098 = vmatmul.mubr.msk.bf16.vlgmr.msra.gmra.mrb[48].mxu0 %vm47_vm1, %v2095_v24  ;;  %2100 = vmatmul.mubr.msk.bf16.vlgmr.msra.gmra.mrb[48].mxu1 %vm47_vm1, %v2095_v24 }
 0x36f   :  { %1844 = vmatprep.mubr.bf16.mxu0 %v2150_v6  ;;  %1885 = vmatprep.mubr.bf16.mxu1 %v2150_v6 }
 0x439   :  { %v1620_v3 = vpop.f32.mrb[44].mxu0  ;;  %v1661_v8 = vpop.f32.mrb[44].mxu1 }
 0x43a   :  { %v1622_v9 = vpop.f32.mrb[45].mxu0  ;;  %v1663_v27 = vpop.f32.mrb[45].mxu1  ;;  %v1621_v28 = vadd.f32 %v1620_v3, %v1569_v2  ;;  %v1662_v12 = vadd.f32 %v1661_v8, %v1569_v2 }
 0x43b   :  { %v1624_v13 = vpop.f32.mrb[46].mxu0  ;;  %v1665_v14 = vpop.f32.mrb[46].mxu1  ;;  %v1623_v15 = vadd.f32 %v1622_v9, %v1569_v2  ;;  %v1664_v16 = vadd.f32 %v1663_v27, %v1569_v2 }
 0x43c   :  { %v1625_v17 = vpop.f32.mrb[47].mxu0  ;;  %v1666_v18 = vpop.f32.mrb[47].mxu1  ;;  %v1766_v19 = vmul.f32 0.1, %v1621_v28  ;;  %v1768_v20 = vmul.f32 0.1, %v1662_v12 }
 0x43d   :  { %vm1762_vm10 = vcmp.gt.f32.partialorder %v1621_v28, 0.0  ;;  %vm1764_vm11 = vcmp.gt.f32.partialorder %v1662_v12, 0.0  ;;  %vm1763_vm12 = vcmp.gt.f32.partialorder %v1623_v15, 0.0  ;;  %v1767_v22 = vmul.f32 0.1, %v1623_v15  ;;  %v1995_v3 = vpop.permute.xlu1 %1994 }
 0x43e   :  { %vm1765_vm13 = vcmp.gt.f32.partialorder %v1664_v16, 0.0  ;;  %v1769_v29 = vmul.f32 0.1, %v1664_v16  ;;  %v1770_v33 = vsel %vm1762_vm10, %v1621_v28, %v1766_v19  ;;  %v1772_v35 = vsel %vm1764_vm11, %v1662_v12, %v1768_v20 }
 0x43f   :  { %v1771_v42 = vsel %vm1763_vm12, %v1623_v15, %v1767_v22  ;;  %v1787_v51 = vpack.c.bf16 %v1770_v33, %v1770_v33  ;;  %v1789_v54 = vpack.c.bf16 %v1772_v35, %v1772_v35 }
 0x440   :  { %v1773_v59 = vsel %vm1765_vm13, %v1664_v16, %v1769_v29  ;;  %v1788_v55 = vpack.c.bf16 %v1771_v42, %v1771_v42 }
 0x441   :  { %v1714_v25 = vpop.f32.mrb[48].mxu0  ;;  %v1755_v26 = vpop.f32.mrb[48].mxu1  ;;  %v1790_v56 = vpack.c.bf16 %v1773_v59, %v1773_v59  ;;  %v1898_v61 = vsel %vm51_vm0, %v1787_v51, 0  ;;  %v1904_v62 = vsel %vm51_vm0, %v1789_v54, 0 }
 0x442   :  { %v1715_v30 = vadd.f32 %v1714_v25, %v1675_v21  ;;  %v1756_v58 = vadd.f32 %v1755_v26, %v1675_v21  ;;  %v1757_v31 = vpop.f32.mrb[49].mxu1  ;;  %v1716_v32 = vpop.f32.mrb[49].mxu0 }
 0x443   :  { %v1758_v36 = vadd.f32 %v1757_v31, %v1675_v21  ;;  %v1717_v34 = vadd.f32 %v1716_v32, %v1675_v21  ;;  %v1718_v37 = vpop.f32.mrb[50].mxu0  ;;  %v1759_v1 = vpop.f32.mrb[50].mxu1 }
 0x444   :  { %vm1774_vm14 = vcmp.gt.f32.partialorder %v1715_v30, 0.0  ;;  %v1778_v38 = vmul.f32 0.1, %v1715_v30  ;;  %vm1776_vm15 = vcmp.gt.f32.partialorder %v1756_v58, 0.0  ;;  %v1780_v39 = vmul.f32 0.1, %v1756_v58 }
 0x445   :  { %vm1777_vm2 = vcmp.gt.f32.partialorder %v1758_v36, 0.0  ;;  %v1781_v40 = vmul.f32 0.1, %v1758_v36  ;;  %vm1775_vm3 = vcmp.gt.f32.partialorder %v1717_v34, 0.0  ;;  %v1779_v41 = vmul.f32 0.1, %v1717_v34 }
 0x446   :  { %v1782_v43 = vsel %vm1774_vm14, %v1715_v30, %v1778_v38  ;;  %v1784_v4 = vsel %vm1776_vm15, %v1756_v58, %v1780_v39  ;;  %v1719_v44 = vpop.f32.mrb[51].mxu0  ;;  %v1760_v45 = vpop.f32.mrb[51].mxu1 }
 0x447   :  { %v1793_v57 = vpack.c.bf16 %v1782_v43, %v1782_v43  ;;  %v1795_v46 = vpack.c.bf16 %v1784_v4, %v1784_v4  ;;  %v1785_v47 = vsel %vm1777_vm2, %v1758_v36, %v1781_v40  ;;  %v1783_v48 = vsel %vm1775_vm3, %v1717_v34, %v1779_v41 }
 0x448   :  { %v1796_v49 = vpack.c.bf16 %v1785_v47, %v1785_v47  ;;  %v1794_v50 = vpack.c.bf16 %v1783_v48, %v1783_v48 }
 0x449   :  { %v1801_v52 = vsel %vm51_vm0, %v1793_v57, 0  ;;  %v1807_v53 = vsel %vm51_vm0, %v1795_v46, 0 }
 0x44a   :  { %2102 = vmatprep.subr.msk.bf16.mxu0 %vm51_vm0, %v1794_v50  ;;  %2104 = vmatprep.subr.msk.bf16.mxu1 %vm51_vm0, %v1796_v49 }
 0x44b   :  { %1813 = vmatpush1.bf16.msra.mxu0 %v1801_v52  ;;  %1854 = vmatpush1.bf16.msra.mxu1 %v1807_v53 }
 0x44c   :  { %2106 = vmatprep.subr.msk.bf16.mxu0 %vm51_vm0, %v1788_v55  ;;  %2108 = vmatprep.subr.msk.bf16.mxu1 %vm51_vm0, %v1790_v56 }
 0x44e   :  { %2103 = vmatmul.mubr.msk.bf16.vlgmr.msra.gmra.mrb[52].mxu0 %vm47_vm1, %v2101_v60  ;;  %2105 = vmatmul.mubr.msk.bf16.vlgmr.msra.gmra.mrb[52].mxu1 %vm47_vm1, %v2101_v60 }
 0x44f   :  { %1910 = vmatpush1.bf16.msra.mxu0 %v1898_v61  ;;  %1951 = vmatpush1.bf16.msra.mxu1 %v1904_v62 }
 0x450   :  { %1941 = vmatprep.mubr.bf16.mxu0 %v2150_v6  ;;  %1982 = vmatprep.mubr.bf16.mxu1 %v2150_v6 }
 0x456   :  { %2107 = vmatmul.mubr.msk.bf16.vlgmr.msra.gmra.mrb[56].mxu0 %vm47_vm1, %v1786_v63  ;;  %2109 = vmatmul.mubr.msk.bf16.vlgmr.msra.gmra.mrb[56].mxu1 %vm47_vm1, %v1786_v63 }
 0x521   :  { %v1846_v0 = vpop.f32.mrb[52].mxu0  ;;  %v1887_v5 = vpop.f32.mrb[52].mxu1 }
 0x522   :  { %v1848_v7 = vpop.f32.mrb[53].mxu0  ;;  %v1889_v10 = vpop.f32.mrb[53].mxu1 }
 0x523   :  { %v1850_v11 = vpop.f32.mrb[54].mxu0  ;;  %v1891_v23 = vpop.f32.mrb[54].mxu1 }
 0x524   :  { %v1851_v24 = vpop.f32.mrb[55].mxu0  ;;  %v1892_v2 = vpop.f32.mrb[55].mxu1 }
 0x529   :  { %v1943_v8 = vpop.f32.mrb[56].mxu0  ;;  %v1984_v9 = vpop.f32.mrb[56].mxu1 }
 0x52a   :  { %v1944_v6 = vadd.f32 %v1943_v8, %v1846_v0  ;;  %v1985_v27 = vadd.f32 %v1984_v9, %v1887_v5  ;;  %v1945_v28 = vpop.f32.mrb[57].mxu0  ;;  %v1986_v12 = vpop.f32.mrb[57].mxu1 }
 0x52b   :  { %v1946_v13 = vadd.f32 %v1945_v28, %v1848_v7  ;;  %v1987_v14 = vadd.f32 %v1986_v12, %v1889_v10  ;;  %v1947_v15 = vpop.f32.mrb[58].mxu0  ;;  %v1988_v16 = vpop.f32.mrb[58].mxu1 }
 0x52c   :  { %v1997_v17 = vadd.f32 %v1995_v3, %v1944_v6  ;;  %v1999_v18 = vadd.f32 %v1995_v3, %v1985_v27  ;;  %v1948_v19 = vpop.f32.mrb[59].mxu0  ;;  %v1989_v20 = vpop.f32.mrb[59].mxu1 }
 0x52d   :  { %v1998_v21 = vadd.f32 %v1995_v3, %v1946_v13  ;;  %v2000_v22 = vadd.f32 %v1995_v3, %v1987_v14 }
 0x52e   :  { %v2001_v25 = vmax.f32 %v1997_v17, 0.0  ;;  %v2003_v26 = vmax.f32 %v1999_v18, 0.0 }
 0x52f   :  { %v2002_v29 = vmax.f32 %v1998_v21, 0.0  ;;  %v2004_v30 = vmax.f32 %v2000_v22, 0.0 }
 0x530   :  { %2005 = vst [vmem:[#allocation2] sm:$0xff] %v2001_v25  ;;  %2007 = vst [vmem:[#allocation2 + $0x10] sm:$0xff] %v2003_v26 }
 0x531   :  { %2006 = vst [vmem:[#allocation2 + $0x8] sm:$0xff] %v2002_v29  ;;  %2008 = vst [vmem:[#allocation2 + $0x18] sm:$0xff] %v2004_v30 }
 0x532   :  { %2137 = shalt.err (!%p2134_p4)
}
 0x533   :  { %s2138_s21 = scalar_lea.hbm %s2632_s7, 512 }
 0x534   :  { %p2139_p5 = scmp.ne.s32.totalorder %s2632_s7, %s2138_s21  ;;  %p2142_p6 = scmp.lt.u32.totalorder %s2138_s21, %s2632_s7 }
 0x536   :  { %p2144_p7 = pnand %p2142_p6, %p2139_p5 }
 0x538   :  { %2147 = shalt.err (!%p2144_p7)
}
 0x539   :  { %2018 = dma.vmem_to_hbm [thread:$0]  %s2016_s17, 512, %s2632_s7, [#allocation3]  }
 0x53a   :  { %2148 = dma.done.wait [#allocation3], 512  }
 0x53b   :  { %2149 = vsyncadd [#allocation3], 4294966784 }
 0x53c   :  { %2022 = vsyncpa [#allocation3], 1 }

</bundles_post_ra>
